<compile_context>
chip_gen: v7x
topology: tpu7x:2x2x1
jax: 0.10.0
libtpu: 0.0.40
codegen_flags: <defaults>
</compile_context>

<pallas_src>
import jax
import jax.numpy as jnp
from jax.experimental import pallas as pl
from jax.experimental.pallas import tpu as pltpu


# -----------------------------------------------------------------------------
# Shapes: logical PyTorch layer dims and their 128-lane-padded counterparts.
# -----------------------------------------------------------------------------
_LAYER_DIMS  = [(832, 832), (832, 416), (416, 208), (208, 104), (104, 1)]
_PADDED_DIMS = [(896, 896), (896, 512), (512, 256), (256, 128), (128, 128)]
_B_OFFSETS   = [0, 896, 1408, 1664, 1792, 1920]   # cumulative padded out-dims
_IN_DIM, _IN_PAD = 832, 896
_OUT_PAD = 128


def _lrelu(x):
    return jnp.where(x > 0, x, 0.01 * x)


# -----------------------------------------------------------------------------
# Fused kernel: ConvNet (cast) + Net (fc1..fc5 with LeakyReLU(0.01)).
#   x_ref      : (1, 896)  input dtype (flattened + zero-padded lane row)
#   w*_ref     : padded W.T tiles, bf16 storage (DMA) -> upcast to f32 compute
#   b_ref      : (1, 1920) f32, all 5 padded biases packed (lane-aligned slices)
#   o_ref      : (1, 128)  f32, lane 0 holds the fc5 scalar
# -----------------------------------------------------------------------------
def fused_kernel(x_ref, w1_ref, w2_ref, w3_ref, w4_ref, w5_ref, b_ref, o_ref):
    h = x_ref[...].astype(jnp.float32)           # ConvNet: x.float()
    w_refs = (w1_ref, w2_ref, w3_ref, w4_ref, w5_ref)
    for i, w_ref in enumerate(w_refs):
        w = w_ref[...].astype(jnp.float32)       # bf16 storage -> f32 compute
        b = b_ref[:, _B_OFFSETS[i]:_B_OFFSETS[i + 1]]
        h = jnp.dot(h, w, preferred_element_type=jnp.float32) + b
        if i < len(w_refs) - 1:
            h = _lrelu(h)
    o_ref[...] = h                               # padded lanes carry zeros


# -----------------------------------------------------------------------------
# Parameter init (PyTorch nn.Linear default: uniform +-1/sqrt(fan_in)),
# stored as W.T in (in, out) layout, weights cast to bf16 once.
# -----------------------------------------------------------------------------
def init_net_params(key):
    params = []
    for i, (fan_in, fan_out) in enumerate(_LAYER_DIMS):
        kw, kb = jax.random.split(jax.random.fold_in(key, i))
        bound = 1.0 / (fan_in ** 0.5)
        w_t = jax.random.uniform(kw, (fan_in, fan_out), jnp.float32, -bound, bound)
        b = jax.random.uniform(kb, (1, fan_out), jnp.float32, -bound, bound)
        params.append((w_t.astype(jnp.bfloat16), b))   # bf16 weights, f32 biases
    return params


def _pad2d(a, rows, cols):
    return jnp.pad(a, ((0, rows - a.shape[0]), (0, cols - a.shape[1])))


def pack_net_params(params):
    """One-time: zero-pad each W.T to 128-lane multiples and pack the 5 biases
    into a single lane-dense (1, 1920) f32 row (one DMA instead of five)."""
    padded_ws, padded_bs = [], []
    for (w_t, b), (pi, po) in zip(params, _PADDED_DIMS):
        padded_ws.append(_pad2d(w_t, pi, po))
        padded_bs.append(_pad2d(b, 1, po))
    return padded_ws, jnp.concatenate(padded_bs, axis=1)


# -----------------------------------------------------------------------------
# Fused forward wrapper: one pallas_call, everything VMEM-resident.
# -----------------------------------------------------------------------------
def fused_forward(x, padded_ws, b_packed):
    # ConvNet.forward's torch.flatten: zero-cost reshape to a lane row, then
    # zero-pad 832 -> 896 lanes (cast to f32 happens inside the kernel).
    x_row = x.reshape(1, _IN_DIM)
    x_row = jnp.pad(x_row, ((0, 0), (0, _IN_PAD - _IN_DIM)))
    vmem = pl.BlockSpec(memory_space=pltpu.MemorySpace.VMEM)
    out = pl.pallas_call(
        fused_kernel,
        out_shape=jax.ShapeDtypeStruct((1, _OUT_PAD), jnp.float32),
        in_specs=[vmem] * 7,
        out_specs=vmem,
        compiler_params=pltpu.CompilerParams(vmem_limit_bytes=8 * 1024 * 1024),
    )(x_row, *padded_ws, b_packed)
    return out[0, :1]   # (1,) — lane 0 is the real fc5 output


# -----------------------------------------------------------------------------
# Pure-JAX references (same bf16 weight values, f32 math).
# -----------------------------------------------------------------------------
def convnet_ref(x):
    # ConvNet.forward: x.float(); torch.flatten(x)
    return x.astype(jnp.float32).reshape(-1)


def net_ref(flat_x, params):
    h = flat_x.reshape(1, -1)
    for i, (w_t, b) in enumerate(params):
        h = jnp.dot(h, w_t.astype(jnp.float32),
                    precision=jax.lax.Precision.HIGHEST) + b
        if i < len(params) - 1:
            h = jnp.where(h > 0, h, 0.01 * h)
    return h.reshape(1)


if __name__ == "__main__":
    key = jax.random.PRNGKey(0)
    kx, kp = jax.random.split(key)

    # 2*4*104 = 832 elements == fc1 in-dim; bf16 so x.float() is exercised.
    x = jax.random.normal(kx, (2, 4, 104), dtype=jnp.bfloat16)

    params = init_net_params(kp)                    # logical params (reference)
    padded_ws, b_packed = pack_net_params(params)   # one-time pad/pack for kernel

    fwd = jax.jit(fused_forward)
    y = fwd(x, padded_ws, b_packed)
    jax.block_until_ready(y)

    flat_ref = convnet_ref(x)                       # ConvNet.forward semantics
    y_ref = net_ref(flat_ref, params)               # dependent Net.forward

    assert flat_ref.shape == (832,) and flat_ref.dtype == jnp.float32
    assert y.shape == (1,) and y.dtype == jnp.float32
    assert jnp.allclose(y, y_ref, atol=1e-2, rtol=1e-2), (y, y_ref)

    print("KERNEL_OK")
</pallas_src>

<mosaic_0001>
module attributes {stable_mosaic.version = 11 : i64} {
  func.func @fused_kernel(%arg0: memref<1x896xbf16, #tpu.memory_space<vmem>>, %arg1: memref<896x896xbf16, #tpu.memory_space<vmem>>, %arg2: memref<896x512xbf16, #tpu.memory_space<vmem>>, %arg3: memref<512x256xbf16, #tpu.memory_space<vmem>>, %arg4: memref<256x128xbf16, #tpu.memory_space<vmem>>, %arg5: memref<128x128xbf16, #tpu.memory_space<vmem>>, %arg6: memref<1x1920xf32, #tpu.memory_space<vmem>>, %arg7: memref<1x128xf32, #tpu.memory_space<vmem>>) attributes {dimension_semantics = [], scalar_prefetch = 0 : i64, scratch_operands = 0 : i64, tpu.core_type = #tpu.core_type<tc>} {
    %c0 = arith.constant 0 : index
    %c0_0 = arith.constant 0 : index
    %0 = vector.load %arg0[%c0, %c0_0] : memref<1x896xbf16, #tpu.memory_space<vmem>>, vector<1x896xbf16>
    %1 = arith.extf %0 : vector<1x896xbf16> to vector<1x896xf32>
    %c0_1 = arith.constant 0 : index
    %c0_2 = arith.constant 0 : index
    %2 = vector.load %arg1[%c0_1, %c0_2] : memref<896x896xbf16, #tpu.memory_space<vmem>>, vector<896x896xbf16>
    %3 = arith.extf %2 : vector<896x896xbf16> to vector<896x896xf32>
    %c0_3 = arith.constant 0 : index
    %c0_4 = arith.constant 0 : index
    %4 = vector.load %arg6[%c0_3, %c0_4] : memref<1x1920xf32, #tpu.memory_space<vmem>>, vector<1x896xf32>
    %cst = arith.constant dense<0.000000e+00> : vector<1x896xf32>
    %5 = tpu.matmul %1, %3, %cst {dimension_numbers = #tpu.dot_dimension_numbers<[1], [0], [0], [1], [0, 0, 1, 1], [], []>} : vector<1x896xf32>, vector<896x896xf32>, vector<1x896xf32> -> vector<1x896xf32>
    %6 = arith.addf %5, %4 : vector<1x896xf32>
    %cst_5 = arith.constant 0.000000e+00 : f32
    %7 = vector.broadcast %cst_5 : f32 to vector<1x896xf32>
    %8 = arith.cmpf ogt, %6, %7 : vector<1x896xf32>
    %cst_6 = arith.constant 0.00999999977 : f32
    %9 = vector.broadcast %cst_6 : f32 to vector<1x896xf32>
    %10 = arith.mulf %9, %6 : vector<1x896xf32>
    %11 = arith.select %8, %6, %10 : vector<1x896xi1>, vector<1x896xf32>
    %c0_7 = arith.constant 0 : index
    %c0_8 = arith.constant 0 : index
    %12 = vector.load %arg2[%c0_7, %c0_8] : memref<896x512xbf16, #tpu.memory_space<vmem>>, vector<896x512xbf16>
    %13 = arith.extf %12 : vector<896x512xbf16> to vector<896x512xf32>
    %c0_9 = arith.constant 0 : index
    %c896 = arith.constant 896 : index
    %14 = vector.load %arg6[%c0_9, %c896] : memref<1x1920xf32, #tpu.memory_space<vmem>>, vector<1x512xf32>
    %cst_10 = arith.constant dense<0.000000e+00> : vector<1x512xf32>
    %15 = tpu.matmul %11, %13, %cst_10 {dimension_numbers = #tpu.dot_dimension_numbers<[1], [0], [0], [1], [0, 0, 1, 1], [], []>} : vector<1x896xf32>, vector<896x512xf32>, vector<1x512xf32> -> vector<1x512xf32>
    %16 = arith.addf %15, %14 : vector<1x512xf32>
    %cst_11 = arith.constant 0.000000e+00 : f32
    %17 = vector.broadcast %cst_11 : f32 to vector<1x512xf32>
    %18 = arith.cmpf ogt, %16, %17 : vector<1x512xf32>
    %cst_12 = arith.constant 0.00999999977 : f32
    %19 = vector.broadcast %cst_12 : f32 to vector<1x512xf32>
    %20 = arith.mulf %19, %16 : vector<1x512xf32>
    %21 = arith.select %18, %16, %20 : vector<1x512xi1>, vector<1x512xf32>
    %c0_13 = arith.constant 0 : index
    %c0_14 = arith.constant 0 : index
    %22 = vector.load %arg3[%c0_13, %c0_14] : memref<512x256xbf16, #tpu.memory_space<vmem>>, vector<512x256xbf16>
    %23 = arith.extf %22 : vector<512x256xbf16> to vector<512x256xf32>
    %c0_15 = arith.constant 0 : index
    %c1408 = arith.constant 1408 : index
    %24 = vector.load %arg6[%c0_15, %c1408] : memref<1x1920xf32, #tpu.memory_space<vmem>>, vector<1x256xf32>
    %cst_16 = arith.constant dense<0.000000e+00> : vector<1x256xf32>
    %25 = tpu.matmul %21, %23, %cst_16 {dimension_numbers = #tpu.dot_dimension_numbers<[1], [0], [0], [1], [0, 0, 1, 1], [], []>} : vector<1x512xf32>, vector<512x256xf32>, vector<1x256xf32> -> vector<1x256xf32>
    %26 = arith.addf %25, %24 : vector<1x256xf32>
    %cst_17 = arith.constant 0.000000e+00 : f32
    %27 = vector.broadcast %cst_17 : f32 to vector<1x256xf32>
    %28 = arith.cmpf ogt, %26, %27 : vector<1x256xf32>
    %cst_18 = arith.constant 0.00999999977 : f32
    %29 = vector.broadcast %cst_18 : f32 to vector<1x256xf32>
    %30 = arith.mulf %29, %26 : vector<1x256xf32>
    %31 = arith.select %28, %26, %30 : vector<1x256xi1>, vector<1x256xf32>
    %c0_19 = arith.constant 0 : index
    %c0_20 = arith.constant 0 : index
    %32 = vector.load %arg4[%c0_19, %c0_20] : memref<256x128xbf16, #tpu.memory_space<vmem>>, vector<256x128xbf16>
    %33 = arith.extf %32 : vector<256x128xbf16> to vector<256x128xf32>
    %c0_21 = arith.constant 0 : index
    %c1664 = arith.constant 1664 : index
    %34 = vector.load %arg6[%c0_21, %c1664] : memref<1x1920xf32, #tpu.memory_space<vmem>>, vector<1x128xf32>
    %cst_22 = arith.constant dense<0.000000e+00> : vector<1x128xf32>
    %35 = tpu.matmul %31, %33, %cst_22 {dimension_numbers = #tpu.dot_dimension_numbers<[1], [0], [0], [1], [0, 0, 1, 1], [], []>} : vector<1x256xf32>, vector<256x128xf32>, vector<1x128xf32> -> vector<1x128xf32>
    %36 = arith.addf %35, %34 : vector<1x128xf32>
    %cst_23 = arith.constant 0.000000e+00 : f32
    %37 = vector.broadcast %cst_23 : f32 to vector<1x128xf32>
    %38 = arith.cmpf ogt, %36, %37 : vector<1x128xf32>
    %cst_24 = arith.constant 0.00999999977 : f32
    %39 = vector.broadcast %cst_24 : f32 to vector<1x128xf32>
    %40 = arith.mulf %39, %36 : vector<1x128xf32>
    %41 = arith.select %38, %36, %40 : vector<1x128xi1>, vector<1x128xf32>
    %c0_25 = arith.constant 0 : index
    %c0_26 = arith.constant 0 : index
    %42 = vector.load %arg5[%c0_25, %c0_26] : memref<128x128xbf16, #tpu.memory_space<vmem>>, vector<128x128xbf16>
    %43 = arith.extf %42 : vector<128x128xbf16> to vector<128x128xf32>
    %c0_27 = arith.constant 0 : index
    %c1792 = arith.constant 1792 : index
    %44 = vector.load %arg6[%c0_27, %c1792] : memref<1x1920xf32, #tpu.memory_space<vmem>>, vector<1x128xf32>
    %cst_28 = arith.constant dense<0.000000e+00> : vector<1x128xf32>
    %45 = tpu.matmul %41, %43, %cst_28 {dimension_numbers = #tpu.dot_dimension_numbers<[1], [0], [0], [1], [0, 0, 1, 1], [], []>} : vector<1x128xf32>, vector<128x128xf32>, vector<1x128xf32> -> vector<1x128xf32>
    %46 = arith.addf %45, %44 : vector<1x128xf32>
    %c0_29 = arith.constant 0 : index
    %c0_30 = arith.constant 0 : index
    %47 = vector.load %arg7[%c0_29, %c0_30] : memref<1x128xf32, #tpu.memory_space<vmem>>, vector<1x128xf32>
    tpu.vector_store %arg7[%c0_29, %c0_30], %46 {strides = array<i32>} : memref<1x128xf32, #tpu.memory_space<vmem>>, vector<1x128xf32>,
    return
  }
}

</mosaic_0001>

<bundles_post_ra>
// kernel: fused_forward.1
= control target key start
LH: loop header
LB: loop body
LE: loop exit
PB: predicated region body
PF: predicated region fallthrough
CT: control target
= control target key end

     0   :  { %12 = vsyncpa [#allocation3], 0  ;;  %s8453_s0 = inlined_call_operand.vmem [shape: bf16[1,896], index: 0, kind: input, shape index: {}]   ;;  %s8454_s1 = inlined_call_operand.hbm [shape: bf16[896,896], index: 1, kind: input, shape index: {}]   ;;  %s8455_s2 = inlined_call_operand.hbm [shape: bf16[896,512], index: 2, kind: input, shape index: {}]   ;;  %s8456_s3 = inlined_call_operand.hbm [shape: bf16[512,256], index: 3, kind: input, shape index: {}]   ;;  %s8457_s4 = inlined_call_operand.hbm [shape: bf16[256,128], index: 4, kind: input, shape index: {}]   ;;  %s8458_s5 = inlined_call_operand.hbm [shape: bf16[128,128], index: 5, kind: input, shape index: {}]   ;;  %s8459_s6 = inlined_call_operand.hbm [shape: f32[1,1920], index: 6, kind: input, shape index: {}]   ;;  %s8460_s7 = inlined_call_operand.hbm [shape: f32[1,128], index: 7, kind: output, shape index: {}]  }
   0x1   :  { %13 = vsyncpa [#allocation6], 0 }
   0x2   :  { %14 = vsyncpa [#allocation9], 0 }
   0x3   :  { %15 = vsyncpa [#allocation12], 0 }
   0x4   :  { %16 = vsyncpa [#allocation4], 0  ;;  %s8139_s24 = smov [#allocation5]   ;;  %s7975_s28 = scalar_lea.hbm %s8455_s2, 28672 }
   0x5   :  { %s36_s25 = sshll.u32 %s8139_s24, 4  ;;  %p7976_p0 = scmp.ne.s32.totalorder %s8455_s2, %s7975_s28  ;;  %s37_s25 = int_to_ptr.vmem [resolvable:$true] %s36_s25 }
   0x6   :  { %p7979_p1 = scmp.lt.u32.totalorder %s7975_s28, %s8455_s2 }
   0x8   :  { %p7981_p2 = pnand %p7979_p1, %p7976_p0 }
   0xa   :  { %7984 = shalt.err (!%p7981_p2)
}
   0xb   :  { %s7985_s10 = scalar_lea.vmem %s37_s25, 28672  ;;  %p7990_p4 = scmp.lt.s32.totalorder %s37_s25, %s37_s25 }
   0xc   :  { %p7986_p3 = scmp.ne.s32.totalorder %s37_s25, %s7985_s10  ;;  %p7991_p5 = scmp.lt.s32.totalorder %s7985_s10, %s7985_s10 }
   0xe   :  { %p7992_p6 = por %p7991_p5, %p7990_p4 }
  0x10   :  { %p7993_p7 = pnand %p7992_p6, %p7986_p3 }
  0x12   :  { %7996 = shalt.err (!%p7993_p7)
}
  0x13   :  { %s8140_s11 = smov 256   ;;  %s8141_s12 = smov 16  }
  0x14   :  { %42 = dma.hbm_to_vmem [thread:$0]  %s8455_s2, 28672, %s37_s25, [#allocation6], %s8140_s11, %s8140_s11, %s8141_s12  }
  0x15   :  { %s8142_s15 = smov [#allocation8]   ;;  %s7997_s19 = scalar_lea.hbm %s8457_s4, 2048 }
  0x16   :  { %s60_s16 = sshll.u32 %s8142_s15, 4  ;;  %p7998_p8 = scmp.ne.s32.totalorder %s8457_s4, %s7997_s19  ;;  %s61_s16 = int_to_ptr.vmem [resolvable:$true] %s60_s16 }
  0x17   :  { %p8001_p9 = scmp.lt.u32.totalorder %s7997_s19, %s8457_s4 }
  0x19   :  { %p8003_p10 = pnand %p8001_p9, %p7998_p8 }
  0x1b   :  { %8006 = shalt.err (!%p8003_p10)
}
  0x1c   :  { %s8007_s24 = scalar_lea.vmem %s61_s16, 2048  ;;  %p8012_p12 = scmp.lt.s32.totalorder %s61_s16, %s61_s16 }
  0x1d   :  { %p8008_p11 = scmp.ne.s32.totalorder %s61_s16, %s8007_s24  ;;  %p8013_p13 = scmp.lt.s32.totalorder %s8007_s24, %s8007_s24 }
  0x1f   :  { %p8014_p0 = por %p8013_p13, %p8012_p12 }
  0x21   :  { %p8015_p1 = pnand %p8014_p0, %p8008_p11 }
  0x23   :  { %8018 = shalt.err (!%p8015_p1)
}
  0x24   :  { %s8143_s2 = smov 64   ;;  %s8144_s25 = smov 4  }
  0x25   :  { %66 = dma.hbm_to_vmem [thread:$0]  %s8457_s4, 2048, %s61_s16, [#allocation9], %s8143_s2, %s8143_s2, %s8144_s25  }
  0x26   :  { %s8145_s28 = smov [#allocation2]   ;;  %s8019_s9 = scalar_lea.hbm %s8454_s1, 50176 }
  0x27   :  { %s24_s29 = sshll.u32 %s8145_s28, 4  ;;  %p8020_p2 = scmp.ne.s32.totalorder %s8454_s1, %s8019_s9  ;;  %s25_s29 = int_to_ptr.vmem [resolvable:$true] %s24_s29 }
  0x28   :  { %p8023_p3 = scmp.lt.u32.totalorder %s8019_s9, %s8454_s1 }
  0x2a   :  { %p8025_p4 = pnand %p8023_p3, %p8020_p2 }
  0x2c   :  { %8028 = shalt.err (!%p8025_p4)
}
  0x2d   :  { %s8029_s14 = scalar_lea.vmem %s25_s29, 50176  ;;  %p8034_p6 = scmp.lt.s32.totalorder %s25_s29, %s25_s29 }
  0x2e   :  { %p8030_p5 = scmp.ne.s32.totalorder %s25_s29, %s8029_s14  ;;  %p8035_p7 = scmp.lt.s32.totalorder %s8029_s14, %s8029_s14 }
  0x30   :  { %p8036_p8 = por %p8035_p7, %p8034_p6 }
  0x32   :  { %p8037_p9 = pnand %p8036_p8, %p8030_p5 }
  0x34   :  { %8040 = shalt.err (!%p8037_p9)
}
  0x35   :  { %s8146_s4 = smov 448   ;;  %s8147_s15 = smov 28  }
  0x36   :  { %30 = dma.hbm_to_vmem [thread:$0]  %s8454_s1, 50176, %s25_s29, [#allocation3], %s8146_s4, %s8146_s4, %s8147_s15  }
  0x37   :  { %s8148_s18 = smov [#allocation7]   ;;  %s8041_s22 = scalar_lea.hbm %s8456_s3, 8192 }
  0x38   :  { %s48_s19 = sshll.u32 %s8148_s18, 4  ;;  %p8042_p10 = scmp.ne.s32.totalorder %s8456_s3, %s8041_s22  ;;  %s49_s19 = int_to_ptr.vmem [resolvable:$true] %s48_s19 }
  0x39   :  { %p8045_p11 = scmp.lt.u32.totalorder %s8041_s22, %s8456_s3 }
  0x3b   :  { %p8047_p12 = pnand %p8045_p11, %p8042_p10 }
  0x3d   :  { %8050 = shalt.err (!%p8047_p12)
}
  0x3e   :  { %s8051_s28 = scalar_lea.vmem %s49_s19, 8192  ;;  %p8056_p0 = scmp.lt.s32.totalorder %s49_s19, %s49_s19 }
  0x3f   :  { %p8052_p13 = scmp.ne.s32.totalorder %s49_s19, %s8051_s28  ;;  %p8057_p1 = scmp.lt.s32.totalorder %s8051_s28, %s8051_s28 }
  0x41   :  { %p8058_p2 = por %p8057_p1, %p8056_p0 }
  0x43   :  { %p8059_p3 = pnand %p8058_p2, %p8052_p13 }
  0x45   :  { %8062 = shalt.err (!%p8059_p3)
}
  0x46   :  { %s8149_s1 = smov 128   ;;  %s8150_s29 = smov 8  }
  0x47   :  { %54 = dma.hbm_to_vmem [thread:$0]  %s8456_s3, 8192, %s49_s19, [#allocation6], %s8149_s1, %s8149_s1, %s8150_s29  }
  0x48   :  { %s8151_s9 = smov [#allocation10]   ;;  %s8152_s11 = smov [#allocation11]  }
  0x49   :  { %s72_s10 = sshll.u32 %s8151_s9, 4  ;;  %s85_s12 = sshll.u32 %s8152_s11, 4  ;;  %s73_s10 = int_to_ptr.vmem [resolvable:$true] %s72_s10  ;;  %s86_s12 = int_to_ptr.vmem [resolvable:$true] %s85_s12 }
  0x4a   :  { %s8063_s4 = scalar_lea.hbm %s8458_s5, 1024 }
  0x4b   :  { %p8064_p4 = scmp.ne.s32.totalorder %s8458_s5, %s8063_s4  ;;  %p8067_p5 = scmp.lt.u32.totalorder %s8063_s4, %s8458_s5 }
  0x4d   :  { %p8069_p6 = pnand %p8067_p5, %p8064_p4 }
  0x4f   :  { %8072 = shalt.err (!%p8069_p6)
}
  0x50   :  { %s8073_s3 = scalar_lea.vmem %s73_s10, 1024  ;;  %p8078_p8 = scmp.lt.s32.totalorder %s73_s10, %s73_s10 }
  0x51   :  { %p8074_p7 = scmp.ne.s32.totalorder %s73_s10, %s8073_s3  ;;  %p8079_p9 = scmp.lt.s32.totalorder %s8073_s3, %s8073_s3 }
  0x53   :  { %p8080_p10 = por %p8079_p9, %p8078_p8 }
  0x55   :  { %p8081_p11 = pnand %p8080_p10, %p8074_p7 }
  0x57   :  { %8084 = shalt.err (!%p8081_p11)
}
  0x58   :  { %78 = dma.hbm_to_vmem [thread:$0]  %s8458_s5, 1024, %s73_s10, [#allocation9], %s8143_s2, %s8143_s2, %s8144_s25  }
  0x59   :  { %s8085_s23 = scalar_lea.hbm %s8459_s6, 240 }
  0x5a   :  { %p8086_p12 = scmp.ne.s32.totalorder %s8459_s6, %s8085_s23  ;;  %p8089_p13 = scmp.lt.u32.totalorder %s8085_s23, %s8459_s6 }
  0x5c   :  { %p8091_p0 = pnand %p8089_p13, %p8086_p12 }
  0x5e   :  { %8094 = shalt.err (!%p8091_p0)
}
  0x5f   :  { %s8095_s1 = scalar_lea.vmem %s86_s12, 240  ;;  %s8099_s29 = scalar_lea.vmem %s86_s12, 256 }
  0x60   :  { %p8096_p1 = scmp.ne.s32.totalorder %s86_s12, %s8095_s1  ;;  %p8100_p2 = scmp.lt.s32.totalorder %s86_s12, %s86_s12 }
  0x61   :  { %p8101_p3 = scmp.lt.s32.totalorder %s8099_s29, %s8095_s1 }
  0x63   :  { %p8102_p4 = por %p8101_p3, %p8100_p2 }
  0x65   :  { %p8103_p5 = pnand %p8102_p4, %p8096_p1 }
  0x67   :  { %8106 = shalt.err (!%p8103_p5)
}
  0x68   :  { %88 = dma.hbm_to_vmem [thread:$0]  %s8459_s6, 240, %s86_s12, [#allocation12]  }
  0x69   :  { %8129 = dma.done.wait [#allocation3], 50176  }
  0x6a   :  { %8130 = vsyncadd [#allocation3], 4294917120 }
  0x6b   :  { %8131 = dma.done.wait [#allocation6], 36864  }
  0x6c   :  { %8132 = vsyncadd [#allocation6], 4294930432 }
  0x6d   :  { %8133 = dma.done.wait [#allocation9], 3072  }
  0x6e   :  { %8134 = vsyncadd [#allocation9], 4294964224 }
  0x6f   :  { %8135 = dma.done.wait [#allocation12], 240  }
  0x70   :  { %8136 = vsyncadd [#allocation12], 4294967056  ;;  %v6983_v0 = vld [vmem:[#allocation2 + $0x4] ss:$28 sps:$4 sm:$0xff]   ;;  %v6985_v1 = vld [vmem:[#allocation2 + $0xc] ss:$28 sps:$4 sm:$0xff]   ;;  %v1345_v38 = vlaneseq }
  0x71   :  { %4818 = vmatprep.subr.bf16.mxu0 %v6983_v0  ;;  %v6987_v2 = vld [vmem:[#allocation2] ss:$28 sps:$4 sm:$0xff]   ;;  %v6988_v3 = vld [vmem:[#allocation2 + $0x8] ss:$28 sps:$4 sm:$0xff]   ;;  %5042 = vmatprep.subr.bf16.mxu1 %v6985_v1  ;;  %v6993_v6 = vld [vmem:[#allocation2 + $0x38] ss:$28 sps:$4 sm:$0xff]  }
  0x72   :  { %v6989_v4 = vld [vmem:[#allocation2 + $0x3c] ss:$28 sps:$4 sm:$0xff]   ;;  %4820 = vmatpush1.bf16.msra.mxu0 %v6987_v2  ;;  %5044 = vmatpush1.bf16.msra.mxu1 %v6988_v3  ;;  %v6991_v5 = vld [vmem:[#allocation2 + $0x44] ss:$28 sps:$4 sm:$0xff]   ;;  %v6995_v8 = vld [vmem:[#allocation2 + $0x74] ss:$28 sps:$4 sm:$0xff]  }
  0x73   :  { %4822 = vmatprep.subr.bf16.mxu0 %v6989_v4  ;;  %v6994_v7 = vld [vmem:[#allocation2 + $0x40] ss:$28 sps:$4 sm:$0xff]   ;;  %5046 = vmatprep.subr.bf16.mxu1 %v6991_v5  ;;  %v6999_v10 = vld [vmem:[#allocation2 + $0x70] ss:$28 sps:$4 sm:$0xff]   ;;  %v7000_v11 = vld [vmem:[#allocation2 + $0x78] ss:$28 sps:$4 sm:$0xff]  }
  0x74   :  { %v6997_v9 = vld [vmem:[#allocation2 + $0x7c] ss:$28 sps:$4 sm:$0xff]   ;;  %v7001_v12 = vld [vmem:[#allocation2 + $0xac] ss:$28 sps:$4 sm:$0xff]   ;;  %v7003_v13 = vld [vmem:[#allocation2 + $0xb4] ss:$28 sps:$4 sm:$0xff]  }
  0x75   :  { %v7005_v14 = vld [vmem:[#allocation2 + $0xa8] ss:$28 sps:$4 sm:$0xff]   ;;  %v7006_v15 = vld [vmem:[#allocation2 + $0xb0] ss:$28 sps:$4 sm:$0xff]   ;;  %v7011_v18 = vld [vmem:[#allocation2 + $0xe0] ss:$28 sps:$4 sm:$0xff]  }
  0x76   :  { %4824 = vmatpush1.bf16.msra.mxu0 %v6993_v6  ;;  %5048 = vmatpush1.bf16.msra.mxu1 %v6994_v7  ;;  %v7007_v16 = vld [vmem:[#allocation2 + $0xe4] ss:$28 sps:$4 sm:$0xff]   ;;  %v7009_v17 = vld [vmem:[#allocation2 + $0xec] ss:$28 sps:$4 sm:$0xff]   ;;  %v7013_v20 = vld [vmem:[#allocation2 + $0x11c] ss:$28 sps:$4 sm:$0xff]  }
  0x77   :  { %4826 = vmatprep.subr.bf16.mxu0 %v6995_v8  ;;  %5050 = vmatprep.subr.bf16.mxu1 %v6997_v9  ;;  %v7012_v19 = vld [vmem:[#allocation2 + $0xe8] ss:$28 sps:$4 sm:$0xff]   ;;  %v7017_v22 = vld [vmem:[#allocation2 + $0x118] ss:$28 sps:$4 sm:$0xff]   ;;  %v7018_v23 = vld [vmem:[#allocation2 + $0x120] ss:$28 sps:$4 sm:$0xff]  }
  0x78   :  { %v7015_v21 = vld [vmem:[#allocation2 + $0x124] ss:$28 sps:$4 sm:$0xff]   ;;  %v7019_v24 = vld [vmem:[#allocation2 + $0x154] ss:$28 sps:$4 sm:$0xff]   ;;  %v7021_v25 = vld [vmem:[#allocation2 + $0x15c] ss:$28 sps:$4 sm:$0xff]  }
  0x79   :  { %v7023_v26 = vld [vmem:[#allocation2 + $0x150] ss:$28 sps:$4 sm:$0xff]   ;;  %v7024_v27 = vld [vmem:[#allocation2 + $0x158] ss:$28 sps:$4 sm:$0xff]   ;;  %v7029_v30 = vld [vmem:[#allocation2 + $0x188] ss:$28 sps:$4 sm:$0xff]  }
  0x7a   :  { %4828 = vmatpush1.bf16.msra.mxu0 %v6999_v10  ;;  %5052 = vmatpush1.bf16.msra.mxu1 %v7000_v11  ;;  %v7025_v28 = vld [vmem:[#allocation2 + $0x18c] ss:$28 sps:$4 sm:$0xff]   ;;  %v7027_v29 = vld [vmem:[#allocation2 + $0x194] ss:$28 sps:$4 sm:$0xff]   ;;  %v7031_v32 = vld [vmem:[#allocation2 + $0x1c4] ss:$28 sps:$4 sm:$0xff]  }
  0x7b   :  { %4830 = vmatprep.subr.bf16.mxu0 %v7001_v12  ;;  %5054 = vmatprep.subr.bf16.mxu1 %v7003_v13  ;;  %v7030_v31 = vld [vmem:[#allocation2 + $0x190] ss:$28 sps:$4 sm:$0xff]   ;;  %v7035_v34 = vld [vmem:[#allocation2 + $0x1c0] ss:$28 sps:$4 sm:$0xff]   ;;  %v7036_v35 = vld [vmem:[#allocation2 + $0x1c8] ss:$28 sps:$4 sm:$0xff]  }
  0x7c   :  { %v7033_v33 = vld [vmem:[#allocation2 + $0x1cc] ss:$28 sps:$4 sm:$0xff]   ;;  %v7037_v36 = vld [vmem:[#allocation2 + $0x1fc] ss:$28 sps:$4 sm:$0xff]   ;;  %v7039_v37 = vld [vmem:[#allocation2 + $0x204] ss:$28 sps:$4 sm:$0xff]  }
  0x7d   :  { %v7041_v39 = vld [vmem:[#allocation2 + $0x1f8] ss:$28 sps:$4 sm:$0xff]   ;;  %v7042_v40 = vld [vmem:[#allocation2 + $0x200] ss:$28 sps:$4 sm:$0xff]   ;;  %v8275_v43 = vshrl.u32 %v1345_v38, 7  ;;  %vm8155_vm0 = vmmov 0  }
  0x7e   :  { %4832 = vmatpush1.bf16.msra.mxu0 %v7005_v14  ;;  %5056 = vmatpush1.bf16.msra.mxu1 %v7006_v15  ;;  %v7043_v41 = vld [vmem:[#allocation2 + $0x234] ss:$28 sps:$4 sm:$0xff]   ;;  %v7045_v42 = vld [vmem:[#allocation2 + $0x23c] ss:$28 sps:$4 sm:$0xff]   ;;  %v7049_v46 = vld [vmem:[#allocation2 + $0x26c] ss:$28 sps:$4 sm:$0xff]  }
  0x7f   :  { %4834 = vmatprep.subr.bf16.mxu0 %v7007_v16  ;;  %5058 = vmatprep.subr.bf16.mxu1 %v7009_v17  ;;  %v7047_v44 = vld [vmem:[#allocation2 + $0x230] ss:$28 sps:$4 sm:$0xff]   ;;  %v7048_v45 = vld [vmem:[#allocation2 + $0x238] ss:$28 sps:$4 sm:$0xff]   ;;  %v8278_v48 = vsub.s32 2, %v8275_v43  ;;  %v8295_v5 = vsub.s32 0, %v8275_v43 }
  0x80   :  { %v7051_v47 = vld [vmem:[#allocation2 + $0x274] ss:$28 sps:$4 sm:$0xff]   ;;  %v7053_v50 = vld [vmem:[#allocation2 + $0x268] ss:$28 sps:$4 sm:$0xff]   ;;  %v7059_v56 = vld [vmem:[#allocation2 + $0x2a0] ss:$28 sps:$4 sm:$0xff]  }
  0x81   :  { %v8283_v49 = vld [vmem:[%s8453_s0] sm:$0x7f]  ;;  %v7055_v53 = vld [vmem:[#allocation2 + $0x2a4] ss:$28 sps:$4 sm:$0xff]   ;;  %v7057_v54 = vld [vmem:[#allocation2 + $0x2ac] ss:$28 sps:$4 sm:$0xff]  }
  0x82   :  { %4836 = vmatpush1.bf16.msra.mxu0 %v7011_v18  ;;  %5060 = vmatpush1.bf16.msra.mxu1 %v7012_v19  ;;  %v8286_v51 = vunpack.c.l.bf16 %v8283_v49  ;;  %v7054_v52 = vld [vmem:[#allocation2 + $0x270] ss:$28 sps:$4 sm:$0xff]   ;;  %v7060_v57 = vld [vmem:[#allocation2 + $0x2a8] ss:$28 sps:$4 sm:$0xff]   ;;  %v7061_v58 = vld [vmem:[#allocation2 + $0x2dc] ss:$28 sps:$4 sm:$0xff]  }
  0x83   :  { %4838 = vmatprep.subr.bf16.mxu0 %v7013_v20  ;;  %5062 = vmatprep.subr.bf16.mxu1 %v7015_v21  ;;  %v7063_v59 = vld [vmem:[#allocation2 + $0x2e4] ss:$28 sps:$4 sm:$0xff]   ;;  %v7065_v60 = vld [vmem:[#allocation2 + $0x2d8] ss:$28 sps:$4 sm:$0xff]   ;;  %v7071_v0 = vld [vmem:[#allocation2 + $0x310] ss:$28 sps:$4 sm:$0xff]  }
  0x84   :  { %v8290_v55 = vrot.slane %v8286_v51, %v8278_v48  ;;  %v7066_v61 = vld [vmem:[#allocation2 + $0x2e0] ss:$28 sps:$4 sm:$0xff]   ;;  %v7067_v62 = vld [vmem:[#allocation2 + $0x314] ss:$28 sps:$4 sm:$0xff]   ;;  %v7073_v2 = vld [vmem:[#allocation2 + $0x34c] ss:$28 sps:$4 sm:$0xff]   ;;  %v8300_v11 = vrot.slane %v8286_v51, %v8295_v5 }
  0x85   :  { %v7069_v63 = vld [vmem:[#allocation2 + $0x31c] ss:$28 sps:$4 sm:$0xff]   ;;  %v7075_v3 = vld [vmem:[#allocation2 + $0x354] ss:$28 sps:$4 sm:$0xff]   ;;  %v7077_v4 = vld [vmem:[#allocation2 + $0x348] ss:$28 sps:$4 sm:$0xff]  }
  0x86   :  { %4840 = vmatpush1.bf16.msra.mxu0 %v7017_v22  ;;  %5064 = vmatpush1.bf16.msra.mxu1 %v7018_v23  ;;  %v7072_v1 = vld [vmem:[#allocation2 + $0x318] ss:$28 sps:$4 sm:$0xff]   ;;  %v7078_v6 = vld [vmem:[#allocation2 + $0x350] ss:$28 sps:$4 sm:$0xff]   ;;  %v7079_v7 = vld [vmem:[#allocation2 + $0x384] ss:$28 sps:$4 sm:$0xff]  }
  0x87   :  { %4842 = vmatprep.subr.bf16.mxu0 %v7019_v24  ;;  %5066 = vmatprep.subr.bf16.mxu1 %v7021_v25  ;;  %v7082_v8 = vld [vmem:[#allocation2 + $0x38c] ss:$28 sps:$4 sm:$0xff]   ;;  %v1359_v9 = vsub.s32 6, %v8275_v43  ;;  %v7081_v10 = vld [vmem:[#allocation2 + $0x380] ss:$28 sps:$4 sm:$0xff]   ;;  %s8156_s0 = smov [#allocation13]  }
  0x88   :  { %1480 = vmatprep.mubr.f32.mxu0 %v8290_v55  ;;  %1764 = vmatprep.mubr.f32.mxu1 %v8290_v55  ;;  %v7084_v12 = vld [vmem:[#allocation2 + $0x388] ss:$28 sps:$4 sm:$0xff]   ;;  %v7085_v13 = vld [vmem:[#allocation2 + $0x3bc] ss:$28 sps:$4 sm:$0xff]   ;;  %v7091_v18 = vld [vmem:[#allocation2 + $0x3f4] ss:$28 sps:$4 sm:$0xff]  }
  0x89   :  { %v7088_v14 = vld [vmem:[#allocation2 + $0x3c4] ss:$28 sps:$4 sm:$0xff]   ;;  %v8305_v15 = vrot.slane %v8286_v51, %v1359_v9  ;;  %v7087_v16 = vld [vmem:[#allocation2 + $0x3b8] ss:$28 sps:$4 sm:$0xff]   ;;  %v7093_v20 = vld [vmem:[#allocation2 + $0x3f0] ss:$28 sps:$4 sm:$0xff]  }
  0x8a   :  { %4844 = vmatpush1.bf16.msra.mxu0 %v7023_v26  ;;  %5068 = vmatpush1.bf16.msra.mxu1 %v7024_v27  ;;  %v7090_v17 = vld [vmem:[#allocation2 + $0x3c0] ss:$28 sps:$4 sm:$0xff]   ;;  %v7096_v21 = vld [vmem:[#allocation2 + $0x3f8] ss:$28 sps:$4 sm:$0xff]   ;;  %v7097_v22 = vld [vmem:[#allocation2 + $0x42c] ss:$28 sps:$4 sm:$0xff]  }
  0x8b   :  { %4846 = vmatprep.subr.bf16.mxu0 %v7025_v28  ;;  %5070 = vmatprep.subr.bf16.mxu1 %v7027_v29  ;;  %v7094_v19 = vld [vmem:[#allocation2 + $0x3fc] ss:$28 sps:$4 sm:$0xff]   ;;  %v7100_v23 = vld [vmem:[#allocation2 + $0x434] ss:$28 sps:$4 sm:$0xff]   ;;  %v7099_v24 = vld [vmem:[#allocation2 + $0x428] ss:$28 sps:$4 sm:$0xff]  }
  0x8c   :  { %v7102_v25 = vld [vmem:[#allocation2 + $0x430] ss:$28 sps:$4 sm:$0xff]   ;;  %v7103_v26 = vld [vmem:[#allocation2 + $0x464] ss:$28 sps:$4 sm:$0xff]   ;;  %s4443_s30 = sshll.u32 %s8156_s0, 4  ;;  %s4444_s30 = int_to_ptr.vmem [resolvable:$true] %s4443_s30 }
  0x8d   :  { %v7106_v27 = vld [vmem:[#allocation2 + $0x46c] ss:$28 sps:$4 sm:$0xff]   ;;  %v7105_v28 = vld [vmem:[#allocation2 + $0x460] ss:$28 sps:$4 sm:$0xff]   ;;  %s8107_s8 = scalar_lea.vmem %s4444_s30, 16  ;;  %s8111_s9 = scalar_lea.vmem %s4444_s30, 32 }
  0x8e   :  { %4848 = vmatpush1.bf16.msra.mxu0 %v7029_v30  ;;  %5072 = vmatpush1.bf16.msra.mxu1 %v7030_v31  ;;  %v7108_v29 = vld [vmem:[#allocation2 + $0x468] ss:$28 sps:$4 sm:$0xff]   ;;  %v7109_v30 = vld [vmem:[#allocation2 + $0x49c] ss:$28 sps:$4 sm:$0xff]   ;;  %p8108_p6 = scmp.ne.s32.totalorder %s4444_s30, %s8107_s8  ;;  %p8112_p7 = scmp.lt.s32.totalorder %s4444_s30, %s4444_s30 }
  0x8f   :  { %4850 = vmatprep.subr.bf16.mxu0 %v7031_v32  ;;  %5074 = vmatprep.subr.bf16.mxu1 %v7033_v33  ;;  %v7112_v31 = vld [vmem:[#allocation2 + $0x4a4] ss:$28 sps:$4 sm:$0xff]   ;;  %v7111_v32 = vld [vmem:[#allocation2 + $0x498] ss:$28 sps:$4 sm:$0xff]   ;;  %v7121_v38 = vld [vmem:[#allocation2 + $0x50c] ss:$28 sps:$4 sm:$0xff]   ;;  %p8113_p8 = scmp.lt.s32.totalorder %s8111_s9, %s8107_s8 }
  0x90   :  { %v7114_v33 = vld [vmem:[#allocation2 + $0x4a0] ss:$28 sps:$4 sm:$0xff]  }
  0x91   :  { %p8114_p9 = por %p8113_p8, %p8112_p7 }
  0x92   :  { %4852 = vmatpush1.bf16.msra.mxu0 %v7035_v34  ;;  %5076 = vmatpush1.bf16.msra.mxu1 %v7036_v35  ;;  %v7115_v34 = vld [vmem:[#allocation2 + $0x4d4] ss:$28 sps:$4 sm:$0xff]   ;;  %v7118_v35 = vld [vmem:[#allocation2 + $0x4dc] ss:$28 sps:$4 sm:$0xff]  }
  0x93   :  { %4854 = vmatprep.subr.bf16.mxu0 %v7037_v36  ;;  %5078 = vmatprep.subr.bf16.mxu1 %v7039_v37  ;;  %v7117_v36 = vld [vmem:[#allocation2 + $0x4d0] ss:$28 sps:$4 sm:$0xff]   ;;  %v7120_v37 = vld [vmem:[#allocation2 + $0x4d8] ss:$28 sps:$4 sm:$0xff]   ;;  %p8115_p10 = pnand %p8114_p9, %p8108_p6 }
  0x96   :  { %4856 = vmatpush1.bf16.msra.mxu0 %v7041_v39  ;;  %5080 = vmatpush1.bf16.msra.mxu1 %v7042_v40  ;;  %v7124_v39 = vld [vmem:[#allocation2 + $0x514] ss:$28 sps:$4 sm:$0xff]   ;;  %v7123_v40 = vld [vmem:[#allocation2 + $0x508] ss:$28 sps:$4 sm:$0xff]  }
  0x97   :  { %4858 = vmatprep.subr.bf16.mxu0 %v7043_v41  ;;  %5082 = vmatprep.subr.bf16.mxu1 %v7045_v42  ;;  %v7126_v41 = vld [vmem:[#allocation2 + $0x510] ss:$28 sps:$4 sm:$0xff]   ;;  %v7127_v42 = vld [vmem:[#allocation2 + $0x544] ss:$28 sps:$4 sm:$0xff]  }
  0x9a   :  { %4860 = vmatpush1.bf16.msra.mxu0 %v7047_v44  ;;  %5084 = vmatpush1.bf16.msra.mxu1 %v7048_v45  ;;  %v7130_v44 = vld [vmem:[#allocation2 + $0x54c] ss:$28 sps:$4 sm:$0xff]   ;;  %v7129_v45 = vld [vmem:[#allocation2 + $0x540] ss:$28 sps:$4 sm:$0xff]  }
  0x9b   :  { %4862 = vmatprep.subr.bf16.mxu0 %v7049_v46  ;;  %5086 = vmatprep.subr.bf16.mxu1 %v7051_v47  ;;  %v7132_v46 = vld [vmem:[#allocation2 + $0x548] ss:$28 sps:$4 sm:$0xff]   ;;  %v7133_v47 = vld [vmem:[#allocation2 + $0x57c] ss:$28 sps:$4 sm:$0xff]  }
  0x9e   :  { %4864 = vmatpush1.bf16.msra.mxu0 %v7053_v50  ;;  %5088 = vmatpush1.bf16.msra.mxu1 %v7054_v52  ;;  %v7136_v50 = vld [vmem:[#allocation2 + $0x584] ss:$28 sps:$4 sm:$0xff]   ;;  %v7135_v52 = vld [vmem:[#allocation2 + $0x578] ss:$28 sps:$4 sm:$0xff]  }
  0x9f   :  { %4866 = vmatprep.subr.bf16.mxu0 %v7055_v53  ;;  %5090 = vmatprep.subr.bf16.mxu1 %v7057_v54  ;;  %v7138_v53 = vld [vmem:[#allocation2 + $0x580] ss:$28 sps:$4 sm:$0xff]   ;;  %v7139_v54 = vld [vmem:[#allocation2 + $0x5b4] ss:$28 sps:$4 sm:$0xff]  }
  0xa2   :  { %4868 = vmatpush1.bf16.msra.mxu0 %v7059_v56  ;;  %5092 = vmatpush1.bf16.msra.mxu1 %v7060_v57  ;;  %v7142_v56 = vld [vmem:[#allocation2 + $0x5bc] ss:$28 sps:$4 sm:$0xff]   ;;  %v7141_v57 = vld [vmem:[#allocation2 + $0x5b0] ss:$28 sps:$4 sm:$0xff]  }
  0xa3   :  { %4870 = vmatprep.subr.bf16.mxu0 %v7061_v58  ;;  %5094 = vmatprep.subr.bf16.mxu1 %v7063_v59  ;;  %v7144_v58 = vld [vmem:[#allocation2 + $0x5b8] ss:$28 sps:$4 sm:$0xff]   ;;  %v7145_v59 = vld [vmem:[#allocation2 + $0x5ec] ss:$28 sps:$4 sm:$0xff]  }
  0xa6   :  { %4872 = vmatpush1.bf16.msra.mxu0 %v7065_v60  ;;  %5096 = vmatpush1.bf16.msra.mxu1 %v7066_v61  ;;  %v7148_v60 = vld [vmem:[#allocation2 + $0x5f4] ss:$28 sps:$4 sm:$0xff]   ;;  %v7147_v61 = vld [vmem:[#allocation2 + $0x5e8] ss:$28 sps:$4 sm:$0xff]  }
  0xa7   :  { %4874 = vmatprep.subr.bf16.mxu0 %v7067_v62  ;;  %5098 = vmatprep.subr.bf16.mxu1 %v7069_v63  ;;  %v7150_v62 = vld [vmem:[#allocation2 + $0x5f0] ss:$28 sps:$4 sm:$0xff]   ;;  %v7151_v63 = vld [vmem:[#allocation2 + $0x624] ss:$28 sps:$4 sm:$0xff]  }
  0xaa   :  { %4876 = vmatpush1.bf16.msra.mxu0 %v7071_v0  ;;  %5100 = vmatpush1.bf16.msra.mxu1 %v7072_v1  ;;  %v7154_v0 = vld [vmem:[#allocation2 + $0x62c] ss:$28 sps:$4 sm:$0xff]   ;;  %v7153_v1 = vld [vmem:[#allocation2 + $0x620] ss:$28 sps:$4 sm:$0xff]  }
  0xab   :  { %4878 = vmatprep.subr.bf16.mxu0 %v7073_v2  ;;  %5102 = vmatprep.subr.bf16.mxu1 %v7075_v3  ;;  %v7156_v2 = vld [vmem:[#allocation2 + $0x628] ss:$28 sps:$4 sm:$0xff]   ;;  %v7157_v3 = vld [vmem:[#allocation2 + $0x65c] ss:$28 sps:$4 sm:$0xff]  }
  0xae   :  { %4880 = vmatpush1.bf16.msra.mxu0 %v7077_v4  ;;  %5104 = vmatpush1.bf16.msra.mxu1 %v7078_v6  ;;  %v7160_v4 = vld [vmem:[#allocation2 + $0x664] ss:$28 sps:$4 sm:$0xff]   ;;  %v7159_v6 = vld [vmem:[#allocation2 + $0x658] ss:$28 sps:$4 sm:$0xff]  }
  0xaf   :  { %4882 = vmatprep.subr.bf16.mxu0 %v7079_v7  ;;  %5106 = vmatprep.subr.bf16.mxu1 %v7082_v8  ;;  %v7162_v7 = vld [vmem:[#allocation2 + $0x660] ss:$28 sps:$4 sm:$0xff]   ;;  %v7163_v8 = vld [vmem:[#allocation2 + $0x694] ss:$28 sps:$4 sm:$0xff]  }
  0xb1   :  { %1481 = vmatmul.mubr.f32.vlgmr.msra.gmra.mrb[0].mxu0 %v8300_v11  ;;  %1765 = vmatmul.mubr.f32.vlgmr.msra.gmra.mrb[0].mxu1 %v8300_v11 }
  0xb2   :  { %4884 = vmatpush1.bf16.msra.mxu0 %v7081_v10  ;;  %5108 = vmatpush1.bf16.msra.mxu1 %v7084_v12  ;;  %v7166_v10 = vld [vmem:[#allocation2 + $0x69c] ss:$28 sps:$4 sm:$0xff]   ;;  %v7165_v12 = vld [vmem:[#allocation2 + $0x690] ss:$28 sps:$4 sm:$0xff]  }
  0xb3   :  { %4886 = vmatprep.subr.bf16.mxu0 %v7085_v13  ;;  %5110 = vmatprep.subr.bf16.mxu1 %v7088_v14  ;;  %v7168_v13 = vld [vmem:[#allocation2 + $0x698] ss:$28 sps:$4 sm:$0xff]   ;;  %v7169_v14 = vld [vmem:[#allocation2 + $0x6cc] ss:$28 sps:$4 sm:$0xff]  }
  0xb4   :  { %1551 = vmatprep.mubr.f32.mxu0 %v8305_v15  ;;  %1835 = vmatprep.mubr.f32.mxu1 %v8305_v15 }
  0xb6   :  { %4888 = vmatpush1.bf16.msra.mxu0 %v7087_v16  ;;  %5112 = vmatpush1.bf16.msra.mxu1 %v7090_v17  ;;  %v7172_v16 = vld [vmem:[#allocation2 + $0x6d4] ss:$28 sps:$4 sm:$0xff]   ;;  %v7171_v17 = vld [vmem:[#allocation2 + $0x6c8] ss:$28 sps:$4 sm:$0xff]  }
  0xb7   :  { %4890 = vmatprep.subr.bf16.mxu0 %v7091_v18  ;;  %5114 = vmatprep.subr.bf16.mxu1 %v7094_v19  ;;  %v8312_v18 = vsub.s32 4, %v8275_v43  ;;  %v7174_v19 = vld [vmem:[#allocation2 + $0x6d0] ss:$28 sps:$4 sm:$0xff]  }
  0xba   :  { %4892 = vmatpush1.bf16.msra.mxu0 %v7093_v20  ;;  %5116 = vmatpush1.bf16.msra.mxu1 %v7096_v21  ;;  %v7175_v20 = vld [vmem:[#allocation2 + $0x704] ss:$28 sps:$4 sm:$0xff]   ;;  %v7178_v21 = vld [vmem:[#allocation2 + $0x70c] ss:$28 sps:$4 sm:$0xff]  }
  0xbb   :  { %4894 = vmatprep.subr.bf16.mxu0 %v7097_v22  ;;  %5118 = vmatprep.subr.bf16.mxu1 %v7100_v23  ;;  %v8315_v22 = vunpack.c.h.bf16 %v8283_v49  ;;  %v7177_v23 = vld [vmem:[#allocation2 + $0x700] ss:$28 sps:$4 sm:$0xff]   ;;  %v7183_v49 = vld [vmem:[#allocation2 + $0x738] ss:$28 sps:$4 sm:$0xff]  }
  0xbe   :  { %4896 = vmatpush1.bf16.msra.mxu0 %v7099_v24  ;;  %5120 = vmatpush1.bf16.msra.mxu1 %v7102_v25  ;;  %v8319_v24 = vrot.slane %v8286_v51, %v8312_v18  ;;  %v7180_v25 = vld [vmem:[#allocation2 + $0x708] ss:$28 sps:$4 sm:$0xff]   ;;  %v7186_v51 = vld [vmem:[#allocation2 + $0x740] ss:$28 sps:$4 sm:$0xff]  }
  0xbf   :  { %4898 = vmatprep.subr.bf16.mxu0 %v7103_v26  ;;  %5122 = vmatprep.subr.bf16.mxu1 %v7106_v27  ;;  %v7181_v26 = vld [vmem:[#allocation2 + $0x73c] ss:$28 sps:$4 sm:$0xff]   ;;  %v7184_v27 = vld [vmem:[#allocation2 + $0x744] ss:$28 sps:$4 sm:$0xff]  }
  0xc2   :  { %4900 = vmatpush1.bf16.msra.mxu0 %v7105_v28  ;;  %5124 = vmatpush1.bf16.msra.mxu1 %v7108_v29  ;;  %v8323_v28 = vrot.slane %v8315_v22, %v8278_v48  ;;  %v7187_v29 = vld [vmem:[#allocation2 + $0x774] ss:$28 sps:$4 sm:$0xff]  }
  0xc3   :  { %4902 = vmatprep.subr.bf16.mxu0 %v7109_v30  ;;  %5126 = vmatprep.subr.bf16.mxu1 %v7112_v31  ;;  %v7190_v30 = vld [vmem:[#allocation2 + $0x77c] ss:$28 sps:$4 sm:$0xff]   ;;  %v7189_v31 = vld [vmem:[#allocation2 + $0x770] ss:$28 sps:$4 sm:$0xff]  }
  0xc6   :  { %4904 = vmatpush1.bf16.msra.mxu0 %v7111_v32  ;;  %5128 = vmatpush1.bf16.msra.mxu1 %v7114_v33  ;;  %v7192_v32 = vld [vmem:[#allocation2 + $0x778] ss:$28 sps:$4 sm:$0xff]   ;;  %v7193_v33 = vld [vmem:[#allocation2 + $0x7ac] ss:$28 sps:$4 sm:$0xff]  }
  0xc7   :  { %4906 = vmatprep.subr.bf16.mxu0 %v7115_v34  ;;  %5130 = vmatprep.subr.bf16.mxu1 %v7118_v35  ;;  %v7196_v34 = vld [vmem:[#allocation2 + $0x7b4] ss:$28 sps:$4 sm:$0xff]   ;;  %v7195_v35 = vld [vmem:[#allocation2 + $0x7a8] ss:$28 sps:$4 sm:$0xff]  }
  0xca   :  { %4908 = vmatpush1.bf16.msra.mxu0 %v7117_v36  ;;  %5132 = vmatpush1.bf16.msra.mxu1 %v7120_v37  ;;  %v7198_v36 = vld [vmem:[#allocation2 + $0x7b0] ss:$28 sps:$4 sm:$0xff]   ;;  %v7199_v37 = vld [vmem:[#allocation2 + $0x7e4] ss:$28 sps:$4 sm:$0xff]  }
  0xcb   :  { %4910 = vmatprep.subr.bf16.mxu0 %v7121_v38  ;;  %5134 = vmatprep.subr.bf16.mxu1 %v7124_v39  ;;  %v7202_v38 = vld [vmem:[#allocation2 + $0x7ec] ss:$28 sps:$4 sm:$0xff]   ;;  %v7201_v39 = vld [vmem:[#allocation2 + $0x7e0] ss:$28 sps:$4 sm:$0xff]  }
  0xce   :  { %4912 = vmatpush1.bf16.msra.mxu0 %v7123_v40  ;;  %5136 = vmatpush1.bf16.msra.mxu1 %v7126_v41  ;;  %v7204_v40 = vld [vmem:[#allocation2 + $0x7e8] ss:$28 sps:$4 sm:$0xff]   ;;  %v7205_v41 = vld [vmem:[#allocation2 + $0x81c] ss:$28 sps:$4 sm:$0xff]  }
  0xcf   :  { %4914 = vmatprep.subr.bf16.mxu0 %v7127_v42  ;;  %5138 = vmatprep.subr.bf16.mxu1 %v7130_v44  ;;  %v7208_v42 = vld [vmem:[#allocation2 + $0x824] ss:$28 sps:$4 sm:$0xff]   ;;  %v7207_v44 = vld [vmem:[#allocation2 + $0x818] ss:$28 sps:$4 sm:$0xff]  }
  0xd2   :  { %4916 = vmatpush1.bf16.msra.mxu0 %v7129_v45  ;;  %5140 = vmatpush1.bf16.msra.mxu1 %v7132_v46  ;;  %v7210_v45 = vld [vmem:[#allocation2 + $0x820] ss:$28 sps:$4 sm:$0xff]   ;;  %v7211_v46 = vld [vmem:[#allocation2 + $0x854] ss:$28 sps:$4 sm:$0xff]  }
  0xd3   :  { %4918 = vmatprep.subr.bf16.mxu0 %v7133_v47  ;;  %5142 = vmatprep.subr.bf16.mxu1 %v7136_v50  ;;  %v7214_v47 = vld [vmem:[#allocation2 + $0x85c] ss:$28 sps:$4 sm:$0xff]   ;;  %v7213_v50 = vld [vmem:[#allocation2 + $0x850] ss:$28 sps:$4 sm:$0xff]  }
  0xd6   :  { %4920 = vmatpush1.bf16.msra.mxu0 %v7135_v52  ;;  %5144 = vmatpush1.bf16.msra.mxu1 %v7138_v53  ;;  %v7216_v52 = vld [vmem:[#allocation2 + $0x858] ss:$28 sps:$4 sm:$0xff]   ;;  %v7217_v53 = vld [vmem:[#allocation2 + $0x88c] ss:$28 sps:$4 sm:$0xff]  }
  0xd7   :  { %4922 = vmatprep.subr.bf16.mxu0 %v7139_v54  ;;  %5146 = vmatprep.subr.bf16.mxu1 %v7142_v56  ;;  %v7220_v54 = vld [vmem:[#allocation2 + $0x894] ss:$28 sps:$4 sm:$0xff]   ;;  %v7219_v56 = vld [vmem:[#allocation2 + $0x888] ss:$28 sps:$4 sm:$0xff]  }
  0xda   :  { %4924 = vmatpush1.bf16.msra.mxu0 %v7141_v57  ;;  %5148 = vmatpush1.bf16.msra.mxu1 %v7144_v58  ;;  %v7222_v57 = vld [vmem:[#allocation2 + $0x890] ss:$28 sps:$4 sm:$0xff]   ;;  %v7223_v58 = vld [vmem:[#allocation2 + $0x8c4] ss:$28 sps:$4 sm:$0xff]  }
  0xdb   :  { %4926 = vmatprep.subr.bf16.mxu0 %v7145_v59  ;;  %5150 = vmatprep.subr.bf16.mxu1 %v7148_v60  ;;  %v7226_v59 = vld [vmem:[#allocation2 + $0x8cc] ss:$28 sps:$4 sm:$0xff]   ;;  %v7225_v60 = vld [vmem:[#allocation2 + $0x8c0] ss:$28 sps:$4 sm:$0xff]  }
  0xde   :  { %4928 = vmatpush1.bf16.msra.mxu0 %v7147_v61  ;;  %5152 = vmatpush1.bf16.msra.mxu1 %v7150_v62  ;;  %v7228_v61 = vld [vmem:[#allocation2 + $0x8c8] ss:$28 sps:$4 sm:$0xff]   ;;  %v7229_v62 = vld [vmem:[#allocation2 + $0x8fc] ss:$28 sps:$4 sm:$0xff]  }
  0xdf   :  { %4930 = vmatprep.subr.bf16.mxu0 %v7151_v63  ;;  %5154 = vmatprep.subr.bf16.mxu1 %v7154_v0  ;;  %v7232_v63 = vld [vmem:[#allocation2 + $0x904] ss:$28 sps:$4 sm:$0xff]   ;;  %v7231_v0 = vld [vmem:[#allocation2 + $0x8f8] ss:$28 sps:$4 sm:$0xff]  }
  0xe2   :  { %4932 = vmatpush1.bf16.msra.mxu0 %v7153_v1  ;;  %5156 = vmatpush1.bf16.msra.mxu1 %v7156_v2  ;;  %v7234_v1 = vld [vmem:[#allocation2 + $0x900] ss:$28 sps:$4 sm:$0xff]   ;;  %v7235_v2 = vld [vmem:[#allocation2 + $0x934] ss:$28 sps:$4 sm:$0xff]  }
  0xe3   :  { %4934 = vmatprep.subr.bf16.mxu0 %v7157_v3  ;;  %5158 = vmatprep.subr.bf16.mxu1 %v7160_v4  ;;  %v7238_v3 = vld [vmem:[#allocation2 + $0x93c] ss:$28 sps:$4 sm:$0xff]   ;;  %v7237_v4 = vld [vmem:[#allocation2 + $0x930] ss:$28 sps:$4 sm:$0xff]  }
  0xe6   :  { %4936 = vmatpush1.bf16.msra.mxu0 %v7159_v6  ;;  %5160 = vmatpush1.bf16.msra.mxu1 %v7162_v7  ;;  %v7240_v6 = vld [vmem:[#allocation2 + $0x938] ss:$28 sps:$4 sm:$0xff]   ;;  %v7241_v7 = vld [vmem:[#allocation2 + $0x96c] ss:$28 sps:$4 sm:$0xff]  }
  0xe7   :  { %4938 = vmatprep.subr.bf16.mxu0 %v7163_v8  ;;  %5162 = vmatprep.subr.bf16.mxu1 %v7166_v10  ;;  %v7244_v8 = vld [vmem:[#allocation2 + $0x974] ss:$28 sps:$4 sm:$0xff]   ;;  %v7243_v10 = vld [vmem:[#allocation2 + $0x968] ss:$28 sps:$4 sm:$0xff]  }
  0xea   :  { %4940 = vmatpush1.bf16.msra.mxu0 %v7165_v12  ;;  %5164 = vmatpush1.bf16.msra.mxu1 %v7168_v13  ;;  %v7246_v12 = vld [vmem:[#allocation2 + $0x970] ss:$28 sps:$4 sm:$0xff]   ;;  %v7247_v13 = vld [vmem:[#allocation2 + $0x9a4] ss:$28 sps:$4 sm:$0xff]  }
  0xeb   :  { %4942 = vmatprep.subr.bf16.mxu0 %v7169_v14  ;;  %5166 = vmatprep.subr.bf16.mxu1 %v7172_v16  ;;  %v7250_v14 = vld [vmem:[#allocation2 + $0x9ac] ss:$28 sps:$4 sm:$0xff]   ;;  %v7249_v16 = vld [vmem:[#allocation2 + $0x9a0] ss:$28 sps:$4 sm:$0xff]  }
  0xee   :  { %4944 = vmatpush1.bf16.msra.mxu0 %v7171_v17  ;;  %5168 = vmatpush1.bf16.msra.mxu1 %v7174_v19  ;;  %v7252_v17 = vld [vmem:[#allocation2 + $0x9a8] ss:$28 sps:$4 sm:$0xff]   ;;  %v7253_v19 = vld [vmem:[#allocation2 + $0x9dc] ss:$28 sps:$4 sm:$0xff]  }
  0xef   :  { %4946 = vmatprep.subr.bf16.mxu0 %v7175_v20  ;;  %5170 = vmatprep.subr.bf16.mxu1 %v7178_v21  ;;  %v7256_v20 = vld [vmem:[#allocation2 + $0x9e4] ss:$28 sps:$4 sm:$0xff]   ;;  %v7255_v21 = vld [vmem:[#allocation2 + $0x9d8] ss:$28 sps:$4 sm:$0xff]  }
  0xf1   :  { %1552 = vmatmul.mubr.f32.vlgmr.msra.gmra.mrb[0].mxu0 %v8319_v24  ;;  %1836 = vmatmul.mubr.f32.vlgmr.msra.gmra.mrb[0].mxu1 %v8319_v24 }
  0xf2   :  { %4948 = vmatpush1.bf16.msra.mxu0 %v7177_v23  ;;  %5172 = vmatpush1.bf16.msra.mxu1 %v7180_v25  ;;  %v7258_v23 = vld [vmem:[#allocation2 + $0x9e0] ss:$28 sps:$4 sm:$0xff]   ;;  %v7259_v25 = vld [vmem:[#allocation2 + $0xa14] ss:$28 sps:$4 sm:$0xff]  }
  0xf3   :  { %4950 = vmatprep.subr.bf16.mxu0 %v7181_v26  ;;  %5174 = vmatprep.subr.bf16.mxu1 %v7184_v27  ;;  %v7262_v26 = vld [vmem:[#allocation2 + $0xa1c] ss:$28 sps:$4 sm:$0xff]   ;;  %v7261_v27 = vld [vmem:[#allocation2 + $0xa10] ss:$28 sps:$4 sm:$0xff]  }
  0xf4   :  { %1622 = vmatprep.mubr.f32.mxu0 %v8323_v28  ;;  %1906 = vmatprep.mubr.f32.mxu1 %v8323_v28 }
  0xf6   :  { %4952 = vmatpush1.bf16.msra.mxu0 %v7183_v49  ;;  %5176 = vmatpush1.bf16.msra.mxu1 %v7186_v51  ;;  %v7264_v49 = vld [vmem:[#allocation2 + $0xa18] ss:$28 sps:$4 sm:$0xff]   ;;  %v7265_v51 = vld [vmem:[#allocation2 + $0xa4c] ss:$28 sps:$4 sm:$0xff]  }
  0xf7   :  { %4954 = vmatprep.subr.bf16.mxu0 %v7187_v29  ;;  %5178 = vmatprep.subr.bf16.mxu1 %v7190_v30  ;;  %v7268_v29 = vld [vmem:[#allocation2 + $0xa54] ss:$28 sps:$4 sm:$0xff]   ;;  %v7267_v30 = vld [vmem:[#allocation2 + $0xa48] ss:$28 sps:$4 sm:$0xff]  }
  0xfa   :  { %4956 = vmatpush1.bf16.msra.mxu0 %v7189_v31  ;;  %5180 = vmatpush1.bf16.msra.mxu1 %v7192_v32  ;;  %v7270_v31 = vld [vmem:[#allocation2 + $0xa50] ss:$28 sps:$4 sm:$0xff]   ;;  %v7271_v32 = vld [vmem:[#allocation2 + $0xa84] ss:$28 sps:$4 sm:$0xff]  }
  0xfb   :  { %4958 = vmatprep.subr.bf16.mxu0 %v7193_v33  ;;  %5182 = vmatprep.subr.bf16.mxu1 %v7196_v34  ;;  %v7274_v33 = vld [vmem:[#allocation2 + $0xa8c] ss:$28 sps:$4 sm:$0xff]   ;;  %v7273_v34 = vld [vmem:[#allocation2 + $0xa80] ss:$28 sps:$4 sm:$0xff]  }
  0xfe   :  { %4960 = vmatpush1.bf16.msra.mxu0 %v7195_v35  ;;  %5184 = vmatpush1.bf16.msra.mxu1 %v7198_v36  ;;  %v7276_v35 = vld [vmem:[#allocation2 + $0xa88] ss:$28 sps:$4 sm:$0xff]   ;;  %v8331_v36 = vrot.slane %v8315_v22, %v8295_v5 }
  0xff   :  { %4962 = vmatprep.subr.bf16.mxu0 %v7199_v37  ;;  %5186 = vmatprep.subr.bf16.mxu1 %v7202_v38  ;;  %v7277_v37 = vld [vmem:[#allocation2 + $0xabc] ss:$28 sps:$4 sm:$0xff]   ;;  %v7280_v38 = vld [vmem:[#allocation2 + $0xac4] ss:$28 sps:$4 sm:$0xff]  }
 0x102   :  { %4964 = vmatpush1.bf16.msra.mxu0 %v7201_v39  ;;  %5188 = vmatpush1.bf16.msra.mxu1 %v7204_v40  ;;  %v7279_v39 = vld [vmem:[#allocation2 + $0xab8] ss:$28 sps:$4 sm:$0xff]   ;;  %v7282_v40 = vld [vmem:[#allocation2 + $0xac0] ss:$28 sps:$4 sm:$0xff]  }
 0x103   :  { %4966 = vmatprep.subr.bf16.mxu0 %v7205_v41  ;;  %5190 = vmatprep.subr.bf16.mxu1 %v7208_v42  ;;  %v7283_v41 = vld [vmem:[#allocation2 + $0xaf4] ss:$28 sps:$4 sm:$0xff]   ;;  %v7286_v42 = vld [vmem:[#allocation2 + $0xafc] ss:$28 sps:$4 sm:$0xff]  }
 0x106   :  { %4968 = vmatpush1.bf16.msra.mxu0 %v7207_v44  ;;  %5192 = vmatpush1.bf16.msra.mxu1 %v7210_v45  ;;  %v7285_v44 = vld [vmem:[#allocation2 + $0xaf0] ss:$28 sps:$4 sm:$0xff]   ;;  %v8153_v45 = vmov 0.0  }
 0x107   :  { %4970 = vmatprep.subr.bf16.mxu0 %v7211_v46  ;;  %5194 = vmatprep.subr.bf16.mxu1 %v7214_v47  ;;  %v7288_v46 = vld [vmem:[#allocation2 + $0xaf8] ss:$28 sps:$4 sm:$0xff]   ;;  %v7289_v47 = vld [vmem:[#allocation2 + $0xb2c] ss:$28 sps:$4 sm:$0xff]  }
 0x10a   :  { %4972 = vmatpush1.bf16.msra.mxu0 %v7213_v50  ;;  %5196 = vmatpush1.bf16.msra.mxu1 %v7216_v52  ;;  %v7292_v50 = vld [vmem:[#allocation2 + $0xb34] ss:$28 sps:$4 sm:$0xff]   ;;  %v7291_v52 = vld [vmem:[#allocation2 + $0xb28] ss:$28 sps:$4 sm:$0xff]  }
 0x10b   :  { %4974 = vmatprep.subr.bf16.mxu0 %v7217_v53  ;;  %5198 = vmatprep.subr.bf16.mxu1 %v7220_v54  ;;  %v7294_v53 = vld [vmem:[#allocation2 + $0xb30] ss:$28 sps:$4 sm:$0xff]   ;;  %v7295_v54 = vld [vmem:[#allocation2 + $0xb64] ss:$28 sps:$4 sm:$0xff]  }
 0x10e   :  { %4976 = vmatpush1.bf16.msra.mxu0 %v7219_v56  ;;  %5200 = vmatpush1.bf16.msra.mxu1 %v7222_v57  ;;  %v7298_v56 = vld [vmem:[#allocation2 + $0xb6c] ss:$28 sps:$4 sm:$0xff]   ;;  %v7297_v57 = vld [vmem:[#allocation2 + $0xb60] ss:$28 sps:$4 sm:$0xff]  }
 0x10f   :  { %4978 = vmatprep.subr.bf16.mxu0 %v7223_v58  ;;  %5202 = vmatprep.subr.bf16.mxu1 %v7226_v59  ;;  %v7300_v58 = vld [vmem:[#allocation2 + $0xb68] ss:$28 sps:$4 sm:$0xff]   ;;  %v7301_v59 = vld [vmem:[#allocation2 + $0xb9c] ss:$28 sps:$4 sm:$0xff]  }
 0x112   :  { %4980 = vmatpush1.bf16.msra.mxu0 %v7225_v60  ;;  %5204 = vmatpush1.bf16.msra.mxu1 %v7228_v61  ;;  %v7304_v60 = vld [vmem:[#allocation2 + $0xba4] ss:$28 sps:$4 sm:$0xff]   ;;  %v7303_v61 = vld [vmem:[#allocation2 + $0xb98] ss:$28 sps:$4 sm:$0xff]  }
 0x113   :  { %4982 = vmatprep.subr.bf16.mxu0 %v7229_v62  ;;  %5206 = vmatprep.subr.bf16.mxu1 %v7232_v63  ;;  %v7306_v62 = vld [vmem:[#allocation2 + $0xba0] ss:$28 sps:$4 sm:$0xff]   ;;  %v7307_v63 = vld [vmem:[#allocation2 + $0xbd4] ss:$28 sps:$4 sm:$0xff]  }
 0x116   :  { %4984 = vmatpush1.bf16.msra.mxu0 %v7231_v0  ;;  %5208 = vmatpush1.bf16.msra.mxu1 %v7234_v1  ;;  %v7310_v0 = vld [vmem:[#allocation2 + $0xbdc] ss:$28 sps:$4 sm:$0xff]   ;;  %v7309_v1 = vld [vmem:[#allocation2 + $0xbd0] ss:$28 sps:$4 sm:$0xff]  }
 0x117   :  { %4986 = vmatprep.subr.bf16.mxu0 %v7235_v2  ;;  %5210 = vmatprep.subr.bf16.mxu1 %v7238_v3  ;;  %v7312_v2 = vld [vmem:[#allocation2 + $0xbd8] ss:$28 sps:$4 sm:$0xff]   ;;  %v7313_v3 = vld [vmem:[#allocation2 + $0xc0c] ss:$28 sps:$4 sm:$0xff]  }
 0x11a   :  { %4988 = vmatpush1.bf16.msra.mxu0 %v7237_v4  ;;  %5212 = vmatpush1.bf16.msra.mxu1 %v7240_v6  ;;  %v7316_v4 = vld [vmem:[#allocation2 + $0xc14] ss:$28 sps:$4 sm:$0xff]   ;;  %v7315_v6 = vld [vmem:[#allocation2 + $0xc08] ss:$28 sps:$4 sm:$0xff]  }
 0x11b   :  { %4990 = vmatprep.subr.bf16.mxu0 %v7241_v7  ;;  %5214 = vmatprep.subr.bf16.mxu1 %v7244_v8  ;;  %v7318_v7 = vld [vmem:[#allocation2 + $0xc10] ss:$28 sps:$4 sm:$0xff]  }
 0x11c   :  { %v7319_v8 = vld [vmem:[#allocation2 + $0x14] ss:$28 sps:$4 sm:$0xff]  }
 0x11e   :  { %4992 = vmatpush1.bf16.msra.mxu0 %v7243_v10  ;;  %5216 = vmatpush1.bf16.msra.mxu1 %v7246_v12  ;;  %v7340_v10 = vld [vmem:[#allocation2 + $0x1d8] ss:$28 sps:$4 sm:$0xff]   ;;  %v8339_v12 = vrot.slane %v8315_v22, %v8312_v18  ;;  %v7350_v22 = vld [vmem:[#allocation2 + $0x248] ss:$28 sps:$4 sm:$0xff]  }
 0x11f   :  { %4994 = vmatprep.subr.bf16.mxu0 %v7247_v13  ;;  %5218 = vmatprep.subr.bf16.mxu1 %v7250_v14  ;;  %v7321_v13 = vld [vmem:[#allocation2 + $0x10] ss:$28 sps:$4 sm:$0xff]   ;;  %v7341_v14 = vld [vmem:[#allocation2 + $0x18] ss:$28 sps:$4 sm:$0xff]  }
 0x122   :  { %4996 = vmatpush1.bf16.msra.mxu0 %v7249_v16  ;;  %5220 = vmatpush1.bf16.msra.mxu1 %v7252_v17  ;;  %v7322_v16 = vld [vmem:[#allocation2 + $0x4c] ss:$28 sps:$4 sm:$0xff]  }
 0x123   :  { %4998 = vmatprep.subr.bf16.mxu0 %v7253_v19  ;;  %5222 = vmatprep.subr.bf16.mxu1 %v7256_v20  ;;  %v7345_v17 = vld [vmem:[#allocation2 + $0x210] ss:$28 sps:$4 sm:$0xff]   ;;  %v7324_v19 = vld [vmem:[#allocation2 + $0x48] ss:$28 sps:$4 sm:$0xff]  }
 0x124   :  { %v7325_v20 = vld [vmem:[#allocation2 + $0x84] ss:$28 sps:$4 sm:$0xff]  }
 0x126   :  { %5000 = vmatpush1.bf16.msra.mxu0 %v7255_v21  ;;  %5224 = vmatpush1.bf16.msra.mxu1 %v7258_v23  ;;  %v7346_v21 = vld [vmem:[#allocation2 + $0x50] ss:$28 sps:$4 sm:$0xff]   ;;  %v7327_v23 = vld [vmem:[#allocation2 + $0x80] ss:$28 sps:$4 sm:$0xff]  }
 0x127   :  { %5002 = vmatprep.subr.bf16.mxu0 %v7259_v25  ;;  %5226 = vmatprep.subr.bf16.mxu1 %v7262_v26  ;;  %v7328_v25 = vld [vmem:[#allocation2 + $0xbc] ss:$28 sps:$4 sm:$0xff]   ;;  %v7351_v26 = vld [vmem:[#allocation2 + $0x88] ss:$28 sps:$4 sm:$0xff]  }
 0x12a   :  { %5004 = vmatpush1.bf16.msra.mxu0 %v7261_v27  ;;  %5228 = vmatpush1.bf16.msra.mxu1 %v7264_v49  ;;  %v7355_v27 = vld [vmem:[#allocation2 + $0x280] ss:$28 sps:$4 sm:$0xff]   ;;  %v7330_v49 = vld [vmem:[#allocation2 + $0xb8] ss:$28 sps:$4 sm:$0xff]  }
 0x12b   :  { %5006 = vmatprep.subr.bf16.mxu0 %v7265_v51  ;;  %5230 = vmatprep.subr.bf16.mxu1 %v7268_v29  ;;  %v7331_v51 = vld [vmem:[#allocation2 + $0xf4] ss:$28 sps:$4 sm:$0xff]   ;;  %v7356_v29 = vld [vmem:[#allocation2 + $0xc0] ss:$28 sps:$4 sm:$0xff]  }
 0x12e   :  { %5008 = vmatpush1.bf16.msra.mxu0 %v7267_v30  ;;  %5232 = vmatpush1.bf16.msra.mxu1 %v7270_v31  ;;  %v7360_v30 = vld [vmem:[#allocation2 + $0x2b8] ss:$28 sps:$4 sm:$0xff]   ;;  %v7333_v31 = vld [vmem:[#allocation2 + $0xf0] ss:$28 sps:$4 sm:$0xff]  }
 0x12f   :  { %5010 = vmatprep.subr.bf16.mxu0 %v7271_v32  ;;  %5234 = vmatprep.subr.bf16.mxu1 %v7274_v33  ;;  %v7334_v32 = vld [vmem:[#allocation2 + $0x12c] ss:$28 sps:$4 sm:$0xff]  }
 0x130   :  { %v7365_v33 = vld [vmem:[#allocation2 + $0x2f0] ss:$28 sps:$4 sm:$0xff]  }
 0x131   :  { %1623 = vmatmul.mubr.f32.vlgmr.msra.gmra.mrb[0].mxu0 %v8331_v36  ;;  %1907 = vmatmul.mubr.f32.vlgmr.msra.gmra.mrb[0].mxu1 %v8331_v36 }
 0x132   :  { %5012 = vmatpush1.bf16.msra.mxu0 %v7273_v34  ;;  %5236 = vmatpush1.bf16.msra.mxu1 %v7276_v35  ;;  %v7336_v34 = vld [vmem:[#allocation2 + $0x128] ss:$28 sps:$4 sm:$0xff]   ;;  %v7366_v35 = vld [vmem:[#allocation2 + $0x130] ss:$28 sps:$4 sm:$0xff]  }
 0x133   :  { %5014 = vmatprep.subr.bf16.mxu0 %v7277_v37  ;;  %5238 = vmatprep.subr.bf16.mxu1 %v7280_v38  ;;  %v7337_v37 = vld [vmem:[#allocation2 + $0x164] ss:$28 sps:$4 sm:$0xff]  }
 0x134   :  { %1693 = vmatprep.mubr.f32.mxu0 %v8153_v45  ;;  %1977 = vmatprep.mubr.f32.mxu1 %v8153_v45  ;;  %v7370_v38 = vld [vmem:[#allocation2 + $0x328] ss:$28 sps:$4 sm:$0xff]  }
 0x136   :  { %5016 = vmatpush1.bf16.msra.mxu0 %v7279_v39  ;;  %5240 = vmatpush1.bf16.msra.mxu1 %v7282_v40  ;;  %v7339_v39 = vld [vmem:[#allocation2 + $0x160] ss:$28 sps:$4 sm:$0xff]  }
 0x137   :  { %5018 = vmatprep.subr.bf16.mxu0 %v7283_v41  ;;  %5242 = vmatprep.subr.bf16.mxu1 %v7286_v42  ;;  %v7342_v40 = vld [vmem:[#allocation2 + $0x19c] ss:$28 sps:$4 sm:$0xff]   ;;  %v7371_v41 = vld [vmem:[#allocation2 + $0x168] ss:$28 sps:$4 sm:$0xff]  }
 0x138   :  { %v7375_v42 = vld [vmem:[#allocation2 + $0x360] ss:$28 sps:$4 sm:$0xff]  }
 0x13a   :  { %5020 = vmatpush1.bf16.msra.mxu0 %v7285_v44  ;;  %5244 = vmatpush1.bf16.msra.mxu1 %v7288_v46  ;;  %v7344_v44 = vld [vmem:[#allocation2 + $0x198] ss:$28 sps:$4 sm:$0xff]  }
 0x13b   :  { %5022 = vmatprep.subr.bf16.mxu0 %v7289_v47  ;;  %5246 = vmatprep.subr.bf16.mxu1 %v7292_v50  ;;  %v7347_v46 = vld [vmem:[#allocation2 + $0x1d4] ss:$28 sps:$4 sm:$0xff]   ;;  %v7376_v47 = vld [vmem:[#allocation2 + $0x1a0] ss:$28 sps:$4 sm:$0xff]  }
 0x13c   :  { %v7380_v50 = vld [vmem:[#allocation2 + $0x558] ss:$28 sps:$4 sm:$0xff]  }
 0x13e   :  { %5024 = vmatpush1.bf16.msra.mxu0 %v7291_v52  ;;  %5248 = vmatpush1.bf16.msra.mxu1 %v7294_v53  ;;  %v7349_v52 = vld [vmem:[#allocation2 + $0x1d0] ss:$28 sps:$4 sm:$0xff]   ;;  %v7381_v53 = vld [vmem:[#allocation2 + $0x398] ss:$28 sps:$4 sm:$0xff]  }
 0x13f   :  { %5026 = vmatprep.subr.bf16.mxu0 %v7295_v54  ;;  %5250 = vmatprep.subr.bf16.mxu1 %v7298_v56  ;;  %v7352_v54 = vld [vmem:[#allocation2 + $0x20c] ss:$28 sps:$4 sm:$0xff]  }
 0x140   :  { %v7385_v56 = vld [vmem:[#allocation2 + $0x590] ss:$28 sps:$4 sm:$0xff]  }
 0x142   :  { %5028 = vmatpush1.bf16.msra.mxu0 %v7297_v57  ;;  %5252 = vmatpush1.bf16.msra.mxu1 %v7300_v58  ;;  %v7354_v57 = vld [vmem:[#allocation2 + $0x208] ss:$28 sps:$4 sm:$0xff]   ;;  %v7386_v58 = vld [vmem:[#allocation2 + $0x3d0] ss:$28 sps:$4 sm:$0xff]  }
 0x143   :  { %5030 = vmatprep.subr.bf16.mxu0 %v7301_v59  ;;  %5254 = vmatprep.subr.bf16.mxu1 %v7304_v60  ;;  %v7357_v59 = vld [vmem:[#allocation2 + $0x244] ss:$28 sps:$4 sm:$0xff]  }
 0x144   :  { %v7390_v60 = vld [vmem:[#allocation2 + $0x5c8] ss:$28 sps:$4 sm:$0xff]  }
 0x146   :  { %5032 = vmatpush1.bf16.msra.mxu0 %v7303_v61  ;;  %5256 = vmatpush1.bf16.msra.mxu1 %v7306_v62  ;;  %v7359_v61 = vld [vmem:[#allocation2 + $0x240] ss:$28 sps:$4 sm:$0xff]   ;;  %v7391_v62 = vld [vmem:[#allocation2 + $0x408] ss:$28 sps:$4 sm:$0xff]  }
 0x147   :  { %5034 = vmatprep.subr.bf16.mxu0 %v7307_v63  ;;  %5258 = vmatprep.subr.bf16.mxu1 %v7310_v0  ;;  %v7362_v63 = vld [vmem:[#allocation2 + $0x27c] ss:$28 sps:$4 sm:$0xff]  }
 0x148   :  { %v7395_v0 = vld [vmem:[#allocation2 + $0x600] ss:$28 sps:$4 sm:$0xff]  }
 0x14a   :  { %5036 = vmatpush1.bf16.msra.mxu0 %v7309_v1  ;;  %5260 = vmatpush1.bf16.msra.mxu1 %v7312_v2  ;;  %v7364_v1 = vld [vmem:[#allocation2 + $0x278] ss:$28 sps:$4 sm:$0xff]   ;;  %v7396_v2 = vld [vmem:[#allocation2 + $0x440] ss:$28 sps:$4 sm:$0xff]  }
 0x14b   :  { %5038 = vmatprep.subr.bf16.mxu0 %v7313_v3  ;;  %5262 = vmatprep.subr.bf16.mxu1 %v7316_v4  ;;  %v7367_v3 = vld [vmem:[#allocation2 + $0x2b4] ss:$28 sps:$4 sm:$0xff]  }
 0x14c   :  { %v7400_v4 = vld [vmem:[#allocation2 + $0x638] ss:$28 sps:$4 sm:$0xff]  }
 0x14e   :  { %5040 = vmatpush1.bf16.msra.mxu0 %v7315_v6  ;;  %5264 = vmatpush1.bf16.msra.mxu1 %v7318_v7  ;;  %v7369_v6 = vld [vmem:[#allocation2 + $0x2b0] ss:$28 sps:$4 sm:$0xff]   ;;  %v7401_v7 = vld [vmem:[#allocation2 + $0x478] ss:$28 sps:$4 sm:$0xff]  }
 0x14f   :  { %5266 = vmatprep.subr.bf16.mxu0 %v7319_v8  ;;  %5490 = vmatprep.subr.bf16.mxu1 %v7340_v10  ;;  %v7372_v8 = vld [vmem:[#allocation2 + $0x2ec] ss:$28 sps:$4 sm:$0xff]  }
 0x150   :  { %v7405_v10 = vld [vmem:[#allocation2 + $0x670] ss:$28 sps:$4 sm:$0xff]  }
 0x151   :  { %1694 = vmatmul.mubr.f32.vlgmr.msra.gmra.mrb[0].mxu0 %v8339_v12  ;;  %1978 = vmatmul.mubr.f32.vlgmr.msra.gmra.mrb[0].mxu1 %v8339_v12 }
 0x152   :  { %5268 = vmatpush1.bf16.msra.mxu0 %v7321_v13  ;;  %5492 = vmatpush3.bf16.msra.mxu1 %v7341_v14  ;;  %v7374_v13 = vld [vmem:[#allocation2 + $0x2e8] ss:$28 sps:$4 sm:$0xff]  }
 0x153   :  { %5270 = vmatprep.subr.bf16.mxu0 %v7322_v16  ;;  %5494 = vmatprep.subr.bf16.mxu1 %v7345_v17  ;;  %v7377_v14 = vld [vmem:[#allocation2 + $0x324] ss:$28 sps:$4 sm:$0xff]   ;;  %v7406_v16 = vld [vmem:[#allocation2 + $0x4b0] ss:$28 sps:$4 sm:$0xff]  }
 0x154   :  { %2332 = vmatprep.mubr.f32.mxu1 %v8290_v55  ;;  %2048 = vmatprep.mubr.f32.mxu0 %v8290_v55  ;;  %v7361_v55 = vld [vmem:[#allocation2 + $0xf8] ss:$28 sps:$4 sm:$0xff]   ;;  %v7410_v17 = vld [vmem:[#allocation2 + $0x6a8] ss:$28 sps:$4 sm:$0xff]  }
 0x156   :  { %5272 = vmatpush1.bf16.msra.mxu0 %v7324_v19  ;;  %5496 = vmatpush3.bf16.msra.mxu1 %v7346_v21  ;;  %v7379_v19 = vld [vmem:[#allocation2 + $0x320] ss:$28 sps:$4 sm:$0xff]   ;;  %v7411_v21 = vld [vmem:[#allocation2 + $0x4e8] ss:$28 sps:$4 sm:$0xff]  }
 0x157   :  { %5274 = vmatprep.subr.bf16.mxu0 %v7325_v20  ;;  %5498 = vmatprep.subr.bf16.mxu1 %v7350_v22  ;;  %v7382_v20 = vld [vmem:[#allocation2 + $0x35c] ss:$28 sps:$4 sm:$0xff]  }
 0x158   :  { %v7415_v22 = vld [vmem:[#allocation2 + $0x6e0] ss:$28 sps:$4 sm:$0xff]  }
 0x15a   :  { %5276 = vmatpush1.bf16.msra.mxu0 %v7327_v23  ;;  %5500 = vmatpush3.bf16.msra.mxu1 %v7351_v26  ;;  %v7384_v23 = vld [vmem:[#allocation2 + $0x358] ss:$28 sps:$4 sm:$0xff]   ;;  %v7416_v26 = vld [vmem:[#allocation2 + $0x520] ss:$28 sps:$4 sm:$0xff]  }
 0x15b   :  { %5278 = vmatprep.subr.bf16.mxu0 %v7328_v25  ;;  %5502 = vmatprep.subr.bf16.mxu1 %v7355_v27  ;;  %v7387_v25 = vld [vmem:[#allocation2 + $0x394] ss:$28 sps:$4 sm:$0xff]  }
 0x15c   :  { %v7420_v27 = vld [vmem:[#allocation2 + $0x8d8] ss:$28 sps:$4 sm:$0xff]  }
 0x15e   :  { %5280 = vmatpush1.bf16.msra.mxu0 %v7330_v49  ;;  %5504 = vmatpush3.bf16.msra.mxu1 %v7356_v29  ;;  %v7389_v49 = vld [vmem:[#allocation2 + $0x390] ss:$28 sps:$4 sm:$0xff]   ;;  %v7421_v29 = vld [vmem:[#allocation2 + $0x718] ss:$28 sps:$4 sm:$0xff]  }
 0x15f   :  { %5282 = vmatprep.subr.bf16.mxu0 %v7331_v51  ;;  %5506 = vmatprep.subr.bf16.mxu1 %v7360_v30  ;;  %v7392_v51 = vld [vmem:[#allocation2 + $0x3cc] ss:$28 sps:$4 sm:$0xff]  }
 0x160   :  { %v7425_v30 = vld [vmem:[#allocation2 + $0x910] ss:$28 sps:$4 sm:$0xff]  }
 0x162   :  { %5284 = vmatpush1.bf16.msra.mxu0 %v7333_v31  ;;  %5508 = vmatpush3.bf16.msra.mxu1 %v7361_v55  ;;  %v7394_v31 = vld [vmem:[#allocation2 + $0x3c8] ss:$28 sps:$4 sm:$0xff]   ;;  %v7426_v55 = vld [vmem:[#allocation2 + $0x750] ss:$28 sps:$4 sm:$0xff]  }
 0x163   :  { %5286 = vmatprep.subr.bf16.mxu0 %v7334_v32  ;;  %5510 = vmatprep.subr.bf16.mxu1 %v7365_v33  ;;  %v7397_v32 = vld [vmem:[#allocation2 + $0x404] ss:$28 sps:$4 sm:$0xff]  }
 0x164   :  { %v7430_v33 = vld [vmem:[#allocation2 + $0x948] ss:$28 sps:$4 sm:$0xff]  }
 0x166   :  { %5288 = vmatpush1.bf16.msra.mxu0 %v7336_v34  ;;  %5512 = vmatpush3.bf16.msra.mxu1 %v7366_v35  ;;  %v7399_v34 = vld [vmem:[#allocation2 + $0x400] ss:$28 sps:$4 sm:$0xff]  }
 0x167   :  { %5290 = vmatprep.subr.bf16.mxu0 %v7337_v37  ;;  %5514 = vmatprep.subr.bf16.mxu1 %v7370_v38  ;;  %v7402_v35 = vld [vmem:[#allocation2 + $0x43c] ss:$28 sps:$4 sm:$0xff]   ;;  %v7431_v37 = vld [vmem:[#allocation2 + $0x788] ss:$28 sps:$4 sm:$0xff]  }
 0x168   :  { %v7404_v38 = vld [vmem:[#allocation2 + $0x438] ss:$28 sps:$4 sm:$0xff]  }
 0x16a   :  { %5292 = vmatpush1.bf16.msra.mxu0 %v7339_v39  ;;  %5516 = vmatpush3.bf16.msra.mxu1 %v7371_v41  ;;  %v7407_v39 = vld [vmem:[#allocation2 + $0x474] ss:$28 sps:$4 sm:$0xff]  }
 0x16b   :  { %5294 = vmatprep.subr.bf16.mxu0 %v7342_v40  ;;  %5518 = vmatprep.subr.bf16.mxu1 %v7375_v42  ;;  %v7436_v40 = vld [vmem:[#allocation2 + $0x7c0] ss:$28 sps:$4 sm:$0xff]   ;;  %v7440_v41 = vld [vmem:[#allocation2 + $0x9b8] ss:$28 sps:$4 sm:$0xff]   ;;  %v7409_v42 = vld [vmem:[#allocation2 + $0x470] ss:$28 sps:$4 sm:$0xff]  }
 0x16e   :  { %5296 = vmatpush1.bf16.msra.mxu0 %v7344_v44  ;;  %5520 = vmatpush3.bf16.msra.mxu1 %v7376_v47  ;;  %v7412_v44 = vld [vmem:[#allocation2 + $0x4ac] ss:$28 sps:$4 sm:$0xff]  }
 0x16f   :  { %5298 = vmatprep.subr.bf16.mxu0 %v7347_v46  ;;  %5522 = vmatprep.subr.bf16.mxu1 %v7380_v50  ;;  %v7445_v46 = vld [vmem:[#allocation2 + $0x9f0] ss:$28 sps:$4 sm:$0xff]   ;;  %v7414_v47 = vld [vmem:[#allocation2 + $0x4a8] ss:$28 sps:$4 sm:$0xff]  }
 0x170   :  { %v7417_v50 = vld [vmem:[#allocation2 + $0x4e4] ss:$28 sps:$4 sm:$0xff]  }
 0x171   :  { %2333 = vmatmul.mubr.f32.vlgmr.msra.gmra.mrb[2].mxu1 %v8300_v11 }
 0x172   :  { %5300 = vmatpush1.bf16.msra.mxu0 %v7349_v52  ;;  %5524 = vmatpush3.bf16.msra.mxu1 %v7381_v53  ;;  %v7446_v52 = vld [vmem:[#allocation2 + $0x830] ss:$28 sps:$4 sm:$0xff]   ;;  %v7450_v53 = vld [vmem:[#allocation2 + $0xa28] ss:$28 sps:$4 sm:$0xff]  }
 0x173   :  { %5302 = vmatprep.subr.bf16.mxu0 %v7352_v54  ;;  %5526 = vmatprep.subr.bf16.mxu1 %v7385_v56  ;;  %v7419_v54 = vld [vmem:[#allocation2 + $0x4e0] ss:$28 sps:$4 sm:$0xff]  }
 0x174   :  { %2402 = vmatprep.mubr.f32.mxu1 %v8305_v15  ;;  %v7422_v56 = vld [vmem:[#allocation2 + $0x51c] ss:$28 sps:$4 sm:$0xff]  }
 0x176   :  { %5304 = vmatpush1.bf16.msra.mxu0 %v7354_v57  ;;  %5528 = vmatpush3.bf16.msra.mxu1 %v7386_v58  ;;  %v7451_v57 = vld [vmem:[#allocation2 + $0x868] ss:$28 sps:$4 sm:$0xff]   ;;  %v7455_v58 = vld [vmem:[#allocation2 + $0xa60] ss:$28 sps:$4 sm:$0xff]  }
 0x177   :  { %5306 = vmatprep.subr.bf16.mxu0 %v7357_v59  ;;  %5530 = vmatprep.subr.bf16.mxu1 %v7390_v60  ;;  %v7424_v59 = vld [vmem:[#allocation2 + $0x518] ss:$28 sps:$4 sm:$0xff]  }
 0x178   :  { %v7427_v60 = vld [vmem:[#allocation2 + $0x554] ss:$28 sps:$4 sm:$0xff]  }
 0x17a   :  { %5308 = vmatpush1.bf16.msra.mxu0 %v7359_v61  ;;  %5532 = vmatpush3.bf16.msra.mxu1 %v7391_v62  ;;  %v7456_v61 = vld [vmem:[#allocation2 + $0x8a0] ss:$28 sps:$4 sm:$0xff]   ;;  %v7429_v62 = vld [vmem:[#allocation2 + $0x550] ss:$28 sps:$4 sm:$0xff]  }
 0x17b   :  { %5310 = vmatprep.subr.bf16.mxu0 %v7362_v63  ;;  %5534 = vmatprep.subr.bf16.mxu1 %v7395_v0  ;;  %v7432_v63 = vld [vmem:[#allocation2 + $0x58c] ss:$28 sps:$4 sm:$0xff]   ;;  %v7460_v0 = vld [vmem:[#allocation2 + $0xa98] ss:$28 sps:$4 sm:$0xff]  }
 0x17e   :  { %5312 = vmatpush1.bf16.msra.mxu0 %v7364_v1  ;;  %5536 = vmatpush3.bf16.msra.mxu1 %v7396_v2  ;;  %v8154_v1 = vmov 0.0|0.0   ;;  %v7434_v2 = vld [vmem:[#allocation2 + $0x588] ss:$28 sps:$4 sm:$0xff]  }
 0x17f   :  { %5314 = vmatprep.subr.bf16.mxu0 %v7367_v3  ;;  %5538 = vmatprep.subr.bf16.mxu1 %v7400_v4  ;;  %v7464_v3 = vld [vmem:[#allocation2 + $0xad0] ss:$28 sps:$4 sm:$0xff]   ;;  %v7437_v4 = vld [vmem:[#allocation2 + $0x5c4] ss:$28 sps:$4 sm:$0xff]  }
 0x182   :  { %5316 = vmatpush1.bf16.msra.mxu0 %v7369_v6  ;;  %5540 = vmatpush3.bf16.msra.mxu1 %v7401_v7  ;;  %v7439_v6 = vld [vmem:[#allocation2 + $0x5c0] ss:$28 sps:$4 sm:$0xff]  }
 0x183   :  { %5318 = vmatprep.subr.bf16.mxu0 %v7372_v8  ;;  %5542 = vmatprep.subr.bf16.mxu1 %v7405_v10  ;;  %v7442_v7 = vld [vmem:[#allocation2 + $0x5fc] ss:$28 sps:$4 sm:$0xff]   ;;  %v7468_v8 = vld [vmem:[#allocation2 + $0xb08] ss:$28 sps:$4 sm:$0xff]  }
 0x184   :  { %v7444_v10 = vld [vmem:[#allocation2 + $0x5f8] ss:$28 sps:$4 sm:$0xff]  }
 0x186   :  { %5320 = vmatpush1.bf16.msra.mxu0 %v7374_v13  ;;  %5544 = vmatpush3.bf16.msra.mxu1 %v7406_v16  ;;  %v7447_v13 = vld [vmem:[#allocation2 + $0x634] ss:$28 sps:$4 sm:$0xff]  }
 0x187   :  { %5322 = vmatprep.subr.bf16.mxu0 %v7377_v14  ;;  %5546 = vmatprep.subr.bf16.mxu1 %v7410_v17  ;;  %v7472_v14 = vld [vmem:[#allocation2 + $0xb40] ss:$28 sps:$4 sm:$0xff]   ;;  %v7449_v16 = vld [vmem:[#allocation2 + $0x630] ss:$28 sps:$4 sm:$0xff]  }
 0x188   :  { %v7452_v17 = vld [vmem:[#allocation2 + $0x66c] ss:$28 sps:$4 sm:$0xff]  }
 0x18a   :  { %5324 = vmatpush1.bf16.msra.mxu0 %v7379_v19  ;;  %5548 = vmatpush3.bf16.msra.mxu1 %v7411_v21  ;;  %v7476_v19 = vld [vmem:[#allocation2 + $0xb78] ss:$28 sps:$4 sm:$0xff]   ;;  %v7457_v21 = vld [vmem:[#allocation2 + $0x6a4] ss:$28 sps:$4 sm:$0xff]  }
 0x18b   :  { %5326 = vmatprep.subr.bf16.mxu0 %v7382_v20  ;;  %5550 = vmatprep.subr.bf16.mxu1 %v7415_v22  ;;  %v7454_v20 = vld [vmem:[#allocation2 + $0x668] ss:$28 sps:$4 sm:$0xff]   ;;  %v7480_v22 = vld [vmem:[#allocation2 + $0xbb0] ss:$28 sps:$4 sm:$0xff]  }
 0x18e   :  { %5328 = vmatpush1.bf16.msra.mxu0 %v7384_v23  ;;  %5552 = vmatpush3.bf16.msra.mxu1 %v7416_v26  ;;  %v7459_v23 = vld [vmem:[#allocation2 + $0x6a0] ss:$28 sps:$4 sm:$0xff]   ;;  %v7484_v26 = vld [vmem:[#allocation2 + $0xbe8] ss:$28 sps:$4 sm:$0xff]  }
 0x18f   :  { %5330 = vmatprep.subr.bf16.mxu0 %v7387_v25  ;;  %5554 = vmatprep.subr.bf16.mxu1 %v7420_v27  ;;  %v7461_v25 = vld [vmem:[#allocation2 + $0x6dc] ss:$28 sps:$4 sm:$0xff]  }
 0x190   :  { %v7463_v27 = vld [vmem:[#allocation2 + $0x6d8] ss:$28 sps:$4 sm:$0xff]  }
 0x191   :  { %2049 = vmatmul.mubr.f32.vlgmr.msra.gmra.mrb[2].mxu0 %v8300_v11  ;;  %2403 = vmatmul.mubr.f32.vlgmr.msra.gmra.mrb[4].mxu1 %v8319_v24  ;;  %v7435_v11 = vld [vmem:[#allocation2 + $0x980] ss:$28 sps:$4 sm:$0xff]  }
 0x192   :  { %5332 = vmatpush1.bf16.msra.mxu0 %v7389_v49  ;;  %5556 = vmatpush3.bf16.msra.mxu1 %v7421_v29  ;;  %v7465_v49 = vld [vmem:[#allocation2 + $0x714] ss:$28 sps:$4 sm:$0xff]  }
 0x193   :  { %5334 = vmatprep.subr.bf16.mxu0 %v7392_v51  ;;  %5558 = vmatprep.subr.bf16.mxu1 %v7425_v30  ;;  %v7488_v51 = vld [vmem:[#allocation2 + $0xc20] ss:$28 sps:$4 sm:$0xff]   ;;  %v7492_v29 = vld [vmem:[#allocation5 + $0x4] ss:$16 sps:$4 sm:$0xff]   ;;  %v7467_v30 = vld [vmem:[#allocation2 + $0x710] ss:$28 sps:$4 sm:$0xff]  }
 0x194   :  { %2472 = vmatprep.mubr.f32.mxu1 %v8323_v28  ;;  %2119 = vmatprep.mubr.f32.mxu0 %v8305_v15  ;;  %v7441_v15 = vld [vmem:[#allocation2 + $0x7f8] ss:$28 sps:$4 sm:$0xff]  }
 0x196   :  { %5336 = vmatpush1.bf16.msra.mxu0 %v7394_v31  ;;  %5560 = vmatpush3.bf16.msra.mxu1 %v7426_v55  ;;  %v7469_v31 = vld [vmem:[#allocation2 + $0x74c] ss:$28 sps:$4 sm:$0xff]   ;;  %v7498_v55 = vld [vmem:[#allocation5 + $0x24] ss:$16 sps:$4 sm:$0xff]  }
 0x197   :  { %5338 = vmatprep.subr.bf16.mxu0 %v7397_v32  ;;  %5562 = vmatprep.subr.bf16.mxu1 %v7430_v33  ;;  %v7494_v32 = vld [vmem:[#allocation5] ss:$16 sps:$4 sm:$0xff]   ;;  %v7471_v33 = vld [vmem:[#allocation2 + $0x748] ss:$28 sps:$4 sm:$0xff]  }
 0x19a   :  { %5340 = vmatpush1.bf16.msra.mxu0 %v7399_v34  ;;  %5564 = vmatpush3.bf16.msra.mxu1 %v7431_v37  ;;  %v7473_v34 = vld [vmem:[#allocation2 + $0x784] ss:$28 sps:$4 sm:$0xff]  }
 0x19b   :  { %5342 = vmatprep.subr.bf16.mxu0 %v7402_v35  ;;  %5566 = vmatprep.subr.bf16.mxu1 %v7435_v11  ;;  %v7500_v35 = vld [vmem:[#allocation5 + $0x20] ss:$16 sps:$4 sm:$0xff]   ;;  %v7504_v37 = vld [vmem:[#allocation5 + $0x44] ss:$16 sps:$4 sm:$0xff]  }
 0x19c   :  { %v7475_v11 = vld [vmem:[#allocation2 + $0x780] ss:$28 sps:$4 sm:$0xff]  }
 0x19e   :  { %5344 = vmatpush1.bf16.msra.mxu0 %v7404_v38  ;;  %5568 = vmatpush3.bf16.msra.mxu1 %v7436_v40  ;;  %v7477_v38 = vld [vmem:[#allocation2 + $0x7bc] ss:$28 sps:$4 sm:$0xff]   ;;  %v7510_v40 = vld [vmem:[#allocation5 + $0x64] ss:$16 sps:$4 sm:$0xff]  }
 0x19f   :  { %5346 = vmatprep.subr.bf16.mxu0 %v7407_v39  ;;  %5570 = vmatprep.subr.bf16.mxu1 %v7440_v41  ;;  %v7506_v39 = vld [vmem:[#allocation5 + $0x40] ss:$16 sps:$4 sm:$0xff]  }
 0x1a0   :  { %v7481_v41 = vld [vmem:[#allocation2 + $0x7f4] ss:$28 sps:$4 sm:$0xff]  }
 0x1a2   :  { %5348 = vmatpush1.bf16.msra.mxu0 %v7409_v42  ;;  %5572 = vmatpush3.bf16.msra.mxu1 %v7441_v15  ;;  %v7512_v42 = vld [vmem:[#allocation5 + $0x60] ss:$16 sps:$4 sm:$0xff]  }
 0x1a3   :  { %5350 = vmatprep.subr.bf16.mxu0 %v7412_v44  ;;  %5574 = vmatprep.subr.bf16.mxu1 %v7445_v46  ;;  %v7516_v44 = vld [vmem:[#allocation5 + $0x84] ss:$16 sps:$4 sm:$0xff]   ;;  %v7483_v15 = vld [vmem:[#allocation2 + $0x7f0] ss:$28 sps:$4 sm:$0xff]  }
 0x1a4   :  { %v7485_v46 = vld [vmem:[#allocation2 + $0x82c] ss:$28 sps:$4 sm:$0xff]  }
 0x1a6   :  { %5352 = vmatpush1.bf16.msra.mxu0 %v7414_v47  ;;  %5576 = vmatpush3.bf16.msra.mxu1 %v7446_v52  ;;  %v7522_v47 = vld [vmem:[#allocation5 + $0xa4] ss:$16 sps:$4 sm:$0xff]  }
 0x1a7   :  { %5354 = vmatprep.subr.bf16.mxu0 %v7417_v50  ;;  %5578 = vmatprep.subr.bf16.mxu1 %v7450_v53  ;;  %v7487_v50 = vld [vmem:[#allocation2 + $0x828] ss:$28 sps:$4 sm:$0xff]   ;;  %v7524_v53 = vld [vmem:[#allocation5 + $0xa0] ss:$16 sps:$4 sm:$0xff]  }
 0x1a8   :  { %v7489_v52 = vld [vmem:[#allocation2 + $0x864] ss:$28 sps:$4 sm:$0xff]  }
 0x1aa   :  { %5356 = vmatpush1.bf16.msra.mxu0 %v7419_v54  ;;  %5580 = vmatpush3.bf16.msra.mxu1 %v7451_v57  ;;  %v7528_v54 = vld [vmem:[#allocation5 + $0xc4] ss:$16 sps:$4 sm:$0xff]   ;;  %v7495_v57 = vld [vmem:[#allocation2 + $0x89c] ss:$28 sps:$4 sm:$0xff]  }
 0x1ab   :  { %5358 = vmatprep.subr.bf16.mxu0 %v7422_v56  ;;  %5582 = vmatprep.subr.bf16.mxu1 %v7455_v58  ;;  %v7491_v56 = vld [vmem:[#allocation2 + $0x860] ss:$28 sps:$4 sm:$0xff]  }
 0x1ac   :  { %v7530_v58 = vld [vmem:[#allocation5 + $0xc0] ss:$16 sps:$4 sm:$0xff]  }
 0x1ae   :  { %5360 = vmatpush1.bf16.msra.mxu0 %v7424_v59  ;;  %5584 = vmatpush3.bf16.msra.mxu1 %v7456_v61  ;;  %v7534_v59 = vld [vmem:[#allocation5 + $0xe4] ss:$16 sps:$4 sm:$0xff]   ;;  %v7536_v61 = vld [vmem:[#allocation5 + $0xe0] ss:$16 sps:$4 sm:$0xff]  }
 0x1af   :  { %5362 = vmatprep.subr.bf16.mxu0 %v7427_v60  ;;  %5585 = vmatprep.subr.bf16.mxu1 %v8154_v1  ;;  %v7497_v60 = vld [vmem:[#allocation2 + $0x898] ss:$28 sps:$4 sm:$0xff]  }
 0x1b1   :  { %2473 = vmatmul.mubr.f32.vlgmr.msra.gmra.mrb[6].mxu1 %v8331_v36 }
 0x1b2   :  { %5364 = vmatpush1.bf16.msra.mxu0 %v7429_v62  ;;  %5587 = vmatpush3.bf16.msra.mxu1 %v7460_v0  ;;  %v7501_v62 = vld [vmem:[#allocation2 + $0x8d4] ss:$28 sps:$4 sm:$0xff]  }
 0x1b3   :  { %5366 = vmatprep.subr.bf16.mxu0 %v7432_v63  ;;  %5588 = vmatprep.subr.bf16.mxu1 %v8154_v1  ;;  %v7540_v63 = vld [vmem:[#allocation5 + $0x104] ss:$16 sps:$4 sm:$0xff]   ;;  %v7503_v0 = vld [vmem:[#allocation2 + $0x8d0] ss:$28 sps:$4 sm:$0xff]  }
 0x1b4   :  { %4779 = vmatprep.mubr.msk.f32.mxu1 %vm8155_vm0, %v8153_v45 }
 0x1b6   :  { %5368 = vmatpush1.bf16.msra.mxu0 %v7434_v2  ;;  %5590 = vmatpush3.bf16.msra.mxu1 %v7464_v3  ;;  %v7542_v2 = vld [vmem:[#allocation5 + $0x100] ss:$16 sps:$4 sm:$0xff]   ;;  %v7507_v3 = vld [vmem:[#allocation2 + $0x90c] ss:$28 sps:$4 sm:$0xff]  }
 0x1b7   :  { %5370 = vmatprep.subr.bf16.mxu0 %v7437_v4  ;;  %5591 = vmatprep.subr.bf16.mxu1 %v8154_v1  ;;  %v7546_v4 = vld [vmem:[#allocation5 + $0x124] ss:$16 sps:$4 sm:$0xff]  }
 0x1ba   :  { %5372 = vmatpush1.bf16.msra.mxu0 %v7439_v6  ;;  %5593 = vmatpush3.bf16.msra.mxu1 %v7468_v8  ;;  %v7509_v6 = vld [vmem:[#allocation2 + $0x908] ss:$28 sps:$4 sm:$0xff]   ;;  %v7548_v8 = vld [vmem:[#allocation5 + $0x120] ss:$16 sps:$4 sm:$0xff]  }
 0x1bb   :  { %5374 = vmatprep.subr.bf16.mxu0 %v7442_v7  ;;  %5594 = vmatprep.subr.bf16.mxu1 %v8154_v1  ;;  %v7513_v7 = vld [vmem:[#allocation2 + $0x944] ss:$28 sps:$4 sm:$0xff]  }
 0x1be   :  { %5376 = vmatpush1.bf16.msra.mxu0 %v7444_v10  ;;  %5596 = vmatpush3.bf16.msra.mxu1 %v7472_v14  ;;  %v7552_v10 = vld [vmem:[#allocation5 + $0x144] ss:$16 sps:$4 sm:$0xff]   ;;  %v7519_v14 = vld [vmem:[#allocation2 + $0x97c] ss:$28 sps:$4 sm:$0xff]  }
 0x1bf   :  { %5378 = vmatprep.subr.bf16.mxu0 %v7447_v13  ;;  %5597 = vmatprep.subr.bf16.mxu1 %v8154_v1  ;;  %v7515_v13 = vld [vmem:[#allocation2 + $0x940] ss:$28 sps:$4 sm:$0xff]  }
 0x1c2   :  { %5380 = vmatpush1.bf16.msra.mxu0 %v7449_v16  ;;  %5599 = vmatpush3.bf16.msra.mxu1 %v7476_v19  ;;  %v7554_v16 = vld [vmem:[#allocation5 + $0x140] ss:$16 sps:$4 sm:$0xff]   ;;  %v7521_v19 = vld [vmem:[#allocation2 + $0x978] ss:$28 sps:$4 sm:$0xff]  }
 0x1c3   :  { %5382 = vmatprep.subr.bf16.mxu0 %v7452_v17  ;;  %5600 = vmatprep.subr.bf16.mxu1 %v8154_v1  ;;  %v7558_v17 = vld [vmem:[#allocation5 + $0x164] ss:$16 sps:$4 sm:$0xff]  }
 0x1c6   :  { %5384 = vmatpush1.bf16.msra.mxu0 %v7454_v20  ;;  %5602 = vmatpush3.bf16.msra.mxu1 %v7480_v22  ;;  %v7525_v20 = vld [vmem:[#allocation2 + $0x9b4] ss:$28 sps:$4 sm:$0xff]  }
 0x1c7   :  { %5386 = vmatprep.subr.bf16.mxu0 %v7457_v21  ;;  %5603 = vmatprep.subr.bf16.mxu1 %v8154_v1  ;;  %v7560_v21 = vld [vmem:[#allocation5 + $0x160] ss:$16 sps:$4 sm:$0xff]   ;;  %v7564_v22 = vld [vmem:[#allocation5 + $0x184] ss:$16 sps:$4 sm:$0xff]  }
 0x1ca   :  { %5388 = vmatpush1.bf16.msra.mxu0 %v7459_v23  ;;  %5605 = vmatpush3.bf16.msra.mxu1 %v7484_v26  ;;  %v7527_v23 = vld [vmem:[#allocation2 + $0x9b0] ss:$28 sps:$4 sm:$0xff]  }
 0x1cb   :  { %5390 = vmatprep.subr.bf16.mxu0 %v7461_v25  ;;  %5606 = vmatprep.subr.bf16.mxu1 %v8154_v1  ;;  %v7531_v25 = vld [vmem:[#allocation2 + $0x9ec] ss:$28 sps:$4 sm:$0xff]   ;;  %v7566_v26 = vld [vmem:[#allocation5 + $0x180] ss:$16 sps:$4 sm:$0xff]  }
 0x1ce   :  { %5392 = vmatpush1.bf16.msra.mxu0 %v7463_v27  ;;  %5608 = vmatpush3.bf16.msra.mxu1 %v7488_v51  ;;  %v7570_v27 = vld [vmem:[#allocation5 + $0x1a4] ss:$16 sps:$4 sm:$0xff]  }
 0x1cf   :  { %5394 = vmatprep.subr.bf16.mxu0 %v7465_v49  ;;  %5610 = vmatprep.subr.bf16.mxu1 %v7492_v29  ;;  %v7533_v49 = vld [vmem:[#allocation2 + $0x9e8] ss:$28 sps:$4 sm:$0xff]   ;;  %v7572_v29 = vld [vmem:[#allocation5 + $0x1a0] ss:$16 sps:$4 sm:$0xff]  }
 0x1d0   :  { %v7537_v51 = vld [vmem:[#allocation2 + $0xa24] ss:$28 sps:$4 sm:$0xff]  }
 0x1d1   :  { %2120 = vmatmul.mubr.f32.vlgmr.msra.gmra.mrb[2].mxu0 %v8319_v24  ;;  %4780 = vmatmul.mubr.f32.vlgmr.msra.gmra.mrb[8].mxu1 %v8339_v12  ;;  %v7479_v24 = vld [vmem:[#allocation2 + $0x7b8] ss:$28 sps:$4 sm:$0xff]  }
 0x1d2   :  { %5396 = vmatpush1.bf16.msra.mxu0 %v7467_v30  ;;  %5612 = vmatpush1.bf16.msra.mxu1 %v7494_v32  ;;  %v7576_v30 = vld [vmem:[#allocation5 + $0x1c4] ss:$16 sps:$4 sm:$0xff]   ;;  %v7543_v32 = vld [vmem:[#allocation2 + $0xa5c] ss:$28 sps:$4 sm:$0xff]  }
 0x1d3   :  { %5398 = vmatprep.subr.bf16.mxu0 %v7469_v31  ;;  %5614 = vmatprep.subr.bf16.mxu1 %v7498_v55  ;;  %v7539_v31 = vld [vmem:[#allocation2 + $0xa20] ss:$28 sps:$4 sm:$0xff]  }
 0x1d4   :  { %2190 = vmatprep.mubr.f32.mxu0 %v8323_v28  ;;  %v7518_v28 = vld [vmem:[#allocation5 + $0x80] ss:$16 sps:$4 sm:$0xff]  }
 0x1d5   :  { %v7578_v55 = vld [vmem:[#allocation5 + $0x1c0] ss:$16 sps:$4 sm:$0xff]  }
 0x1d6   :  { %5400 = vmatpush1.bf16.msra.mxu0 %v7471_v33  ;;  %5616 = vmatpush1.bf16.msra.mxu1 %v7500_v35  ;;  %v7582_v33 = vld [vmem:[#allocation5 + $0x1e4] ss:$16 sps:$4 sm:$0xff]  }
 0x1d7   :  { %5402 = vmatprep.subr.bf16.mxu0 %v7473_v34  ;;  %5618 = vmatprep.subr.bf16.mxu1 %v7504_v37  ;;  %v7545_v34 = vld [vmem:[#allocation2 + $0xa58] ss:$28 sps:$4 sm:$0xff]   ;;  %v7584_v37 = vld [vmem:[#allocation5 + $0x1e0] ss:$16 sps:$4 sm:$0xff]  }
 0x1d8   :  { %v7549_v35 = vld [vmem:[#allocation2 + $0xa94] ss:$28 sps:$4 sm:$0xff]  }
 0x1da   :  { %5404 = vmatpush1.bf16.msra.mxu0 %v7475_v11  ;;  %5620 = vmatpush1.bf16.msra.mxu1 %v7506_v39  ;;  %v7588_v11 = vld [vmem:[#allocation5 + $0x204] ss:$16 sps:$4 sm:$0xff]   ;;  %v7555_v39 = vld [vmem:[#allocation2 + $0xacc] ss:$28 sps:$4 sm:$0xff]  }
 0x1db   :  { %5406 = vmatprep.subr.bf16.mxu0 %v7477_v38  ;;  %5622 = vmatprep.subr.bf16.mxu1 %v7510_v40  ;;  %v7551_v38 = vld [vmem:[#allocation2 + $0xa90] ss:$28 sps:$4 sm:$0xff]   ;;  %v7557_v40 = vld [vmem:[#allocation2 + $0xac8] ss:$28 sps:$4 sm:$0xff]  }
 0x1de   :  { %5408 = vmatpush1.bf16.msra.mxu0 %v7479_v24  ;;  %5624 = vmatpush1.bf16.msra.mxu1 %v7512_v42  ;;  %v7561_v24 = vld [vmem:[#allocation2 + $0xb04] ss:$28 sps:$4 sm:$0xff]   ;;  %v7567_v42 = vld [vmem:[#allocation2 + $0xb3c] ss:$28 sps:$4 sm:$0xff]  }
 0x1df   :  { %5410 = vmatprep.subr.bf16.mxu0 %v7481_v41  ;;  %5626 = vmatprep.subr.bf16.mxu1 %v7516_v44  ;;  %v7563_v41 = vld [vmem:[#allocation2 + $0xb00] ss:$28 sps:$4 sm:$0xff]   ;;  %v7569_v44 = vld [vmem:[#allocation2 + $0xb38] ss:$28 sps:$4 sm:$0xff]  }
 0x1e2   :  { %5412 = vmatpush1.bf16.msra.mxu0 %v7483_v15  ;;  %5628 = vmatpush1.bf16.msra.mxu1 %v7518_v28  ;;  %v7573_v15 = vld [vmem:[#allocation2 + $0xb74] ss:$28 sps:$4 sm:$0xff]   ;;  %v8367_v28 = vld [vmem:[#allocation11] sm:$0xff] }
 0x1e3   :  { %5414 = vmatprep.subr.bf16.mxu0 %v7485_v46  ;;  %5630 = vmatprep.subr.bf16.mxu1 %v7522_v47  ;;  %v7575_v46 = vld [vmem:[#allocation2 + $0xb70] ss:$28 sps:$4 sm:$0xff]   ;;  %v1395_v47 = vsub.s32 3, %v8275_v43 }
 0x1e6   :  { %5416 = vmatpush1.bf16.msra.mxu0 %v7487_v50  ;;  %5632 = vmatpush1.bf16.msra.mxu1 %v7524_v53  ;;  %v7579_v50 = vld [vmem:[#allocation2 + $0xbac] ss:$28 sps:$4 sm:$0xff]  }
 0x1e7   :  { %5418 = vmatprep.subr.bf16.mxu0 %v7489_v52  ;;  %5634 = vmatprep.subr.bf16.mxu1 %v7528_v54  ;;  %v1384_v52 = vrot.slane %v8367_v28, %v8295_v5  ;;  %v1396_v54 = vrot.slane %v8367_v28, %v1395_v47 }
 0x1ea   :  { %5420 = vmatpush1.bf16.msra.mxu0 %v7491_v56  ;;  %5636 = vmatpush1.bf16.msra.mxu1 %v7530_v58  ;;  %v7581_v56 = vld [vmem:[#allocation2 + $0xba8] ss:$28 sps:$4 sm:$0xff]  }
 0x1eb   :  { %5422 = vmatprep.subr.bf16.mxu0 %v7495_v57  ;;  %5638 = vmatprep.subr.bf16.mxu1 %v7534_v59  ;;  %v7585_v57 = vld [vmem:[#allocation2 + $0xbe4] ss:$28 sps:$4 sm:$0xff]  }
 0x1ee   :  { %5424 = vmatpush1.bf16.msra.mxu0 %v7497_v60  ;;  %5640 = vmatpush1.bf16.msra.mxu1 %v7536_v61 }
 0x1ef   :  { %5426 = vmatprep.subr.bf16.mxu0 %v7501_v62  ;;  %5642 = vmatprep.subr.bf16.mxu1 %v7540_v63 }
 0x1f2   :  { %5428 = vmatpush1.bf16.msra.mxu0 %v7503_v0  ;;  %5644 = vmatpush1.bf16.msra.mxu1 %v7542_v2  ;;  %v7587_v2 = vld [vmem:[#allocation2 + $0xbe0] ss:$28 sps:$4 sm:$0xff]  }
 0x1f3   :  { %5430 = vmatprep.subr.bf16.mxu0 %v7507_v3  ;;  %5646 = vmatprep.subr.bf16.mxu1 %v7546_v4  ;;  %v7591_v4 = vld [vmem:[#allocation2 + $0xc1c] ss:$28 sps:$4 sm:$0xff]  }
 0x1f6   :  { %5432 = vmatpush1.bf16.msra.mxu0 %v7509_v6  ;;  %5648 = vmatpush1.bf16.msra.mxu1 %v7548_v8  ;;  %v7590_v8 = vld [vmem:[#allocation5 + $0x200] ss:$16 sps:$4 sm:$0xff]  }
 0x1f7   :  { %5434 = vmatprep.subr.bf16.mxu0 %v7513_v7  ;;  %5650 = vmatprep.subr.bf16.mxu1 %v7552_v10 }
 0x1fa   :  { %5436 = vmatpush1.bf16.msra.mxu0 %v7515_v13  ;;  %5652 = vmatpush1.bf16.msra.mxu1 %v7554_v16  ;;  %v7593_v13 = vld [vmem:[#allocation2 + $0xc18] ss:$28 sps:$4 sm:$0xff]  }
 0x1fb   :  { %5438 = vmatprep.subr.bf16.mxu0 %v7519_v14  ;;  %5654 = vmatprep.subr.bf16.mxu1 %v7558_v17  ;;  %v7594_v14 = vld [vmem:[#allocation5 + $0x224] ss:$16 sps:$4 sm:$0xff]   ;;  %v7597_v17 = vld [vmem:[#allocation5 + $0xc] ss:$16 sps:$4 sm:$0xff]  }
 0x1fe   :  { %5440 = vmatpush1.bf16.msra.mxu0 %v7521_v19  ;;  %5656 = vmatpush1.bf16.msra.mxu1 %v7560_v21  ;;  %v7599_v21 = vld [vmem:[#allocation5 + $0x8] ss:$16 sps:$4 sm:$0xff]  }
 0x1ff   :  { %5442 = vmatprep.subr.bf16.mxu0 %v7525_v20  ;;  %5658 = vmatprep.subr.bf16.mxu1 %v7564_v22  ;;  %v7596_v20 = vld [vmem:[#allocation5 + $0x220] ss:$16 sps:$4 sm:$0xff]   ;;  %v7600_v22 = vld [vmem:[#allocation5 + $0x244] ss:$16 sps:$4 sm:$0xff]  }
 0x202   :  { %5444 = vmatpush1.bf16.msra.mxu0 %v7527_v23  ;;  %5660 = vmatpush1.bf16.msra.mxu1 %v7566_v26  ;;  %v7603_v23 = vld [vmem:[#allocation5 + $0x2c] ss:$16 sps:$4 sm:$0xff]   ;;  %v7605_v26 = vld [vmem:[#allocation5 + $0x28] ss:$16 sps:$4 sm:$0xff]  }
 0x203   :  { %5446 = vmatprep.subr.bf16.mxu0 %v7531_v25  ;;  %5662 = vmatprep.subr.bf16.mxu1 %v7570_v27  ;;  %v7602_v25 = vld [vmem:[#allocation5 + $0x240] ss:$16 sps:$4 sm:$0xff]   ;;  %v7606_v27 = vld [vmem:[#allocation5 + $0x264] ss:$16 sps:$4 sm:$0xff]  }
 0x206   :  { %5448 = vmatpush1.bf16.msra.mxu0 %v7533_v49  ;;  %5664 = vmatpush1.bf16.msra.mxu1 %v7572_v29  ;;  %v7609_v49 = vld [vmem:[#allocation5 + $0x4c] ss:$16 sps:$4 sm:$0xff]   ;;  %v7611_v29 = vld [vmem:[#allocation5 + $0x48] ss:$16 sps:$4 sm:$0xff]  }
 0x207   :  { %5450 = vmatprep.subr.bf16.mxu0 %v7537_v51  ;;  %5666 = vmatprep.subr.bf16.mxu1 %v7576_v30  ;;  %v7608_v51 = vld [vmem:[#allocation5 + $0x260] ss:$16 sps:$4 sm:$0xff]   ;;  %v7612_v30 = vld [vmem:[#allocation5 + $0x284] ss:$16 sps:$4 sm:$0xff]  }
 0x20a   :  { %5452 = vmatpush1.bf16.msra.mxu0 %v7539_v31  ;;  %5668 = vmatpush1.bf16.msra.mxu1 %v7578_v55  ;;  %v7615_v31 = vld [vmem:[#allocation5 + $0x6c] ss:$16 sps:$4 sm:$0xff]   ;;  %v7618_v55 = vld [vmem:[#allocation5 + $0x2a4] ss:$16 sps:$4 sm:$0xff]  }
 0x20b   :  { %5454 = vmatprep.subr.bf16.mxu0 %v7543_v32  ;;  %5670 = vmatprep.subr.bf16.mxu1 %v7582_v33  ;;  %v7614_v32 = vld [vmem:[#allocation5 + $0x280] ss:$16 sps:$4 sm:$0xff]   ;;  %v7621_v33 = vld [vmem:[#allocation5 + $0x8c] ss:$16 sps:$4 sm:$0xff]  }
 0x20e   :  { %5456 = vmatpush1.bf16.msra.mxu0 %v7545_v34  ;;  %5672 = vmatpush1.bf16.msra.mxu1 %v7584_v37  ;;  %v7620_v34 = vld [vmem:[#allocation5 + $0x2a0] ss:$16 sps:$4 sm:$0xff]   ;;  %v7624_v37 = vld [vmem:[#allocation5 + $0x2c4] ss:$16 sps:$4 sm:$0xff]  }
 0x20f   :  { %5458 = vmatprep.subr.bf16.mxu0 %v7549_v35  ;;  %5674 = vmatprep.subr.bf16.mxu1 %v7588_v11  ;;  %v7623_v35 = vld [vmem:[#allocation5 + $0x88] ss:$16 sps:$4 sm:$0xff]   ;;  %v7627_v11 = vld [vmem:[#allocation5 + $0xac] ss:$16 sps:$4 sm:$0xff]  }
 0x211   :  { %2191 = vmatmul.mubr.f32.vlgmr.msra.gmra.mrb[2].mxu0 %v8331_v36  ;;  %v8370_v36 = vsub.s32 1, %v8275_v43 }
 0x212   :  { %5460 = vmatpush1.bf16.msra.mxu0 %v7551_v38  ;;  %2261 = vmatprep.mubr.f32.mxu0 %v8153_v45  ;;  %v7626_v38 = vld [vmem:[#allocation5 + $0x2c0] ss:$16 sps:$4 sm:$0xff]  }
 0x213   :  { %5462 = vmatprep.subr.bf16.mxu0 %v7555_v39  ;;  %v1388_v53 = vrot.slane %v8367_v28, %v8370_v36  ;;  %v7629_v39 = vld [vmem:[#allocation5 + $0xa8] ss:$16 sps:$4 sm:$0xff]  }
 0x216   :  { %5464 = vmatpush1.bf16.msra.mxu0 %v7557_v40  ;;  %v7630_v40 = vld [vmem:[#allocation5 + $0x2e4] ss:$16 sps:$4 sm:$0xff]  }
 0x217   :  { %5466 = vmatprep.subr.bf16.mxu0 %v7561_v24  ;;  %v7633_v24 = vld [vmem:[#allocation5 + $0xcc] ss:$16 sps:$4 sm:$0xff]  }
 0x21a   :  { %5468 = vmatpush1.bf16.msra.mxu0 %v7563_v41 }
 0x21b   :  { %5470 = vmatprep.subr.bf16.mxu0 %v7567_v42  ;;  %v7632_v42 = vld [vmem:[#allocation5 + $0x2e0] ss:$16 sps:$4 sm:$0xff]  }
 0x21e   :  { %5472 = vmatpush1.bf16.msra.mxu0 %v7569_v44 }
 0x21f   :  { %5474 = vmatprep.subr.bf16.mxu0 %v7573_v15  ;;  %v7635_v15 = vld [vmem:[#allocation5 + $0xc8] ss:$16 sps:$4 sm:$0xff]  }
 0x222   :  { %5476 = vmatpush1.bf16.msra.mxu0 %v7575_v46  ;;  %v7636_v46 = vld [vmem:[#allocation5 + $0x304] ss:$16 sps:$4 sm:$0xff]  }
 0x223   :  { %5478 = vmatprep.subr.bf16.mxu0 %v7579_v50 }
 0x224   :  { %v1695_v58 = vpop.f32.mrb[0].mxu0  ;;  %v8380_v59 = vpop.f32.mrb[0].mxu1 }
 0x225   :  { %v6241_v60 = vadd.f32 %v1695_v58, %v1384_v52  ;;  %v1697_v61 = vpop.f32.mrb[1].mxu0  ;;  %v1981_v62 = vpop.f32.mrb[1].mxu1  ;;  %v7639_v52 = vld [vmem:[#allocation5 + $0xec] ss:$16 sps:$4 sm:$0xff]   ;;  %v7644_v58 = vld [vmem:[#allocation5 + $0x320] ss:$16 sps:$4 sm:$0xff]  }
 0x226   :  { %v6242_v63 = vadd.f32 %v1697_v61, %v1388_v53  ;;  %v6244_v0 = vadd.f32 %v1981_v62, %v1396_v54  ;;  %5480 = vmatpush1.bf16.msra.mxu0 %v7581_v56  ;;  %v7638_v53 = vld [vmem:[#allocation5 + $0x300] ss:$16 sps:$4 sm:$0xff]   ;;  %v7641_v54 = vld [vmem:[#allocation5 + $0xe8] ss:$16 sps:$4 sm:$0xff]   ;;  %v7642_v56 = vld [vmem:[#allocation5 + $0x324] ss:$16 sps:$4 sm:$0xff]  }
 0x227   :  { %v2555_v3 = vmul.f32 0.01, %v6241_v60  ;;  %5482 = vmatprep.subr.bf16.mxu0 %v7585_v57  ;;  %vm2548_vm1 = vcmp.gt.f32.partialorder %v6241_v60, 0.0  ;;  %v7645_v57 = vld [vmem:[#allocation5 + $0x10c] ss:$16 sps:$4 sm:$0xff]  }
 0x228   :  { %v2556_v6 = vmul.f32 0.01, %v6242_v63  ;;  %v2558_v7 = vmul.f32 0.01, %v6244_v0  ;;  %vm2549_vm2 = vcmp.gt.f32.partialorder %v6242_v63, 0.0  ;;  %vm2551_vm3 = vcmp.gt.f32.partialorder %v6244_v0, 0.0 }
 0x229   :  { %v8382_v16 = vsel %vm2548_vm1, %v6241_v60, %v2555_v3  ;;  %v7647_v60 = vld [vmem:[#allocation5 + $0x108] ss:$16 sps:$4 sm:$0xff]   ;;  %v7648_v61 = vld [vmem:[#allocation5 + $0x344] ss:$16 sps:$4 sm:$0xff]   ;;  %v7651_v62 = vld [vmem:[#allocation5 + $0x12c] ss:$16 sps:$4 sm:$0xff]  }
 0x22a   :  { %5484 = vmatpush1.bf16.msra.mxu0 %v7587_v2  ;;  %v2563_v10 = vsel %vm2549_vm2, %v6242_v63, %v2556_v6  ;;  %v8385_v19 = vsel %vm2551_vm3, %v6244_v0, %v2558_v7  ;;  %v7650_v63 = vld [vmem:[#allocation5 + $0x340] ss:$16 sps:$4 sm:$0xff]   ;;  %v7653_v0 = vld [vmem:[#allocation5 + $0x128] ss:$16 sps:$4 sm:$0xff]   ;;  %v7654_v2 = vld [vmem:[#allocation5 + $0x364] ss:$16 sps:$4 sm:$0xff]  }
 0x22b   :  { %3327 = vmatprep.mubr.f32.mxu1 %v2563_v10  ;;  %5486 = vmatprep.subr.bf16.mxu0 %v7591_v4  ;;  %v7657_v3 = vld [vmem:[#allocation5 + $0x14c] ss:$16 sps:$4 sm:$0xff]   ;;  %v7656_v4 = vld [vmem:[#allocation5 + $0x360] ss:$16 sps:$4 sm:$0xff]   ;;  %v7659_v6 = vld [vmem:[#allocation5 + $0x148] ss:$16 sps:$4 sm:$0xff]  }
 0x22c   :  { %3328 = vmatmul.mubr.f32.vlgmr.msra.gmra.mrb[10].mxu1 %v8382_v16  ;;  %v7660_v7 = vld [vmem:[#allocation5 + $0x384] ss:$16 sps:$4 sm:$0xff]  }
 0x22d   :  { %5676 = vmatpush1.bf16.msra.mxu1 %v7590_v8  ;;  %3398 = vmatprep.mubr.f32.mxu1 %v8385_v19  ;;  %v7663_v8 = vld [vmem:[#allocation5 + $0x16c] ss:$16 sps:$4 sm:$0xff]  }
 0x22e   :  { %5488 = vmatpush1.bf16.msra.mxu0 %v7593_v13  ;;  %5678 = vmatprep.subr.bf16.mxu1 %v7594_v14  ;;  %v7665_v13 = vld [vmem:[#allocation5 + $0x168] ss:$16 sps:$4 sm:$0xff]   ;;  %v7666_v14 = vld [vmem:[#allocation5 + $0x3a4] ss:$16 sps:$4 sm:$0xff]  }
 0x22f   :  { %5834 = vmatprep.subr.bf16.mxu0 %v7597_v17  ;;  %v7669_v17 = vld [vmem:[#allocation5 + $0x18c] ss:$16 sps:$4 sm:$0xff]  }
 0x231   :  { %5680 = vmatpush1.bf16.msra.mxu1 %v7596_v20  ;;  %2262 = vmatmul.mubr.f32.vlgmr.msra.gmra.mrb[2].mxu0 %v8339_v12  ;;  %v7617_v12 = vld [vmem:[#allocation5 + $0x68] ss:$16 sps:$4 sm:$0xff]   ;;  %v7668_v20 = vld [vmem:[#allocation5 + $0x3a0] ss:$16 sps:$4 sm:$0xff]  }
 0x232   :  { %5836 = vmatpush1.bf16.msra.mxu0 %v7599_v21  ;;  %3611 = vmatprep.mubr.f32.mxu0 %v2563_v10  ;;  %v7662_v10 = vld [vmem:[#allocation5 + $0x380] ss:$16 sps:$4 sm:$0xff]   ;;  %v7671_v21 = vld [vmem:[#allocation5 + $0x188] ss:$16 sps:$4 sm:$0xff]  }
 0x233   :  { %5682 = vmatprep.subr.bf16.mxu1 %v7600_v22  ;;  %5838 = vmatprep.subr.bf16.mxu0 %v7603_v23  ;;  %v7672_v22 = vld [vmem:[#allocation5 + $0x3c4] ss:$16 sps:$4 sm:$0xff]   ;;  %v1392_v23 = vrot.slane %v8367_v28, %v8278_v48 }
 0x235   :  { %5684 = vmatpush1.bf16.msra.mxu1 %v7602_v25  ;;  %v7675_v25 = vld [vmem:[#allocation5 + $0x1ac] ss:$16 sps:$4 sm:$0xff]  }
 0x236   :  { %5840 = vmatpush1.bf16.msra.mxu0 %v7605_v26  ;;  %5686 = vmatprep.subr.bf16.mxu1 %v7606_v27  ;;  %v1408_v26 = vrot.slane %v8367_v28, %v1359_v9  ;;  %v7674_v27 = vld [vmem:[#allocation5 + $0x3c0] ss:$16 sps:$4 sm:$0xff]   ;;  %v7735_v9 = vld [vmem:[#allocation5 + $0x404] ss:$16 sps:$4 sm:$0xff]  }
 0x237   :  { %5842 = vmatprep.subr.bf16.mxu0 %v7609_v49  ;;  %v7677_v49 = vld [vmem:[#allocation5 + $0x1a8] ss:$16 sps:$4 sm:$0xff]  }
 0x239   :  { %5688 = vmatpush1.bf16.msra.mxu1 %v7608_v51  ;;  %v7678_v51 = vld [vmem:[#allocation5 + $0x3e4] ss:$16 sps:$4 sm:$0xff]  }
 0x23a   :  { %5844 = vmatpush1.bf16.msra.mxu0 %v7611_v29  ;;  %5690 = vmatprep.subr.bf16.mxu1 %v7612_v30  ;;  %v6243_v29 = vadd.f32 %v8380_v59, %v1392_v23  ;;  %v7681_v30 = vld [vmem:[#allocation5 + $0x1cc] ss:$16 sps:$4 sm:$0xff]   ;;  %v7737_v59 = vld [vmem:[#allocation5 + $0x400] ss:$16 sps:$4 sm:$0xff]  }
 0x23b   :  { %5846 = vmatprep.subr.bf16.mxu0 %v7615_v31  ;;  %v7785_v23 = vld [vmem:[#allocation5 + $0x500] ss:$16 sps:$4 sm:$0xff]  }
 0x23c   :  { %vm2550_vm4 = vcmp.gt.f32.partialorder %v6243_v29, 0.0 }
 0x23d   :  { %5692 = vmatpush1.bf16.msra.mxu1 %v7614_v32 }
 0x23e   :  { %5848 = vmatpush1.bf16.msra.mxu0 %v7617_v12  ;;  %5694 = vmatprep.subr.bf16.mxu1 %v7618_v55  ;;  %v7680_v12 = vld [vmem:[#allocation5 + $0x3e0] ss:$16 sps:$4 sm:$0xff]  }
 0x23f   :  { %5850 = vmatprep.subr.bf16.mxu0 %v7621_v33  ;;  %v7683_v33 = vld [vmem:[#allocation5 + $0x1c8] ss:$16 sps:$4 sm:$0xff]  }
 0x241   :  { %5696 = vmatpush1.bf16.msra.mxu1 %v7620_v34 }
 0x242   :  { %5852 = vmatpush1.bf16.msra.mxu0 %v7623_v35  ;;  %5698 = vmatprep.subr.bf16.mxu1 %v7624_v37  ;;  %v2557_v35 = vmul.f32 0.01, %v6243_v29  ;;  %v7684_v37 = vld [vmem:[#allocation5 + $0x1ec] ss:$16 sps:$4 sm:$0xff]  }
 0x243   :  { %5854 = vmatprep.subr.bf16.mxu0 %v7627_v11 }
 0x244   :  { %v4605_v41 = vpop.f32.mrb[2].mxu1 }
 0x245   :  { %5700 = vmatpush1.bf16.msra.mxu1 %v7626_v38  ;;  %v4606_v44 = vpop.f32.mrb[3].mxu1  ;;  %v7686_v38 = vld [vmem:[#allocation5 + $0x1e8] ss:$16 sps:$4 sm:$0xff]  }
 0x246   :  { %5856 = vmatpush1.bf16.msra.mxu0 %v7629_v39  ;;  %5702 = vmatprep.subr.bf16.mxu1 %v7630_v40  ;;  %v4607_v50 = vadd.f32 %v4606_v44, %v4605_v41  ;;  %v7741_v39 = vld [vmem:[#allocation5 + $0x424] ss:$16 sps:$4 sm:$0xff]   ;;  %v8397_v40 = vsel %vm2550_vm4, %v6243_v29, %v2557_v35  ;;  %v7743_v41 = vld [vmem:[#allocation5 + $0x420] ss:$16 sps:$4 sm:$0xff]   ;;  %v7690_v44 = vld [vmem:[#allocation5 + $0x22c] ss:$16 sps:$4 sm:$0xff]  }
 0x247   :  { %5858 = vmatprep.subr.bf16.mxu0 %v7633_v24  ;;  %v7687_v24 = vld [vmem:[#allocation5 + $0x20c] ss:$16 sps:$4 sm:$0xff]   ;;  %v7795_v29 = vld [vmem:[#allocation5 + $0x544] ss:$16 sps:$4 sm:$0xff]  }
 0x248   :  { %v2335_v31 = vadd.f32 %v4607_v50, %v1408_v26  ;;  %v7692_v50 = vld [vmem:[#allocation5 + $0x228] ss:$16 sps:$4 sm:$0xff]   ;;  %v7789_v26 = vld [vmem:[#allocation5 + $0x524] ss:$16 sps:$4 sm:$0xff]   ;;  %v7720_v35 = vld [vmem:[#allocation5 + $0x36c] ss:$16 sps:$4 sm:$0xff]  }
 0x249   :  { %5704 = vmatpush1.bf16.msra.mxu1 %v7632_v42  ;;  %v7689_v42 = vld [vmem:[#allocation5 + $0x208] ss:$16 sps:$4 sm:$0xff]  }
 0x24a   :  { %5860 = vmatpush1.bf16.msra.mxu0 %v7635_v15  ;;  %5706 = vmatprep.subr.bf16.mxu1 %v7636_v46  ;;  %v7747_v15 = vld [vmem:[#allocation5 + $0x444] ss:$16 sps:$4 sm:$0xff]   ;;  %v7749_v46 = vld [vmem:[#allocation5 + $0x440] ss:$16 sps:$4 sm:$0xff]  }
 0x24b   :  { %5862 = vmatprep.subr.bf16.mxu0 %v7639_v52  ;;  %v7753_v52 = vld [vmem:[#allocation5 + $0x464] ss:$16 sps:$4 sm:$0xff]  }
 0x24d   :  { %5708 = vmatpush1.bf16.msra.mxu1 %v7638_v53  ;;  %v7693_v53 = vld [vmem:[#allocation5 + $0x24c] ss:$16 sps:$4 sm:$0xff]  }
 0x24e   :  { %5864 = vmatpush1.bf16.msra.mxu0 %v7641_v54  ;;  %5710 = vmatprep.subr.bf16.mxu1 %v7642_v56  ;;  %v7755_v54 = vld [vmem:[#allocation5 + $0x460] ss:$16 sps:$4 sm:$0xff]   ;;  %v7695_v56 = vld [vmem:[#allocation5 + $0x248] ss:$16 sps:$4 sm:$0xff]  }
 0x24f   :  { %5866 = vmatprep.subr.bf16.mxu0 %v7645_v57  ;;  %v7759_v57 = vld [vmem:[#allocation5 + $0x484] ss:$16 sps:$4 sm:$0xff]  }
 0x251   :  { %5712 = vmatpush1.bf16.msra.mxu1 %v7644_v58  ;;  %v7696_v58 = vld [vmem:[#allocation5 + $0x26c] ss:$16 sps:$4 sm:$0xff]  }
 0x252   :  { %5868 = vmatpush1.bf16.msra.mxu0 %v7647_v60  ;;  %5714 = vmatprep.subr.bf16.mxu1 %v7648_v61  ;;  %v7698_v60 = vld [vmem:[#allocation5 + $0x268] ss:$16 sps:$4 sm:$0xff]   ;;  %v7765_v61 = vld [vmem:[#allocation5 + $0x4a4] ss:$16 sps:$4 sm:$0xff]  }
 0x253   :  { %5870 = vmatprep.subr.bf16.mxu0 %v7651_v62  ;;  %v7767_v62 = vld [vmem:[#allocation5 + $0x4a0] ss:$16 sps:$4 sm:$0xff]  }
 0x255   :  { %5716 = vmatpush1.bf16.msra.mxu1 %v7650_v63  ;;  %v7701_v63 = vld [vmem:[#allocation5 + $0x288] ss:$16 sps:$4 sm:$0xff]  }
 0x256   :  { %5872 = vmatpush1.bf16.msra.mxu0 %v7653_v0  ;;  %5718 = vmatprep.subr.bf16.mxu1 %v7654_v2  ;;  %v7771_v0 = vld [vmem:[#allocation5 + $0x4c4] ss:$16 sps:$4 sm:$0xff]   ;;  %v7702_v2 = vld [vmem:[#allocation5 + $0x2ac] ss:$16 sps:$4 sm:$0xff]  }
 0x257   :  { %5874 = vmatprep.subr.bf16.mxu0 %v7657_v3  ;;  %v7773_v3 = vld [vmem:[#allocation5 + $0x4c0] ss:$16 sps:$4 sm:$0xff]  }
 0x259   :  { %5720 = vmatpush1.bf16.msra.mxu1 %v7656_v4  ;;  %v7704_v4 = vld [vmem:[#allocation5 + $0x2a8] ss:$16 sps:$4 sm:$0xff]  }
 0x25a   :  { %5876 = vmatpush1.bf16.msra.mxu0 %v7659_v6  ;;  %5722 = vmatprep.subr.bf16.mxu1 %v7660_v7  ;;  %v7777_v6 = vld [vmem:[#allocation5 + $0x4e4] ss:$16 sps:$4 sm:$0xff]   ;;  %v7705_v7 = vld [vmem:[#allocation5 + $0x2cc] ss:$16 sps:$4 sm:$0xff]  }
 0x25b   :  { %5878 = vmatprep.subr.bf16.mxu0 %v7663_v8 }
 0x25d   :  { %5724 = vmatpush1.bf16.msra.mxu1 %v7662_v10 }
 0x25e   :  { %5880 = vmatpush1.bf16.msra.mxu0 %v7665_v13  ;;  %5726 = vmatprep.subr.bf16.mxu1 %v7666_v14  ;;  %v7779_v13 = vld [vmem:[#allocation5 + $0x4e0] ss:$16 sps:$4 sm:$0xff]   ;;  %v7707_v14 = vld [vmem:[#allocation5 + $0x2c8] ss:$16 sps:$4 sm:$0xff]  }
 0x25f   :  { %5882 = vmatprep.subr.bf16.mxu0 %v7669_v17 }
 0x261   :  { %5728 = vmatpush1.bf16.msra.mxu1 %v7668_v20  ;;  %v7783_v20 = vld [vmem:[#allocation5 + $0x504] ss:$16 sps:$4 sm:$0xff]  }
 0x262   :  { %5884 = vmatpush1.bf16.msra.mxu0 %v7671_v21  ;;  %5730 = vmatprep.subr.bf16.mxu1 %v7672_v22  ;;  %v7708_v21 = vld [vmem:[#allocation5 + $0x2ec] ss:$16 sps:$4 sm:$0xff]  }
 0x263   :  { %5886 = vmatprep.subr.bf16.mxu0 %v7675_v25  ;;  %v7710_v25 = vld [vmem:[#allocation5 + $0x2e8] ss:$16 sps:$4 sm:$0xff]  }
 0x264   :  { %v4640_v32 = vpop.f32.mrb[4].mxu1 }
 0x265   :  { %5732 = vmatpush1.bf16.msra.mxu1 %v7674_v27  ;;  %v4641_v55 = vpop.f32.mrb[5].mxu1  ;;  %v7711_v27 = vld [vmem:[#allocation5 + $0x30c] ss:$16 sps:$4 sm:$0xff]  }
 0x266   :  { %5888 = vmatpush1.bf16.msra.mxu0 %v7677_v49  ;;  %5734 = vmatprep.subr.bf16.mxu1 %v7678_v51  ;;  %v4642_v34 = vadd.f32 %v4641_v55, %v4640_v32  ;;  %v7791_v49 = vld [vmem:[#allocation5 + $0x520] ss:$16 sps:$4 sm:$0xff]   ;;  %v7713_v51 = vld [vmem:[#allocation5 + $0x308] ss:$16 sps:$4 sm:$0xff]   ;;  %v7717_v55 = vld [vmem:[#allocation5 + $0x34c] ss:$16 sps:$4 sm:$0xff]  }
 0x267   :  { %5890 = vmatprep.subr.bf16.mxu0 %v7681_v30  ;;  %v7714_v30 = vld [vmem:[#allocation5 + $0x32c] ss:$16 sps:$4 sm:$0xff]   ;;  %v7716_v32 = vld [vmem:[#allocation5 + $0x328] ss:$16 sps:$4 sm:$0xff]  }
 0x268   :  { %v8395_v11 = vadd.f32 %v4642_v34, %v2335_v31  ;;  %v7797_v31 = vld [vmem:[#allocation5 + $0x540] ss:$16 sps:$4 sm:$0xff]   ;;  %v7719_v34 = vld [vmem:[#allocation5 + $0x348] ss:$16 sps:$4 sm:$0xff]  }
 0x269   :  { %5736 = vmatpush1.bf16.msra.mxu1 %v7680_v12  ;;  %v7801_v12 = vld [vmem:[#allocation5 + $0x564] ss:$16 sps:$4 sm:$0xff]  }
 0x26a   :  { %5892 = vmatpush1.bf16.msra.mxu0 %v7683_v33  ;;  %5738 = vmatprep.subr.bf16.mxu1 %v7735_v9  ;;  %v7803_v33 = vld [vmem:[#allocation5 + $0x560] ss:$16 sps:$4 sm:$0xff]   ;;  %v7807_v9 = vld [vmem:[#allocation5 + $0x584] ss:$16 sps:$4 sm:$0xff]  }
 0x26b   :  { %5894 = vmatprep.subr.bf16.mxu0 %v7684_v37  ;;  %v7809_v37 = vld [vmem:[#allocation5 + $0x580] ss:$16 sps:$4 sm:$0xff]  }
 0x26c   :  { %3399 = vmatmul.mubr.f32.vlgmr.msra.gmra.mrb[10].mxu1 %v8397_v40 }
 0x26d   :  { %5740 = vmatpush1.bf16.msra.mxu1 %v7737_v59  ;;  %v7813_v59 = vld [vmem:[#allocation5 + $0x5a4] ss:$16 sps:$4 sm:$0xff]  }
 0x26e   :  { %5896 = vmatpush1.bf16.msra.mxu0 %v7686_v38  ;;  %5742 = vmatprep.subr.bf16.mxu1 %v7741_v39  ;;  %v7723_v38 = vld [vmem:[#allocation5 + $0x38c] ss:$16 sps:$4 sm:$0xff]   ;;  %v7815_v39 = vld [vmem:[#allocation5 + $0x5a0] ss:$16 sps:$4 sm:$0xff]  }
 0x26f   :  { %5898 = vmatprep.subr.bf16.mxu0 %v7687_v24  ;;  %v7725_v24 = vld [vmem:[#allocation5 + $0x388] ss:$16 sps:$4 sm:$0xff]  }
 0x271   :  { %3612 = vmatmul.mubr.f32.vlgmr.msra.gmra.mrb[4].mxu0 %v8382_v16  ;;  %5744 = vmatpush1.bf16.msra.mxu1 %v7743_v41  ;;  %v7761_v16 = vld [vmem:[#allocation5 + $0x480] ss:$16 sps:$4 sm:$0xff]   ;;  %v7819_v41 = vld [vmem:[#allocation5 + $0x5c4] ss:$16 sps:$4 sm:$0xff]  }
 0x272   :  { %5900 = vmatpush1.bf16.msra.mxu0 %v7689_v42  ;;  %3682 = vmatprep.mubr.f32.mxu0 %v8385_v19  ;;  %v7699_v19 = vld [vmem:[#allocation5 + $0x28c] ss:$16 sps:$4 sm:$0xff]  }
 0x273   :  { %5902 = vmatprep.subr.bf16.mxu0 %v7690_v44  ;;  %5746 = vmatprep.subr.bf16.mxu1 %v7747_v15  ;;  %v7726_v42 = vld [vmem:[#allocation5 + $0x3ac] ss:$16 sps:$4 sm:$0xff]   ;;  %v7821_v44 = vld [vmem:[#allocation5 + $0x5c0] ss:$16 sps:$4 sm:$0xff]   ;;  %v7728_v15 = vld [vmem:[#allocation5 + $0x3a8] ss:$16 sps:$4 sm:$0xff]  }
 0x275   :  { %5748 = vmatpush1.bf16.msra.mxu1 %v7749_v46  ;;  %v7825_v46 = vld [vmem:[#allocation5 + $0x5e4] ss:$16 sps:$4 sm:$0xff]  }
 0x276   :  { %5904 = vmatpush1.bf16.msra.mxu0 %v7692_v50  ;;  %5750 = vmatprep.subr.bf16.mxu1 %v7753_v52  ;;  %v7729_v50 = vld [vmem:[#allocation5 + $0x3cc] ss:$16 sps:$4 sm:$0xff]  }
 0x277   :  { %5906 = vmatprep.subr.bf16.mxu0 %v7693_v53 }
 0x279   :  { %5752 = vmatpush1.bf16.msra.mxu1 %v7755_v54  ;;  %v7827_v54 = vld [vmem:[#allocation5 + $0x5e0] ss:$16 sps:$4 sm:$0xff]  }
 0x27a   :  { %5908 = vmatpush1.bf16.msra.mxu0 %v7695_v56  ;;  %5754 = vmatprep.subr.bf16.mxu1 %v7759_v57  ;;  %v7731_v57 = vld [vmem:[#allocation5 + $0x3c8] ss:$16 sps:$4 sm:$0xff]  }
 0x27b   :  { %5910 = vmatprep.subr.bf16.mxu0 %v7696_v58  ;;  %v7831_v58 = vld [vmem:[#allocation5 + $0x604] ss:$16 sps:$4 sm:$0xff]  }
 0x27d   :  { %5756 = vmatpush1.bf16.msra.mxu1 %v7761_v16  ;;  %v7732_v16 = vld [vmem:[#allocation5 + $0x3ec] ss:$16 sps:$4 sm:$0xff]  }
 0x27e   :  { %5912 = vmatpush1.bf16.msra.mxu0 %v7698_v60  ;;  %5758 = vmatprep.subr.bf16.mxu1 %v7765_v61  ;;  %v7734_v60 = vld [vmem:[#allocation5 + $0x3e8] ss:$16 sps:$4 sm:$0xff]   ;;  %v7738_v61 = vld [vmem:[#allocation5 + $0x40c] ss:$16 sps:$4 sm:$0xff]  }
 0x27f   :  { %5914 = vmatprep.subr.bf16.mxu0 %v7699_v19  ;;  %v7740_v19 = vld [vmem:[#allocation5 + $0x408] ss:$16 sps:$4 sm:$0xff]  }
 0x281   :  { %5760 = vmatpush1.bf16.msra.mxu1 %v7767_v62  ;;  %v7744_v62 = vld [vmem:[#allocation5 + $0x42c] ss:$16 sps:$4 sm:$0xff]  }
 0x282   :  { %5916 = vmatpush1.bf16.msra.mxu0 %v7701_v63  ;;  %5762 = vmatprep.subr.bf16.mxu1 %v7771_v0  ;;  %v7746_v63 = vld [vmem:[#allocation5 + $0x428] ss:$16 sps:$4 sm:$0xff]   ;;  %v7750_v0 = vld [vmem:[#allocation5 + $0x44c] ss:$16 sps:$4 sm:$0xff]  }
 0x283   :  { %5918 = vmatprep.subr.bf16.mxu0 %v7702_v2  ;;  %v7752_v2 = vld [vmem:[#allocation5 + $0x448] ss:$16 sps:$4 sm:$0xff]  }
 0x284   :  { %v4675_v8 = vpop.f32.mrb[6].mxu1 }
 0x285   :  { %v4676_v10 = vpop.f32.mrb[7].mxu1  ;;  %5764 = vmatpush1.bf16.msra.mxu1 %v7773_v3  ;;  %v7756_v3 = vld [vmem:[#allocation5 + $0x46c] ss:$16 sps:$4 sm:$0xff]  }
 0x286   :  { %5920 = vmatpush1.bf16.msra.mxu0 %v7704_v4  ;;  %v4677_v17 = vadd.f32 %v4676_v10, %v4675_v8  ;;  %5766 = vmatprep.subr.bf16.mxu1 %v7777_v6  ;;  %v7758_v4 = vld [vmem:[#allocation5 + $0x468] ss:$16 sps:$4 sm:$0xff]   ;;  %v7762_v6 = vld [vmem:[#allocation5 + $0x48c] ss:$16 sps:$4 sm:$0xff]  }
 0x287   :  { %5922 = vmatprep.subr.bf16.mxu0 %v7705_v7  ;;  %v7764_v7 = vld [vmem:[#allocation5 + $0x488] ss:$16 sps:$4 sm:$0xff]   ;;  %v7768_v8 = vld [vmem:[#allocation5 + $0x4ac] ss:$16 sps:$4 sm:$0xff]  }
 0x288   :  { %v2475_v22 = vadd.f32 %v4677_v17, %v8395_v11  ;;  %v7722_v11 = vld [vmem:[#allocation5 + $0x368] ss:$16 sps:$4 sm:$0xff]  }
 0x289   :  { %5768 = vmatpush1.bf16.msra.mxu1 %v7779_v13  ;;  %v7770_v10 = vld [vmem:[#allocation5 + $0x4a8] ss:$16 sps:$4 sm:$0xff]  }
 0x28a   :  { %5924 = vmatpush1.bf16.msra.mxu0 %v7707_v14  ;;  %5770 = vmatprep.subr.bf16.mxu1 %v7783_v20  ;;  %v7776_v13 = vld [vmem:[#allocation5 + $0x4c8] ss:$16 sps:$4 sm:$0xff]   ;;  %v7780_v14 = vld [vmem:[#allocation5 + $0x4ec] ss:$16 sps:$4 sm:$0xff]  }
 0x28b   :  { %5926 = vmatprep.subr.bf16.mxu0 %v7708_v21  ;;  %v7782_v17 = vld [vmem:[#allocation5 + $0x4e8] ss:$16 sps:$4 sm:$0xff]   ;;  %v7786_v20 = vld [vmem:[#allocation5 + $0x50c] ss:$16 sps:$4 sm:$0xff]  }
 0x28c   :  { %v7788_v21 = vld [vmem:[#allocation5 + $0x508] ss:$16 sps:$4 sm:$0xff]  }
 0x28d   :  { %5772 = vmatpush1.bf16.msra.mxu1 %v7785_v23  ;;  %v7794_v23 = vld [vmem:[#allocation5 + $0x528] ss:$16 sps:$4 sm:$0xff]  }
 0x28e   :  { %5928 = vmatpush1.bf16.msra.mxu0 %v7710_v25  ;;  %5774 = vmatprep.subr.bf16.mxu1 %v7789_v26  ;;  %v7798_v25 = vld [vmem:[#allocation5 + $0x54c] ss:$16 sps:$4 sm:$0xff]   ;;  %v7800_v26 = vld [vmem:[#allocation5 + $0x548] ss:$16 sps:$4 sm:$0xff]  }
 0x28f   :  { %5930 = vmatprep.subr.bf16.mxu0 %v7711_v27  ;;  %v7804_v27 = vld [vmem:[#allocation5 + $0x56c] ss:$16 sps:$4 sm:$0xff]  }
 0x291   :  { %5776 = vmatpush1.bf16.msra.mxu1 %v7791_v49  ;;  %v7806_v49 = vld [vmem:[#allocation5 + $0x568] ss:$16 sps:$4 sm:$0xff]  }
 0x292   :  { %5932 = vmatpush1.bf16.msra.mxu0 %v7713_v51  ;;  %5778 = vmatprep.subr.bf16.mxu1 %v7795_v29  ;;  %v7810_v51 = vld [vmem:[#allocation5 + $0x58c] ss:$16 sps:$4 sm:$0xff]   ;;  %v7812_v29 = vld [vmem:[#allocation5 + $0x588] ss:$16 sps:$4 sm:$0xff]  }
 0x293   :  { %5934 = vmatprep.subr.bf16.mxu0 %v7714_v30  ;;  %v7816_v30 = vld [vmem:[#allocation5 + $0x5ac] ss:$16 sps:$4 sm:$0xff]  }
 0x295   :  { %5780 = vmatpush1.bf16.msra.mxu1 %v7797_v31  ;;  %v7818_v31 = vld [vmem:[#allocation5 + $0x5a8] ss:$16 sps:$4 sm:$0xff]  }
 0x296   :  { %5936 = vmatpush1.bf16.msra.mxu0 %v7716_v32  ;;  %5782 = vmatprep.subr.bf16.mxu1 %v7801_v12  ;;  %v7822_v32 = vld [vmem:[#allocation5 + $0x5cc] ss:$16 sps:$4 sm:$0xff]   ;;  %v7824_v12 = vld [vmem:[#allocation5 + $0x5c8] ss:$16 sps:$4 sm:$0xff]  }
 0x297   :  { %5938 = vmatprep.subr.bf16.mxu0 %v7717_v55  ;;  %v7828_v55 = vld [vmem:[#allocation5 + $0x5ec] ss:$16 sps:$4 sm:$0xff]  }
 0x299   :  { %5784 = vmatpush1.bf16.msra.mxu1 %v7803_v33  ;;  %v7830_v33 = vld [vmem:[#allocation5 + $0x5e8] ss:$16 sps:$4 sm:$0xff]  }
 0x29a   :  { %5940 = vmatpush1.bf16.msra.mxu0 %v7719_v34  ;;  %5786 = vmatprep.subr.bf16.mxu1 %v7807_v9  ;;  %v7834_v34 = vld [vmem:[#allocation5 + $0x60c] ss:$16 sps:$4 sm:$0xff]   ;;  %v1403_v9 = vsub.s32 5, %v8275_v43 }
 0x29b   :  { %5942 = vmatprep.subr.bf16.mxu0 %v7720_v35  ;;  %v1400_v35 = vrot.slane %v8367_v28, %v8312_v18  ;;  %v7839_v18 = vld [vmem:[#allocation5 + $0x620] ss:$16 sps:$4 sm:$0xff]  }
 0x29d   :  { %5788 = vmatpush1.bf16.msra.mxu1 %v7809_v37  ;;  %v1404_v37 = vrot.slane %v8367_v28, %v1403_v9  ;;  %v7842_v28 = vld [vmem:[#allocation5 + $0x628] ss:$16 sps:$4 sm:$0xff]   ;;  %v7900_v9 = vld [vmem:[#allocation7 + $0x74] ss:$8 sps:$4 sm:$0xff]  }
 0x29e   :  { %5944 = vmatpush1.bf16.msra.mxu0 %v7722_v11  ;;  %5790 = vmatprep.subr.bf16.mxu1 %v7813_v59 }
 0x29f   :  { %5946 = vmatprep.subr.bf16.mxu0 %v7723_v38 }
 0x2a1   :  { %5792 = vmatpush1.bf16.msra.mxu1 %v7815_v39 }
 0x2a2   :  { %5948 = vmatpush1.bf16.msra.mxu0 %v7725_v24  ;;  %5794 = vmatprep.subr.bf16.mxu1 %v7819_v41 }
 0x2a3   :  { %5950 = vmatprep.subr.bf16.mxu0 %v7726_v42  ;;  %v7833_v42 = vld [vmem:[#allocation5 + $0x600] ss:$16 sps:$4 sm:$0xff]  }
 0x2a4   :  { %v2544_v52 = vpop.f32.mrb[8].mxu1 }
 0x2a5   :  { %v8403_v53 = vadd.f32 %v2544_v52, %v2475_v22  ;;  %5796 = vmatpush1.bf16.msra.mxu1 %v7821_v44  ;;  %v4781_v56 = vpop.f32.mrb[9].mxu1  ;;  %v7792_v22 = vld [vmem:[#allocation5 + $0x52c] ss:$16 sps:$4 sm:$0xff]   ;;  %v7836_v44 = vld [vmem:[#allocation5 + $0x608] ss:$16 sps:$4 sm:$0xff]  }
 0x2a6   :  { %5952 = vmatpush1.bf16.msra.mxu0 %v7728_v15  ;;  %5798 = vmatprep.subr.bf16.mxu1 %v7825_v46  ;;  %v7837_v46 = vld [vmem:[#allocation5 + $0x624] ss:$16 sps:$4 sm:$0xff]   ;;  %v7846_v56 = vld [vmem:[#allocation5 + $0x64c] ss:$16 sps:$4 sm:$0xff]  }
 0x2a7   :  { %5954 = vmatprep.subr.bf16.mxu0 %v7729_v50  ;;  %v7840_v50 = vld [vmem:[#allocation5 + $0x62c] ss:$16 sps:$4 sm:$0xff]   ;;  %vm2554_vm7 = vcmp.gt.f32.partialorder %v8403_v53, 0.0 }
 0x2a9   :  { %5800 = vmatpush1.bf16.msra.mxu1 %v7827_v54  ;;  %v7843_v54 = vld [vmem:[#allocation5 + $0x644] ss:$16 sps:$4 sm:$0xff]  }
 0x2aa   :  { %5956 = vmatpush1.bf16.msra.mxu0 %v7731_v57  ;;  %5802 = vmatprep.subr.bf16.mxu1 %v7831_v58  ;;  %v7845_v57 = vld [vmem:[#allocation5 + $0x640] ss:$16 sps:$4 sm:$0xff]   ;;  %v7848_v58 = vld [vmem:[#allocation5 + $0x648] ss:$16 sps:$4 sm:$0xff]  }
 0x2ab   :  { %5958 = vmatprep.subr.bf16.mxu0 %v7732_v16  ;;  %v7849_v16 = vld [vmem:[#allocation5 + $0x664] ss:$16 sps:$4 sm:$0xff]  }
 0x2ae   :  { %5960 = vmatpush1.bf16.msra.mxu0 %v7734_v60  ;;  %v7852_v60 = vld [vmem:[#allocation5 + $0x66c] ss:$16 sps:$4 sm:$0xff]  }
 0x2af   :  { %5962 = vmatprep.subr.bf16.mxu0 %v7738_v61  ;;  %v7851_v61 = vld [vmem:[#allocation5 + $0x660] ss:$16 sps:$4 sm:$0xff]  }
 0x2b1   :  { %3683 = vmatmul.mubr.f32.vlgmr.msra.gmra.mrb[4].mxu0 %v8397_v40  ;;  %v7774_v40 = vld [vmem:[#allocation5 + $0x4cc] ss:$16 sps:$4 sm:$0xff]  }
 0x2b2   :  { %5964 = vmatpush1.bf16.msra.mxu0 %v7740_v19  ;;  %v7854_v19 = vld [vmem:[#allocation5 + $0x668] ss:$16 sps:$4 sm:$0xff]  }
 0x2b3   :  { %5966 = vmatprep.subr.bf16.mxu0 %v7744_v62  ;;  %v7855_v62 = vld [vmem:[#allocation5 + $0x684] ss:$16 sps:$4 sm:$0xff]  }
 0x2b6   :  { %5968 = vmatpush1.bf16.msra.mxu0 %v7746_v63  ;;  %v7858_v63 = vld [vmem:[#allocation5 + $0x68c] ss:$16 sps:$4 sm:$0xff]  }
 0x2b7   :  { %5970 = vmatprep.subr.bf16.mxu0 %v7750_v0  ;;  %v7857_v0 = vld [vmem:[#allocation5 + $0x680] ss:$16 sps:$4 sm:$0xff]  }
 0x2ba   :  { %5972 = vmatpush1.bf16.msra.mxu0 %v7752_v2  ;;  %v7860_v2 = vld [vmem:[#allocation5 + $0x688] ss:$16 sps:$4 sm:$0xff]  }
 0x2bb   :  { %5974 = vmatprep.subr.bf16.mxu0 %v7756_v3  ;;  %v7861_v3 = vld [vmem:[#allocation5 + $0x6a4] ss:$16 sps:$4 sm:$0xff]  }
 0x2be   :  { %5976 = vmatpush1.bf16.msra.mxu0 %v7758_v4  ;;  %v7864_v4 = vld [vmem:[#allocation5 + $0x6ac] ss:$16 sps:$4 sm:$0xff]  }
 0x2bf   :  { %5978 = vmatprep.subr.bf16.mxu0 %v7762_v6  ;;  %v7863_v6 = vld [vmem:[#allocation5 + $0x6a0] ss:$16 sps:$4 sm:$0xff]  }
 0x2c2   :  { %5980 = vmatpush1.bf16.msra.mxu0 %v7764_v7  ;;  %v7866_v7 = vld [vmem:[#allocation5 + $0x6a8] ss:$16 sps:$4 sm:$0xff]  }
 0x2c3   :  { %5982 = vmatprep.subr.bf16.mxu0 %v7768_v8  ;;  %v7867_v8 = vld [vmem:[#allocation5 + $0x6c4] ss:$16 sps:$4 sm:$0xff]  }
 0x2c6   :  { %5984 = vmatpush1.bf16.msra.mxu0 %v7770_v10  ;;  %v7870_v10 = vld [vmem:[#allocation5 + $0x6cc] ss:$16 sps:$4 sm:$0xff]  }
 0x2c7   :  { %5986 = vmatprep.subr.bf16.mxu0 %v7774_v40  ;;  %v7869_v40 = vld [vmem:[#allocation5 + $0x6c0] ss:$16 sps:$4 sm:$0xff]  }
 0x2ca   :  { %5988 = vmatpush1.bf16.msra.mxu0 %v7776_v13  ;;  %v7872_v13 = vld [vmem:[#allocation5 + $0x6c8] ss:$16 sps:$4 sm:$0xff]  }
 0x2cb   :  { %5990 = vmatprep.subr.bf16.mxu0 %v7780_v14  ;;  %v7873_v14 = vld [vmem:[#allocation5 + $0x6e4] ss:$16 sps:$4 sm:$0xff]  }
 0x2ce   :  { %5992 = vmatpush1.bf16.msra.mxu0 %v7782_v17  ;;  %v7876_v17 = vld [vmem:[#allocation5 + $0x6ec] ss:$16 sps:$4 sm:$0xff]  }
 0x2cf   :  { %5994 = vmatprep.subr.bf16.mxu0 %v7786_v20  ;;  %v7875_v20 = vld [vmem:[#allocation5 + $0x6e0] ss:$16 sps:$4 sm:$0xff]  }
 0x2d2   :  { %5996 = vmatpush1.bf16.msra.mxu0 %v7788_v21  ;;  %v7878_v21 = vld [vmem:[#allocation5 + $0x6e8] ss:$16 sps:$4 sm:$0xff]  }
 0x2d3   :  { %5998 = vmatprep.subr.bf16.mxu0 %v7792_v22  ;;  %v7879_v22 = vld [vmem:[#allocation7 + $0x4] ss:$8 sps:$4 sm:$0xff]  }
 0x2d6   :  { %6000 = vmatpush1.bf16.msra.mxu0 %v7794_v23  ;;  %v2561_v23 = vmul.f32 0.01, %v8403_v53 }
 0x2d7   :  { %6002 = vmatprep.subr.bf16.mxu0 %v7798_v25  ;;  %v7881_v25 = vld [vmem:[#allocation7] ss:$8 sps:$4 sm:$0xff]  }
 0x2da   :  { %6004 = vmatpush1.bf16.msra.mxu0 %v7800_v26  ;;  %v7882_v26 = vld [vmem:[#allocation7 + $0x14] ss:$8 sps:$4 sm:$0xff]  }
 0x2db   :  { %6006 = vmatprep.subr.bf16.mxu0 %v7804_v27  ;;  %v2568_v27 = vsel %vm2554_vm7, %v8403_v53, %v2561_v23  ;;  %v7896_v53 = vld [vmem:[#allocation7 + $0x50] ss:$8 sps:$4 sm:$0xff]  }
 0x2de   :  { %6008 = vmatpush1.bf16.msra.mxu0 %v7806_v49  ;;  %v7884_v49 = vld [vmem:[#allocation7 + $0x10] ss:$8 sps:$4 sm:$0xff]  }
 0x2df   :  { %6010 = vmatprep.subr.bf16.mxu0 %v7810_v51  ;;  %v7885_v51 = vld [vmem:[#allocation7 + $0x24] ss:$8 sps:$4 sm:$0xff]  }
 0x2e2   :  { %6012 = vmatpush1.bf16.msra.mxu0 %v7812_v29  ;;  %v7887_v29 = vld [vmem:[#allocation7 + $0x20] ss:$8 sps:$4 sm:$0xff]  }
 0x2e3   :  { %6014 = vmatprep.subr.bf16.mxu0 %v7816_v30  ;;  %v7888_v30 = vld [vmem:[#allocation7 + $0x34] ss:$8 sps:$4 sm:$0xff]  }
 0x2e6   :  { %6016 = vmatpush1.bf16.msra.mxu0 %v7818_v31  ;;  %v7890_v31 = vld [vmem:[#allocation7 + $0x30] ss:$8 sps:$4 sm:$0xff]  }
 0x2e7   :  { %6018 = vmatprep.subr.bf16.mxu0 %v7822_v32  ;;  %v7891_v32 = vld [vmem:[#allocation7 + $0x44] ss:$8 sps:$4 sm:$0xff]  }
 0x2ea   :  { %6020 = vmatpush1.bf16.msra.mxu0 %v7824_v12  ;;  %v7893_v12 = vld [vmem:[#allocation7 + $0x40] ss:$8 sps:$4 sm:$0xff]  }
 0x2eb   :  { %6022 = vmatprep.subr.bf16.mxu0 %v7828_v55  ;;  %v7894_v55 = vld [vmem:[#allocation7 + $0x54] ss:$8 sps:$4 sm:$0xff]  }
 0x2ee   :  { %6024 = vmatpush1.bf16.msra.mxu0 %v7830_v33  ;;  %v7897_v33 = vld [vmem:[#allocation7 + $0x64] ss:$8 sps:$4 sm:$0xff]  }
 0x2ef   :  { %6026 = vmatprep.subr.bf16.mxu0 %v7834_v34  ;;  %v7899_v34 = vld [vmem:[#allocation7 + $0x60] ss:$8 sps:$4 sm:$0xff]  }
 0x304   :  { %v2263_v11 = vpop.f32.mrb[2].mxu0 }
 0x305   :  { %v6245_v59 = vadd.f32 %v2263_v11, %v1400_v35  ;;  %v2265_v38 = vpop.f32.mrb[3].mxu0  ;;  %v7902_v35 = vld [vmem:[#allocation7 + $0x70] ss:$8 sps:$4 sm:$0xff]   ;;  %v7905_v11 = vld [vmem:[#allocation7 + $0x80] ss:$8 sps:$4 sm:$0xff]  }
 0x306   :  { %v6246_v39 = vadd.f32 %v2265_v38, %v1404_v37  ;;  %v7903_v37 = vld [vmem:[#allocation7 + $0x84] ss:$8 sps:$4 sm:$0xff]   ;;  %v7908_v38 = vld [vmem:[#allocation7 + $0x90] ss:$8 sps:$4 sm:$0xff]  }
 0x307   :  { %v2559_v24 = vmul.f32 0.01, %v6245_v59  ;;  %vm2552_vm5 = vcmp.gt.f32.partialorder %v6245_v59, 0.0 }
 0x308   :  { %v2560_v41 = vmul.f32 0.01, %v6246_v39  ;;  %vm2553_vm6 = vcmp.gt.f32.partialorder %v6246_v39, 0.0 }
 0x309   :  { %v2566_v52 = vsel %vm2552_vm5, %v6245_v59, %v2559_v24  ;;  %v7906_v59 = vld [vmem:[#allocation7 + $0x94] ss:$8 sps:$4 sm:$0xff]   ;;  %v7911_v24 = vld [vmem:[#allocation7 + $0xa0] ss:$8 sps:$4 sm:$0xff]  }
 0x30a   :  { %v2567_v15 = vsel %vm2553_vm6, %v6246_v39, %v2560_v41  ;;  %v7909_v39 = vld [vmem:[#allocation7 + $0xa4] ss:$8 sps:$4 sm:$0xff]   ;;  %v7912_v41 = vld [vmem:[#allocation7 + $0xb4] ss:$8 sps:$4 sm:$0xff]  }
 0x30b   :  { %3469 = vmatprep.mubr.f32.mxu1 %v2567_v15  ;;  %3753 = vmatprep.mubr.f32.mxu0 %v2567_v15  ;;  %v7917_v15 = vld [vmem:[#allocation7 + $0xc0] ss:$8 sps:$4 sm:$0xff]  }
 0x30c   :  { %3470 = vmatmul.mubr.f32.vlgmr.msra.gmra.mrb[10].mxu1 %v2566_v52  ;;  %3754 = vmatmul.mubr.f32.vlgmr.msra.gmra.mrb[4].mxu0 %v2566_v52  ;;  %v7921_v52 = vld [vmem:[#allocation7 + $0xe4] ss:$8 sps:$4 sm:$0xff]  }
 0x30d   :  { %5804 = vmatpush1.bf16.msra.mxu1 %v7833_v42  ;;  %6028 = vmatpush1.bf16.msra.mxu0 %v7836_v44  ;;  %v7914_v42 = vld [vmem:[#allocation7 + $0xb0] ss:$8 sps:$4 sm:$0xff]   ;;  %v7915_v44 = vld [vmem:[#allocation7 + $0xc4] ss:$8 sps:$4 sm:$0xff]  }
 0x30e   :  { %5806 = vmatprep.subr.bf16.mxu1 %v7837_v46  ;;  %6030 = vmatprep.subr.bf16.mxu0 %v7840_v50  ;;  %v7918_v46 = vld [vmem:[#allocation7 + $0xd4] ss:$8 sps:$4 sm:$0xff]   ;;  %v7920_v50 = vld [vmem:[#allocation7 + $0xd0] ss:$8 sps:$4 sm:$0xff]  }
 0x30f   :  { %3540 = vmatprep.mubr.f32.mxu1 %v8153_v45  ;;  %3824 = vmatprep.mubr.f32.mxu0 %v8153_v45 }
 0x311   :  { %5808 = vmatpush1.bf16.msra.mxu1 %v7839_v18  ;;  %6032 = vmatpush1.bf16.msra.mxu0 %v7842_v28  ;;  %v7923_v18 = vld [vmem:[#allocation7 + $0xe0] ss:$8 sps:$4 sm:$0xff]   ;;  %v7924_v28 = vld [vmem:[#allocation7 + $0xf4] ss:$8 sps:$4 sm:$0xff]  }
 0x312   :  { %5810 = vmatprep.subr.bf16.mxu1 %v7843_v54  ;;  %6034 = vmatprep.subr.bf16.mxu0 %v7846_v56  ;;  %v7926_v54 = vld [vmem:[#allocation7 + $0xf0] ss:$8 sps:$4 sm:$0xff]   ;;  %v7927_v56 = vld [vmem:[#allocation7 + $0x104] ss:$8 sps:$4 sm:$0xff]  }
 0x315   :  { %5812 = vmatpush1.bf16.msra.mxu1 %v7845_v57  ;;  %6036 = vmatpush1.bf16.msra.mxu0 %v7848_v58  ;;  %v4558_v57 = vld [vmem:[#allocation8 + $0x40] sm:$0xff]  }
 0x316   :  { %5814 = vmatprep.subr.bf16.mxu1 %v7849_v16  ;;  %6038 = vmatprep.subr.bf16.mxu0 %v7852_v60  ;;  %v4456_v58 = vld [vmem:[#allocation8] sm:$0xff]   ;;  %v4559_v16 = vld [vmem:[#allocation8 + $0x48] sm:$0xff]  }
 0x317   :  { %v4551_v60 = vld [vmem:[#allocation8 + $0x8] sm:$0xff]  }
 0x319   :  { %5816 = vmatpush1.bf16.msra.mxu1 %v7851_v61  ;;  %6040 = vmatpush1.bf16.msra.mxu0 %v7854_v19  ;;  %v4560_v61 = vld [vmem:[#allocation8 + $0x50] sm:$0xff]  }
 0x31a   :  { %5818 = vmatprep.subr.bf16.mxu1 %v7855_v62  ;;  %6042 = vmatprep.subr.bf16.mxu0 %v7858_v63  ;;  %v4552_v19 = vld [vmem:[#allocation8 + $0x10] sm:$0xff]   ;;  %v4561_v62 = vld [vmem:[#allocation8 + $0x58] sm:$0xff]  }
 0x31b   :  { %v4553_v63 = vld [vmem:[#allocation8 + $0x18] sm:$0xff]  }
 0x31d   :  { %5820 = vmatpush1.bf16.msra.mxu1 %v7857_v0  ;;  %6044 = vmatpush1.bf16.msra.mxu0 %v7860_v2  ;;  %v4562_v0 = vld [vmem:[#allocation8 + $0x60] sm:$0xff]  }
 0x31e   :  { %5822 = vmatprep.subr.bf16.mxu1 %v7861_v3  ;;  %6046 = vmatprep.subr.bf16.mxu0 %v7864_v4  ;;  %v4554_v2 = vld [vmem:[#allocation8 + $0x20] sm:$0xff]   ;;  %v4563_v3 = vld [vmem:[#allocation8 + $0x68] sm:$0xff]  }
 0x31f   :  { %v4555_v4 = vld [vmem:[#allocation8 + $0x28] sm:$0xff]  }
 0x321   :  { %5824 = vmatpush1.bf16.msra.mxu1 %v7863_v6  ;;  %6048 = vmatpush1.bf16.msra.mxu0 %v7866_v7  ;;  %v8415_v6 = vld [vmem:[#allocation11 + $0x7] sm:$0xf] }
 0x322   :  { %5826 = vmatprep.subr.bf16.mxu1 %v7867_v8  ;;  %6050 = vmatprep.subr.bf16.mxu0 %v7870_v10  ;;  %v3246_v7 = vrot.slane %v8415_v6, %v8295_v5  ;;  %v3250_v8 = vrot.slane %v8415_v6, %v8370_v36  ;;  %v3258_v10 = vrot.slane %v8415_v6, %v1395_v47 }
 0x325   :  { %5828 = vmatpush1.bf16.msra.mxu1 %v7869_v40  ;;  %6052 = vmatpush1.bf16.msra.mxu0 %v7872_v13 }
 0x326   :  { %5830 = vmatprep.subr.bf16.mxu1 %v7873_v14  ;;  %6054 = vmatprep.subr.bf16.mxu0 %v7876_v17 }
 0x329   :  { %5832 = vmatpush1.bf16.msra.mxu1 %v7875_v20  ;;  %6056 = vmatpush1.bf16.msra.mxu0 %v7878_v21 }
 0x32a   :  { %6058 = vmatprep.subr.bf16.mxu1 %v7879_v22  ;;  %6186 = vmatprep.subr.bf16.mxu0 %v4558_v57  ;;  %v7972_v57 = vld [vmem:[#allocation7 + $0x1f4] ss:$8 sps:$4 sm:$0xff]  }
 0x32c   :  { %3541 = vmatmul.mubr.f32.vlgmr.msra.gmra.mrb[10].mxu1 %v2568_v27  ;;  %3825 = vmatmul.mubr.f32.vlgmr.msra.gmra.mrb[4].mxu0 %v2568_v27  ;;  %v7929_v27 = vld [vmem:[#allocation7 + $0x100] ss:$8 sps:$4 sm:$0xff]  }
 0x32d   :  { %6060 = vmatpush1.bf16.msra.mxu1 %v7881_v25  ;;  %6188 = vmatpush3.bf16.msra.mxu0 %v4456_v58 }
 0x32e   :  { %6062 = vmatprep.subr.bf16.mxu1 %v7882_v26  ;;  %6190 = vmatprep.subr.bf16.mxu0 %v4559_v16  ;;  %v7974_v16 = vld [vmem:[#allocation7 + $0x1f0] ss:$8 sps:$4 sm:$0xff]  }
 0x331   :  { %6064 = vmatpush1.bf16.msra.mxu1 %v7884_v49  ;;  %6192 = vmatpush3.bf16.msra.mxu0 %v4551_v60 }
 0x332   :  { %6066 = vmatprep.subr.bf16.mxu1 %v7885_v51  ;;  %6194 = vmatprep.subr.bf16.mxu0 %v4560_v61  ;;  %v7930_v51 = vld [vmem:[#allocation7 + $0x114] ss:$8 sps:$4 sm:$0xff]  }
 0x335   :  { %6068 = vmatpush1.bf16.msra.mxu1 %v7887_v29  ;;  %6196 = vmatpush3.bf16.msra.mxu0 %v4552_v19  ;;  %v7932_v29 = vld [vmem:[#allocation7 + $0x110] ss:$8 sps:$4 sm:$0xff]  }
 0x336   :  { %6070 = vmatprep.subr.bf16.mxu1 %v7888_v30  ;;  %6198 = vmatprep.subr.bf16.mxu0 %v4561_v62  ;;  %v7933_v30 = vld [vmem:[#allocation7 + $0x124] ss:$8 sps:$4 sm:$0xff]   ;;  %v4564_v19 = vld [vmem:[#allocation8 + $0x70] sm:$0xff]  }
 0x337   :  { %v4556_v62 = vld [vmem:[#allocation8 + $0x30] sm:$0xff]  }
 0x339   :  { %6072 = vmatpush1.bf16.msra.mxu1 %v7890_v31  ;;  %6200 = vmatpush3.bf16.msra.mxu0 %v4553_v63  ;;  %v7935_v31 = vld [vmem:[#allocation7 + $0x120] ss:$8 sps:$4 sm:$0xff]   ;;  %v4565_v63 = vld [vmem:[#allocation8 + $0x78] sm:$0xff]  }
 0x33a   :  { %6074 = vmatprep.subr.bf16.mxu1 %v7891_v32  ;;  %6202 = vmatprep.subr.bf16.mxu0 %v4562_v0  ;;  %v7936_v32 = vld [vmem:[#allocation7 + $0x134] ss:$8 sps:$4 sm:$0xff]   ;;  %v4035_v0 = vld [vmem:[#allocation11 + $0xb] sm:$0x3] }
 0x33d   :  { %6076 = vmatpush1.bf16.msra.mxu1 %v7893_v12  ;;  %6204 = vmatpush3.bf16.msra.mxu0 %v4554_v2  ;;  %v7938_v12 = vld [vmem:[#allocation7 + $0x130] ss:$8 sps:$4 sm:$0xff]   ;;  %v4040_v2 = vrot.slane %v4035_v0, %v8295_v5  ;;  %v4566_v5 = vld [vmem:[#allocation10 + $0x8] sm:$0xff]  }
 0x33e   :  { %6078 = vmatprep.subr.bf16.mxu1 %v7894_v55  ;;  %6206 = vmatprep.subr.bf16.mxu0 %v4563_v3  ;;  %v7939_v55 = vld [vmem:[#allocation7 + $0x144] ss:$8 sps:$4 sm:$0xff]   ;;  %v4044_v3 = vrot.slane %v4035_v0, %v8370_v36  ;;  %v4567_v36 = vld [vmem:[#allocation10 + $0x10] sm:$0xff]  }
 0x341   :  { %6080 = vmatpush1.bf16.msra.mxu1 %v7896_v53  ;;  %6208 = vmatpush3.bf16.msra.mxu0 %v4555_v4  ;;  %v7941_v53 = vld [vmem:[#allocation7 + $0x140] ss:$8 sps:$4 sm:$0xff]  }
 0x342   :  { %6082 = vmatprep.subr.bf16.mxu1 %v7897_v33  ;;  %v7942_v33 = vld [vmem:[#allocation7 + $0x154] ss:$8 sps:$4 sm:$0xff]   ;;  %6210 = vmatprep.subr.bf16.mxu0 %v4564_v19 }
 0x345   :  { %6084 = vmatpush1.bf16.msra.mxu1 %v7899_v34  ;;  %v7944_v34 = vld [vmem:[#allocation7 + $0x150] ss:$8 sps:$4 sm:$0xff]   ;;  %6212 = vmatpush3.bf16.msra.mxu0 %v4556_v62 }
 0x346   :  { %6086 = vmatprep.subr.bf16.mxu1 %v7900_v9  ;;  %v7945_v9 = vld [vmem:[#allocation7 + $0x164] ss:$8 sps:$4 sm:$0xff]   ;;  %6214 = vmatprep.subr.bf16.mxu0 %v4565_v63 }
 0x349   :  { %6088 = vmatpush1.bf16.msra.mxu1 %v7902_v35  ;;  %v7947_v35 = vld [vmem:[#allocation7 + $0x160] ss:$8 sps:$4 sm:$0xff]  }
 0x34a   :  { %6090 = vmatprep.subr.bf16.mxu1 %v7903_v37  ;;  %v7948_v37 = vld [vmem:[#allocation7 + $0x174] ss:$8 sps:$4 sm:$0xff]  }
 0x34d   :  { %6092 = vmatpush1.bf16.msra.mxu1 %v7905_v11  ;;  %v7950_v11 = vld [vmem:[#allocation7 + $0x170] ss:$8 sps:$4 sm:$0xff]  }
 0x34e   :  { %6094 = vmatprep.subr.bf16.mxu1 %v7906_v59  ;;  %v7951_v59 = vld [vmem:[#allocation7 + $0x184] ss:$8 sps:$4 sm:$0xff]  }
 0x351   :  { %6096 = vmatpush1.bf16.msra.mxu1 %v7908_v38  ;;  %v7953_v38 = vld [vmem:[#allocation7 + $0x180] ss:$8 sps:$4 sm:$0xff]  }
 0x352   :  { %6098 = vmatprep.subr.bf16.mxu1 %v7909_v39  ;;  %v7954_v39 = vld [vmem:[#allocation7 + $0x194] ss:$8 sps:$4 sm:$0xff]  }
 0x355   :  { %6100 = vmatpush1.bf16.msra.mxu1 %v7911_v24  ;;  %v7956_v24 = vld [vmem:[#allocation7 + $0x190] ss:$8 sps:$4 sm:$0xff]  }
 0x356   :  { %6102 = vmatprep.subr.bf16.mxu1 %v7912_v41  ;;  %v7957_v41 = vld [vmem:[#allocation7 + $0x1a4] ss:$8 sps:$4 sm:$0xff]  }
 0x359   :  { %6104 = vmatpush1.bf16.msra.mxu1 %v7914_v42  ;;  %v7959_v42 = vld [vmem:[#allocation7 + $0x1a0] ss:$8 sps:$4 sm:$0xff]  }
 0x35a   :  { %6106 = vmatprep.subr.bf16.mxu1 %v7915_v44  ;;  %v7960_v44 = vld [vmem:[#allocation7 + $0x1b4] ss:$8 sps:$4 sm:$0xff]  }
 0x35d   :  { %6108 = vmatpush1.bf16.msra.mxu1 %v7917_v15  ;;  %v7962_v15 = vld [vmem:[#allocation7 + $0x1b0] ss:$8 sps:$4 sm:$0xff]  }
 0x35e   :  { %6110 = vmatprep.subr.bf16.mxu1 %v7918_v46  ;;  %v7963_v46 = vld [vmem:[#allocation7 + $0x1c4] ss:$8 sps:$4 sm:$0xff]  }
 0x361   :  { %6112 = vmatpush1.bf16.msra.mxu1 %v7920_v50  ;;  %v7965_v50 = vld [vmem:[#allocation7 + $0x1c0] ss:$8 sps:$4 sm:$0xff]  }
 0x362   :  { %6114 = vmatprep.subr.bf16.mxu1 %v7921_v52  ;;  %v7966_v52 = vld [vmem:[#allocation7 + $0x1d4] ss:$8 sps:$4 sm:$0xff]  }
 0x365   :  { %6116 = vmatpush1.bf16.msra.mxu1 %v7923_v18  ;;  %v7968_v18 = vld [vmem:[#allocation7 + $0x1d0] ss:$8 sps:$4 sm:$0xff]  }
 0x366   :  { %6118 = vmatprep.subr.bf16.mxu1 %v7924_v28  ;;  %v7969_v28 = vld [vmem:[#allocation7 + $0x1e4] ss:$8 sps:$4 sm:$0xff]  }
 0x369   :  { %6120 = vmatpush1.bf16.msra.mxu1 %v7926_v54  ;;  %v3254_v54 = vrot.slane %v8415_v6, %v8278_v48  ;;  %v4557_v48 = vld [vmem:[#allocation8 + $0x38] sm:$0xff]  }
 0x36a   :  { %6122 = vmatprep.subr.bf16.mxu1 %v7927_v56  ;;  %v7971_v56 = vld [vmem:[#allocation7 + $0x1e0] ss:$8 sps:$4 sm:$0xff]   ;;  %6216 = vmatpush3.bf16.msra.mxu0 %v4557_v48 }
 0x36b   :  { %6217 = vmatprep.subr.bf16.mxu0 %v8154_v1 }
 0x3ff   :  { %v3542_v40 = vpop.f32.mrb[10].mxu1  ;;  %v8424_v13 = vpop.f32.mrb[4].mxu0 }
 0x400   :  { %v6247_v14 = vadd.f32 %v3542_v40, %v3246_v7  ;;  %v3544_v17 = vpop.f32.mrb[11].mxu1  ;;  %v3828_v20 = vpop.f32.mrb[5].mxu0  ;;  %v6249_v58 = vadd.f32 %v8424_v13, %v3254_v54 }
 0x401   :  { %v6248_v21 = vadd.f32 %v3544_v17, %v3250_v8  ;;  %v6250_v22 = vadd.f32 %v3828_v20, %v3258_v10  ;;  %v4568_v20 = vld [vmem:[#allocation10 + $0x18] sm:$0xff]  }
 0x402   :  { %v3835_v23 = vmul.f32 0.01, %v6247_v14  ;;  %vm3831_vm8 = vcmp.gt.f32.partialorder %v6247_v14, 0.0  ;;  %v3837_v60 = vmul.f32 0.01, %v6249_v58  ;;  %vm3833_vm11 = vcmp.gt.f32.partialorder %v6249_v58, 0.0 }
 0x403   :  { %v3836_v25 = vmul.f32 0.01, %v6248_v21  ;;  %v3838_v26 = vmul.f32 0.01, %v6250_v22  ;;  %vm3832_vm9 = vcmp.gt.f32.partialorder %v6248_v21, 0.0  ;;  %vm3834_vm10 = vcmp.gt.f32.partialorder %v6250_v22, 0.0 }
 0x404   :  { %v3839_v43 = vsel %vm3831_vm8, %v6247_v14, %v3835_v23  ;;  %v3841_v61 = vsel %vm3833_vm11, %v6249_v58, %v3837_v60  ;;  %v4520_v14 = vld [vmem:[#allocation10] sm:$0xff]   ;;  %v4572_v23 = vld [vmem:[#allocation10 + $0x38] sm:$0xff]  }
 0x405   :  { %v3840_v49 = vsel %vm3832_vm9, %v6248_v21, %v3836_v25  ;;  %v3842_v47 = vsel %vm3834_vm10, %v6250_v22, %v3838_v26  ;;  %v4569_v21 = vld [vmem:[#allocation10 + $0x20] sm:$0xff]   ;;  %v4570_v22 = vld [vmem:[#allocation10 + $0x28] sm:$0xff]  }
 0x406   :  { %4111 = vmatprep.mubr.f32.mxu1 %v3840_v49  ;;  %v4259_v26 = vld [vmem:[#allocation11 + $0xd] sm:$0x1] }
 0x407   :  { %4112 = vmatmul.mubr.f32.vlgmr.msra.gmra.mrb[12].mxu1 %v3839_v43 }
 0x408   :  { %6124 = vmatpush1.bf16.msra.mxu1 %v7929_v27  ;;  %4182 = vmatprep.mubr.f32.mxu1 %v3842_v47 }
 0x409   :  { %6126 = vmatprep.subr.bf16.mxu1 %v7930_v51 }
 0x40c   :  { %6128 = vmatpush1.bf16.msra.mxu1 %v7932_v29  ;;  %v4365_v29 = vld [vmem:[#allocation11 + $0xe] sm:$0x1] }
 0x40d   :  { %6130 = vmatprep.subr.bf16.mxu1 %v7933_v30 }
 0x410   :  { %6132 = vmatpush1.bf16.msra.mxu1 %v7935_v31 }
 0x411   :  { %6134 = vmatprep.subr.bf16.mxu1 %v7936_v32 }
 0x414   :  { %6136 = vmatpush1.bf16.msra.mxu1 %v7938_v12 }
 0x415   :  { %6138 = vmatprep.subr.bf16.mxu1 %v7939_v55 }
 0x418   :  { %6140 = vmatpush1.bf16.msra.mxu1 %v7941_v53 }
 0x419   :  { %6142 = vmatprep.subr.bf16.mxu1 %v7942_v33 }
 0x41c   :  { %6144 = vmatpush1.bf16.msra.mxu1 %v7944_v34 }
 0x41d   :  { %6146 = vmatprep.subr.bf16.mxu1 %v7945_v9 }
 0x420   :  { %6148 = vmatpush1.bf16.msra.mxu1 %v7947_v35 }
 0x421   :  { %6150 = vmatprep.subr.bf16.mxu1 %v7948_v37 }
 0x424   :  { %6152 = vmatpush1.bf16.msra.mxu1 %v7950_v11 }
 0x425   :  { %6154 = vmatprep.subr.bf16.mxu1 %v7951_v59 }
 0x428   :  { %6156 = vmatpush1.bf16.msra.mxu1 %v7953_v38 }
 0x429   :  { %6158 = vmatprep.subr.bf16.mxu1 %v7954_v39 }
 0x42c   :  { %6160 = vmatpush1.bf16.msra.mxu1 %v7956_v24 }
 0x42d   :  { %6162 = vmatprep.subr.bf16.mxu1 %v7957_v41 }
 0x430   :  { %6164 = vmatpush1.bf16.msra.mxu1 %v7959_v42 }
 0x431   :  { %6166 = vmatprep.subr.bf16.mxu1 %v7960_v44 }
 0x434   :  { %6168 = vmatpush1.bf16.msra.mxu1 %v7962_v15 }
 0x435   :  { %6170 = vmatprep.subr.bf16.mxu1 %v7963_v46 }
 0x438   :  { %6172 = vmatpush1.bf16.msra.mxu1 %v7965_v50 }
 0x439   :  { %6174 = vmatprep.subr.bf16.mxu1 %v7966_v52 }
 0x43c   :  { %6176 = vmatpush1.bf16.msra.mxu1 %v7968_v18 }
 0x43d   :  { %6178 = vmatprep.subr.bf16.mxu1 %v7969_v28 }
 0x440   :  { %6180 = vmatpush1.bf16.msra.mxu1 %v7971_v56 }
 0x441   :  { %6182 = vmatprep.subr.bf16.mxu1 %v7972_v57 }
 0x444   :  { %6184 = vmatpush1.bf16.msra.mxu1 %v7974_v16 }
 0x447   :  { %4183 = vmatmul.mubr.f32.vlgmr.msra.gmra.mrb[12].mxu1 %v3841_v61 }
 0x51a   :  { %v4184_v4 = vpop.f32.mrb[12].mxu1 }
 0x51b   :  { %v6251_v6 = vadd.f32 %v4184_v4, %v4040_v2  ;;  %v4186_v7 = vpop.f32.mrb[13].mxu1 }
 0x51c   :  { %v6252_v8 = vadd.f32 %v4186_v7, %v4044_v3 }
 0x51d   :  { %v4191_v10 = vmul.f32 0.01, %v6251_v6  ;;  %vm4189_vm12 = vcmp.gt.f32.partialorder %v6251_v6, 0.0 }
 0x51e   :  { %v4192_v40 = vmul.f32 0.01, %v6252_v8  ;;  %vm4190_vm13 = vcmp.gt.f32.partialorder %v6252_v8, 0.0 }
 0x51f   :  { %v4193_v17 = vsel %vm4189_vm12, %v6251_v6, %v4191_v10 }
 0x520   :  { %v4194_v13 = vsel %vm4190_vm13, %v6252_v8, %v4192_v40 }
 0x521   :  { %4324 = vmatprep.mubr.f32.mxu0 %v4194_v13 }
 0x522   :  { %4325 = vmatmul.mubr.f32.vlgmr.msra.gmra.mrb[6].mxu0 %v4193_v17 }
 0x523   :  { %6219 = vmatpush3.bf16.msra.mxu0 %v4520_v14  ;;  %4814 = vmatprep.mubr.msk.f32.mxu0 %vm8155_vm0, %v8153_v45  ;;  %v4571_v45 = vld [vmem:[#allocation10 + $0x30] sm:$0xff]  }
 0x524   :  { %6220 = vmatprep.subr.bf16.mxu0 %v8154_v1 }
 0x527   :  { %6222 = vmatpush3.bf16.msra.mxu0 %v4566_v5 }
 0x528   :  { %6223 = vmatprep.subr.bf16.mxu0 %v8154_v1 }
 0x52b   :  { %6225 = vmatpush3.bf16.msra.mxu0 %v4567_v36 }
 0x52c   :  { %6226 = vmatprep.subr.bf16.mxu0 %v8154_v1 }
 0x52f   :  { %6228 = vmatpush3.bf16.msra.mxu0 %v4568_v20 }
 0x530   :  { %6229 = vmatprep.subr.bf16.mxu0 %v8154_v1 }
 0x533   :  { %6231 = vmatpush3.bf16.msra.mxu0 %v4569_v21 }
 0x534   :  { %6232 = vmatprep.subr.bf16.mxu0 %v8154_v1 }
 0x537   :  { %6234 = vmatpush3.bf16.msra.mxu0 %v4570_v22 }
 0x538   :  { %6235 = vmatprep.subr.bf16.mxu0 %v8154_v1 }
 0x53b   :  { %6237 = vmatpush3.bf16.msra.mxu0 %v4571_v45 }
 0x53c   :  { %6238 = vmatprep.subr.bf16.mxu0 %v8154_v1 }
 0x53f   :  { %6240 = vmatpush3.bf16.msra.mxu0 %v4572_v23 }
 0x5f5   :  { %v4727_v25 = vpop.f32.mrb[6].mxu0 }
 0x5f6   :  { %v4728_v27 = vpop.f32.mrb[7].mxu0 }
 0x5f7   :  { %v4729_v49 = vadd.f32 %v4728_v27, %v4727_v25 }
 0x5f9   :  { %v4327_v51 = vadd.f32 %v4729_v49, %v4259_v26 }
 0x5fb   :  { %v4331_v43 = vmul.f32 0.01, %v4327_v51  ;;  %vm4330_vm14 = vcmp.gt.f32.partialorder %v4327_v51, 0.0 }
 0x5fd   :  { %v4332_v47 = vsel %vm4330_vm14, %v4327_v51, %v4331_v43 }
 0x5fe   :  { %4815 = vmatmul.mubr.f32.vlgmr.msra.gmra.mrb[8].mxu0 %v4332_v47 }
 0x6d1   :  { %v4432_v30 = vpop.f32.mrb[8].mxu0 }
 0x6d2   :  { %v4433_v31 = vadd.f32 %v4432_v30, %v4365_v29  ;;  %v4816_v32 = vpop.f32.mrb[9].mxu0 }
 0x6d4   :  { %4436 = vst [vmem:[#allocation13] sm:$0x1] %v4433_v31 }
 0x6d5   :  { %8118 = shalt.err (!%p8115_p10)
}
 0x6d6   :  { %s8119_s12 = scalar_lea.hbm %s8460_s7, 16 }
 0x6d7   :  { %p8120_p11 = scmp.ne.s32.totalorder %s8460_s7, %s8119_s12  ;;  %p8123_p12 = scmp.lt.u32.totalorder %s8119_s12, %s8460_s7 }
 0x6d9   :  { %p8125_p13 = pnand %p8123_p12, %p8120_p11 }
 0x6db   :  { %8128 = shalt.err (!%p8125_p13)
}
 0x6dc   :  { %4446 = dma.vmem_to_hbm [thread:$0]  %s4444_s30, 16, %s8460_s7, [#allocation4]  }
 0x6dd   :  { %8137 = dma.done.wait [#allocation4], 16  }
 0x6de   :  { %8138 = vsyncadd [#allocation4], 4294967280 }
 0x6df   :  { %4450 = vsyncpa [#allocation3], 1 }
 0x6e0   :  { %4451 = vsyncpa [#allocation6], 1 }
 0x6e1   :  { %4452 = vsyncpa [#allocation9], 1 }
 0x6e2   :  { %4453 = vsyncpa [#allocation12], 1 }
 0x6e3   :  { %4454 = vsyncpa [#allocation4], 1 }

</bundles_post_ra>
